<compile_context>
chip_gen: v6e
topology: v6e:2x2x1
jax: 0.10.0
libtpu: 0.0.40
codegen_flags: <defaults>
</compile_context>

<pallas_src>
import jax
import jax.numpy as jnp
from jax.experimental import pallas as pl
from jax.experimental.pallas import tpu as pltpu

EPS = 1e-5
_W_ALIGN = 16  # bf16 sublane packing: keep the collapsed output-width a multiple of 16


def _round_up(x, m):
    return ((x + m - 1) // m) * m


_vmem_limit_cache = None


def _vmem_limit_bytes():
    """Generation-aware scoped-VMEM limit (v5e/v6e: ~57 MiB, v7x: ~28 MiB)."""
    global _vmem_limit_cache
    if _vmem_limit_cache is None:
        cap = 128 * 1024 * 1024
        try:
            cap = int(getattr(pltpu.get_tpu_info(), "vmem_capacity_bytes", cap))
        except Exception:
            pass
        _vmem_limit_cache = max(24 * 1024 * 1024, min(int(cap * 0.45), 64 * 1024 * 1024))
    return _vmem_limit_cache


# ----------------------------------------------------------------------------
# Fused conv kernel: in-kernel im2col (tap accumulation) + BN shift
#                    (+ folded 1x1 shortcut) (+ residual) (+ ReLU)
# ----------------------------------------------------------------------------
def _make_conv_kernel(taps, sc_tap, Ho, Wo_eff, Cin, Cout, relu, has_res, has_sc):
    M = Ho * Wo_eff

    def kernel(*refs):
        it = iter(refs)
        xs_ref = next(it)           # (P, 1, Hq, Wq, Cin)
        w_ref = next(it)            # (9, Cin, Cout)
        t_ref = next(it)            # (1, Cout) f32
        if has_sc:
            scw_ref = next(it)      # (Cin, Cout_sc)
            sct_ref = next(it)      # (1, Cout_sc) f32
        if has_res:
            res_ref = next(it)      # (1, M, Cout)
        o_ref = next(it)            # (1, M, Cout)
        if has_sc:
            sco_ref = next(it)      # (1, M, Cout_sc)

        def tap2d(src, oi, oj):
            a = xs_ref[src, 0, oi:oi + Ho, oj:oj + Wo_eff, :]   # (Ho, Wo_eff, Cin)
            # Wo_eff % 16 == 0 -> layout-trivial collapse for bf16.
            return a.reshape(M, Cin)

        acc = None
        for t, (src, oi, oj) in enumerate(taps):
            d = jnp.dot(tap2d(src, oi, oj), w_ref[t],
                        preferred_element_type=jnp.float32)
            acc = d if acc is None else acc + d

        y = acc + t_ref[...]
        if has_res:
            y = y + res_ref[0].astype(jnp.float32)
        if relu:
            y = jnp.maximum(y, 0.0)
        o_ref[0] = y.astype(o_ref.dtype)

        if has_sc:
            src, oi, oj = sc_tap
            ysc = jnp.dot(tap2d(src, oi, oj), scw_ref[...],
                          preferred_element_type=jnp.float32) + sct_ref[...]
            sco_ref[0] = ysc.astype(sco_ref.dtype)

    return kernel


def fused_conv(x, w_taps, shift, *, stride, relu, residual=None,
               sc_w=None, sc_shift=None):
    """3x3 pad-1 conv (stride 1/2) with fused BN shift / residual / ReLU epilogue.

    x:        (N, H, W, Cin) bf16, NHWC
    w_taps:   (9, Cin, Cout) bf16, BN scale pre-folded
    shift:    (1, Cout) f32 (folded BN shift)
    residual: optional (N, Ho, Wo, Cout) bf16, added before the ReLU
    sc_w/sc_shift: optional folded 1x1-stride-s shortcut conv computed in the
                   same kernel (= centre tap with its own weight, no ReLU)
    """
    N, H, W, Cin = x.shape
    KHW, Cin_w, Cout = w_taps.shape
    assert KHW == 9 and Cin_w == Cin
    assert stride in (1, 2)
    s = stride

    Ho = (H - 1) // s + 1
    Wo = (W - 1) // s + 1
    Wo_eff = _round_up(Wo, _W_ALIGN)
    M = Ho * Wo_eff

    x = x.astype(jnp.bfloat16)
    w_taps = jnp.asarray(w_taps, jnp.bfloat16)
    shift = shift.reshape(1, Cout).astype(jnp.float32)

    # Zero-pad: 1 on top/left (conv padding), bottom/right so that every tap
    # window (incl. the Wo->Wo_eff alignment columns, discarded later) is valid.
    hp_need = s * (Ho - 1) + 3
    wp_need = s * (Wo_eff - 1) + 3
    pad_b = hp_need - H - 1
    pad_r = wp_need - W - 1
    xp = jnp.pad(x, ((0, 0), (1, pad_b), (1, pad_r), (0, 0)))

    if s == 1:
        xs = xp[None]                                             # (1, N, Hp, Wp, Cin)

        def tap_of(di, dj):
            return 0, di, dj
    else:
        # Parity (space-to-phase) decomposition: afterwards every tap read inside
        # the kernel is a unit-stride window (no strided loads).
        Hp, Wp = xp.shape[1], xp.shape[2]
        xp = jnp.pad(xp, ((0, 0), (0, Hp % 2), (0, Wp % 2), (0, 0)))
        xs = jnp.stack([xp[:, pi::2, pj::2, :]
                        for pi in (0, 1) for pj in (0, 1)], axis=0)  # (4, N, Hq, Wq, Cin)

        def tap_of(di, dj):
            return (di % 2) * 2 + (dj % 2), di // 2, dj // 2

    taps = tuple(tap_of(di, dj) for di in range(3) for dj in range(3))
    sc_tap = tap_of(1, 1)   # 1x1 / stride-s conv == the centre tap of the 3x3 grid

    P, _, Hq, Wq, _ = xs.shape
    has_res = residual is not None
    has_sc = sc_w is not None
    Cout_sc = sc_w.shape[1] if has_sc else 0

    args = [xs, w_taps, shift]
    in_specs = [
        pl.BlockSpec((P, 1, Hq, Wq, Cin), lambda n: (0, n, 0, 0, 0)),
        pl.BlockSpec((KHW, Cin, Cout), lambda n: (0, 0, 0)),
        pl.BlockSpec((1, Cout), lambda n: (0, 0)),
    ]
    if has_sc:
        sc_w = jnp.asarray(sc_w, jnp.bfloat16)
        sc_shift = sc_shift.reshape(1, Cout_sc).astype(jnp.float32)
        args += [sc_w, sc_shift]
        in_specs += [pl.BlockSpec((Cin, Cout_sc), lambda n: (0, 0)),
                     pl.BlockSpec((1, Cout_sc), lambda n: (0, 0))]
    if has_res:
        res = jnp.pad(residual.astype(jnp.bfloat16),
                      ((0, 0), (0, 0), (0, Wo_eff - Wo), (0, 0)))
        res = res.reshape(N, M, Cout)
        args.append(res)
        in_specs.append(pl.BlockSpec((1, M, Cout), lambda n: (n, 0, 0)))

    main_struct = jax.ShapeDtypeStruct((N, M, Cout), jnp.bfloat16)
    main_spec = pl.BlockSpec((1, M, Cout), lambda n: (n, 0, 0))
    if has_sc:
        out_shape = (main_struct, jax.ShapeDtypeStruct((N, M, Cout_sc), jnp.bfloat16))
        out_specs = (main_spec, pl.BlockSpec((1, M, Cout_sc), lambda n: (n, 0, 0)))
    else:
        out_shape = main_struct
        out_specs = main_spec

    flops = 2 * N * M * Cout * KHW * Cin
    bytes_accessed = xs.size * 2 + w_taps.size * 2 + shift.size * 4 + N * M * Cout * 2
    if has_sc:
        flops += 2 * N * M * Cout_sc * Cin
        bytes_accessed += sc_w.size * 2 + sc_shift.size * 4 + N * M * Cout_sc * 2
    if has_res:
        bytes_accessed += N * M * Cout * 2

    kernel = _make_conv_kernel(taps, sc_tap, Ho, Wo_eff, Cin, Cout,
                               relu, has_res, has_sc)
    outs = pl.pallas_call(
        kernel,
        out_shape=out_shape,
        grid=(N,),
        in_specs=in_specs,
        out_specs=out_specs,
        compiler_params=pltpu.CompilerParams(
            dimension_semantics=("parallel",),
            vmem_limit_bytes=_vmem_limit_bytes()),
        cost_estimate=pl.CostEstimate(flops=int(flops), transcendentals=0,
                                      bytes_accessed=int(bytes_accessed)),
    )(*args)

    def unflatten(o, c):
        return o.reshape(N, Ho, Wo_eff, c)[:, :, :Wo, :]

    if has_sc:
        out, sc_out = outs
        return unflatten(out, Cout), unflatten(sc_out, Cout_sc)
    return unflatten(outs, Cout)


# ----------------------------------------------------------------------------
# Fused AdaptiveAvgPool2d((1,1)) + Flatten + Linear
# ----------------------------------------------------------------------------
def _pool_fc_kernel(x_ref, w_ref, b_ref, o_ref):
    pooled = jnp.mean(x_ref[...].astype(jnp.float32), axis=1)        # (N, C)
    y = jnp.dot(pooled, w_ref[...], preferred_element_type=jnp.float32)
    o_ref[...] = (y + b_ref[...]).astype(o_ref.dtype)


def avgpool_fc(x_nhwc, fc_w, fc_b):
    N, H, W, C = x_nhwc.shape
    nc = fc_w.shape[1]
    x3 = x_nhwc.reshape(N, H * W, C)
    return pl.pallas_call(
        _pool_fc_kernel,
        out_shape=jax.ShapeDtypeStruct((N, nc), jnp.float32),
    )(x3, fc_w, fc_b)


# ----------------------------------------------------------------------------
# Model forward
# ----------------------------------------------------------------------------
def basic_block(x, blk):
    s = blk["stride"]
    if "sc_w" in blk:
        # conv1 + the 1x1 shortcut are computed in ONE pallas_call.
        h, sc = fused_conv(x, blk["w1"], blk["b1"], stride=s, relu=True,
                           sc_w=blk["sc_w"], sc_shift=blk["sc_b"])
    else:
        h = fused_conv(x, blk["w1"], blk["b1"], stride=s, relu=True)
        sc = x
    # conv2: BN shift + residual add + final ReLU fused in the epilogue.
    return fused_conv(h, blk["w2"], blk["b2"], stride=1, relu=True, residual=sc)


def resnet_forward(x_nchw, prep):
    x = jnp.transpose(x_nchw, (0, 2, 3, 1)).astype(jnp.bfloat16)      # NCHW -> NHWC
    # Stem: relu(conv1(x)) -- matches the reference forward (no stem BN).
    out = fused_conv(x, prep["stem_w"], prep["stem_b"], stride=1, relu=True)
    for blk in prep["blocks"]:
        out = basic_block(out, blk)
    return avgpool_fc(out, prep["fc_w"], prep["fc_b"])                # (N, classes)


# ----------------------------------------------------------------------------
# One-time parameter folding (hoisted out of the forward pass)
# ----------------------------------------------------------------------------
def prepare_params(params):
    def fold(w, bn):
        cout = w.shape[0]
        if bn is None:
            scale = jnp.ones((cout,), jnp.float32)
            shift = jnp.zeros((cout,), jnp.float32)
        else:
            g, b, m, v = bn
            scale = g * jax.lax.rsqrt(v + EPS)
            shift = b - m * scale
        # fold BN scale into the weights in f32, then cast once to bf16
        wt = jnp.transpose(w, (2, 3, 1, 0)).astype(jnp.float32) * scale
        return wt.astype(jnp.bfloat16), shift.reshape(1, cout).astype(jnp.float32)

    def fold3x3(w, bn):
        wt, sh = fold(w, bn)
        kh, kw, cin, cout = wt.shape
        return wt.reshape(kh * kw, cin, cout), sh

    def fold1x1(w, bn):
        wt, sh = fold(w, bn)
        return wt.reshape(wt.shape[2], wt.shape[3]), sh

    stem_w, stem_b = fold3x3(params["conv1_w"], None)
    prep = {"stem_w": stem_w, "stem_b": stem_b, "blocks": []}
    for lname in ("layer1", "layer2", "layer3", "layer4"):
        for p in params[lname]:
            blk = {"stride": p["stride"]}
            blk["w1"], blk["b1"] = fold3x3(p["conv1_w"], p["bn1"])
            blk["w2"], blk["b2"] = fold3x3(p["conv2_w"], p["bn2"])
            if "sc_w" in p:
                blk["sc_w"], blk["sc_b"] = fold1x1(p["sc_w"], p["bn_sc"])
            prep["blocks"].append(blk)
    prep["fc_w"] = params["fc_w"].T.astype(jnp.float32)               # (512, classes)
    prep["fc_b"] = params["fc_b"].reshape(1, -1).astype(jnp.float32)
    return prep


# ----------------------------------------------------------------------------
# Deterministic synthetic weights (PyTorch layouts)
# ----------------------------------------------------------------------------
def build_params(key, num_blocks=(1, 1, 1, 1), num_classes=10):
    keys = iter(jax.random.split(key, 512))

    def conv_w(cout, cin, k):
        fan_in = cin * k * k
        return jax.random.normal(next(keys), (cout, cin, k, k), jnp.float32) * (
            2.0 / fan_in) ** 0.5

    def bn_p(c):
        gamma = 1.0 + 0.1 * jax.random.normal(next(keys), (c,), jnp.float32)
        beta = 0.1 * jax.random.normal(next(keys), (c,), jnp.float32)
        mean = 0.1 * jax.random.normal(next(keys), (c,), jnp.float32)
        var = jnp.abs(1.0 + 0.1 * jax.random.normal(next(keys), (c,), jnp.float32))
        return (gamma, beta, mean, var)

    params = {"conv1_w": conv_w(64, 3, 3)}
    in_planes = 64
    cfg = [(64, num_blocks[0], 1), (128, num_blocks[1], 2),
           (256, num_blocks[2], 2), (512, num_blocks[3], 2)]
    for li, (planes, nb, stride) in enumerate(cfg, start=1):
        strides = [stride] + [1] * (nb - 1)
        blocks = []
        for s in strides:
            p = {"conv1_w": conv_w(planes, in_planes, 3), "bn1": bn_p(planes),
                 "conv2_w": conv_w(planes, planes, 3), "bn2": bn_p(planes),
                 "stride": s}
            if s != 1 or in_planes != planes:
                p["sc_w"] = conv_w(planes, in_planes, 1)
                p["bn_sc"] = bn_p(planes)
            blocks.append(p)
            in_planes = planes
        params[f"layer{li}"] = blocks

    params["fc_w"] = jax.random.normal(
        next(keys), (num_classes, 512), jnp.float32) * (1.0 / 512.0) ** 0.5
    params["fc_b"] = 0.01 * jax.random.normal(next(keys), (num_classes,), jnp.float32)
    return params


if __name__ == "__main__":
    key = jax.random.PRNGKey(0)
    pkey, xkey = jax.random.split(key)
    raw_params = build_params(pkey, num_blocks=(1, 1, 1, 1), num_classes=10)
    prep = prepare_params(raw_params)          # one-time weight folding (not per-forward)

    # small CIFAR-like input: batch=2, 3 channels, 16x16 spatial (NCHW like PyTorch)
    x = jax.random.normal(xkey, (2, 3, 16, 16), jnp.float32)

    logits = resnet_forward(x, prep)
    logits = jax.block_until_ready(logits)

    assert logits.shape == (2, 10), logits.shape
    assert bool(jnp.all(jnp.isfinite(logits)))
    print("KERNEL_OK")
</pallas_src>

<mosaic_0001>
module attributes {stable_mosaic.version = 11 : i64} {
  func.func @kernel(%arg0: i32, %arg1: memref<1x1x18x18x3xbf16, #tpu.memory_space<vmem>>, %arg2: memref<9x3x64xbf16, #tpu.memory_space<vmem>>, %arg3: memref<1x64xf32, #tpu.memory_space<vmem>>, %arg4: memref<1x256x64xbf16, #tpu.memory_space<vmem>>) attributes {dimension_semantics = [#tpu.dimension_semantics<parallel>], iteration_bounds = array<i64: 2>, scalar_prefetch = 0 : i64, scratch_operands = 0 : i64, tpu.core_type = #tpu.core_type<tc>, window_params = [{transform_indices = @transform_0, window_bounds = array<i64: 1, 1, 18, 18, 3>}, {pipeline_mode = #tpu.pipeline_mode<synchronous>, transform_indices = @transform_1, window_bounds = array<i64: 9, 3, 64>}, {pipeline_mode = #tpu.pipeline_mode<synchronous>, transform_indices = @transform_2, window_bounds = array<i64: 1, 64>}, {transform_indices = @transform_3, window_bounds = array<i64: 1, 256, 64>}]} {
    %c0 = arith.constant 0 : index
    %c0_0 = arith.constant 0 : index
    %c0_1 = arith.constant 0 : index
    %c0_2 = arith.constant 0 : index
    %c0_3 = arith.constant 0 : index
    %0 = vector.load %arg1[%c0, %c0_0, %c0_1, %c0_2, %c0_3] : memref<1x1x18x18x3xbf16, #tpu.memory_space<vmem>>, vector<1x1x16x16x3xbf16>
    %1 = vector.shape_cast %0 : vector<1x1x16x16x3xbf16> to vector<16x16x3xbf16>
    %2 = vector.shape_cast %1 : vector<16x16x3xbf16> to vector<256x3xbf16>
    %c0_4 = arith.constant 0 : index
    %c0_5 = arith.constant 0 : index
    %c0_6 = arith.constant 0 : index
    %3 = vector.load %arg2[%c0_4, %c0_5, %c0_6] : memref<9x3x64xbf16, #tpu.memory_space<vmem>>, vector<1x3x64xbf16>
    %4 = vector.shape_cast %3 : vector<1x3x64xbf16> to vector<3x64xbf16>
    %cst = arith.constant dense<0.000000e+00> : vector<256x64xf32>
    %5 = tpu.matmul %2, %4, %cst {dimension_numbers = #tpu.dot_dimension_numbers<[1], [0], [0], [1], [0, 0, 1, 1], [], []>} : vector<256x3xbf16>, vector<3x64xbf16>, vector<256x64xf32> -> vector<256x64xf32>
    %c0_7 = arith.constant 0 : index
    %c0_8 = arith.constant 0 : index
    %c0_9 = arith.constant 0 : index
    %c1 = arith.constant 1 : index
    %c0_10 = arith.constant 0 : index
    %6 = vector.load %arg1[%c0_7, %c0_8, %c0_9, %c1, %c0_10] : memref<1x1x18x18x3xbf16, #tpu.memory_space<vmem>>, vector<1x1x16x16x3xbf16>
    %7 = vector.shape_cast %6 : vector<1x1x16x16x3xbf16> to vector<16x16x3xbf16>
    %8 = vector.shape_cast %7 : vector<16x16x3xbf16> to vector<256x3xbf16>
    %c1_11 = arith.constant 1 : index
    %c0_12 = arith.constant 0 : index
    %c0_13 = arith.constant 0 : index
    %9 = vector.load %arg2[%c1_11, %c0_12, %c0_13] : memref<9x3x64xbf16, #tpu.memory_space<vmem>>, vector<1x3x64xbf16>
    %10 = vector.shape_cast %9 : vector<1x3x64xbf16> to vector<3x64xbf16>
    %cst_14 = arith.constant dense<0.000000e+00> : vector<256x64xf32>
    %11 = tpu.matmul %8, %10, %cst_14 {dimension_numbers = #tpu.dot_dimension_numbers<[1], [0], [0], [1], [0, 0, 1, 1], [], []>} : vector<256x3xbf16>, vector<3x64xbf16>, vector<256x64xf32> -> vector<256x64xf32>
    %12 = arith.addf %5, %11 : vector<256x64xf32>
    %c0_15 = arith.constant 0 : index
    %c0_16 = arith.constant 0 : index
    %c0_17 = arith.constant 0 : index
    %c2 = arith.constant 2 : index
    %c0_18 = arith.constant 0 : index
    %13 = vector.load %arg1[%c0_15, %c0_16, %c0_17, %c2, %c0_18] : memref<1x1x18x18x3xbf16, #tpu.memory_space<vmem>>, vector<1x1x16x16x3xbf16>
    %14 = vector.shape_cast %13 : vector<1x1x16x16x3xbf16> to vector<16x16x3xbf16>
    %15 = vector.shape_cast %14 : vector<16x16x3xbf16> to vector<256x3xbf16>
    %c2_19 = arith.constant 2 : index
    %c0_20 = arith.constant 0 : index
    %c0_21 = arith.constant 0 : index
    %16 = vector.load %arg2[%c2_19, %c0_20, %c0_21] : memref<9x3x64xbf16, #tpu.memory_space<vmem>>, vector<1x3x64xbf16>
    %17 = vector.shape_cast %16 : vector<1x3x64xbf16> to vector<3x64xbf16>
    %cst_22 = arith.constant dense<0.000000e+00> : vector<256x64xf32>
    %18 = tpu.matmul %15, %17, %cst_22 {dimension_numbers = #tpu.dot_dimension_numbers<[1], [0], [0], [1], [0, 0, 1, 1], [], []>} : vector<256x3xbf16>, vector<3x64xbf16>, vector<256x64xf32> -> vector<256x64xf32>
    %19 = arith.addf %12, %18 : vector<256x64xf32>
    %c0_23 = arith.constant 0 : index
    %c0_24 = arith.constant 0 : index
    %c1_25 = arith.constant 1 : index
    %c0_26 = arith.constant 0 : index
    %c0_27 = arith.constant 0 : index
    %20 = vector.load %arg1[%c0_23, %c0_24, %c1_25, %c0_26, %c0_27] : memref<1x1x18x18x3xbf16, #tpu.memory_space<vmem>>, vector<1x1x16x16x3xbf16>
    %21 = vector.shape_cast %20 : vector<1x1x16x16x3xbf16> to vector<16x16x3xbf16>
    %22 = vector.shape_cast %21 : vector<16x16x3xbf16> to vector<256x3xbf16>
    %c3 = arith.constant 3 : index
    %c0_28 = arith.constant 0 : index
    %c0_29 = arith.constant 0 : index
    %23 = vector.load %arg2[%c3, %c0_28, %c0_29] : memref<9x3x64xbf16, #tpu.memory_space<vmem>>, vector<1x3x64xbf16>
    %24 = vector.shape_cast %23 : vector<1x3x64xbf16> to vector<3x64xbf16>
    %cst_30 = arith.constant dense<0.000000e+00> : vector<256x64xf32>
    %25 = tpu.matmul %22, %24, %cst_30 {dimension_numbers = #tpu.dot_dimension_numbers<[1], [0], [0], [1], [0, 0, 1, 1], [], []>} : vector<256x3xbf16>, vector<3x64xbf16>, vector<256x64xf32> -> vector<256x64xf32>
    %26 = arith.addf %19, %25 : vector<256x64xf32>
    %c0_31 = arith.constant 0 : index
    %c0_32 = arith.constant 0 : index
    %c1_33 = arith.constant 1 : index
    %c1_34 = arith.constant 1 : index
    %c0_35 = arith.constant 0 : index
    %27 = vector.load %arg1[%c0_31, %c0_32, %c1_33, %c1_34, %c0_35] : memref<1x1x18x18x3xbf16, #tpu.memory_space<vmem>>, vector<1x1x16x16x3xbf16>
    %28 = vector.shape_cast %27 : vector<1x1x16x16x3xbf16> to vector<16x16x3xbf16>
    %29 = vector.shape_cast %28 : vector<16x16x3xbf16> to vector<256x3xbf16>
    %c4 = arith.constant 4 : index
    %c0_36 = arith.constant 0 : index
    %c0_37 = arith.constant 0 : index
    %30 = vector.load %arg2[%c4, %c0_36, %c0_37] : memref<9x3x64xbf16, #tpu.memory_space<vmem>>, vector<1x3x64xbf16>
    %31 = vector.shape_cast %30 : vector<1x3x64xbf16> to vector<3x64xbf16>
    %cst_38 = arith.constant dense<0.000000e+00> : vector<256x64xf32>
    %32 = tpu.matmul %29, %31, %cst_38 {dimension_numbers = #tpu.dot_dimension_numbers<[1], [0], [0], [1], [0, 0, 1, 1], [], []>} : vector<256x3xbf16>, vector<3x64xbf16>, vector<256x64xf32> -> vector<256x64xf32>
    %33 = arith.addf %26, %32 : vector<256x64xf32>
    %c0_39 = arith.constant 0 : index
    %c0_40 = arith.constant 0 : index
    %c1_41 = arith.constant 1 : index
    %c2_42 = arith.constant 2 : index
    %c0_43 = arith.constant 0 : index
    %34 = vector.load %arg1[%c0_39, %c0_40, %c1_41, %c2_42, %c0_43] : memref<1x1x18x18x3xbf16, #tpu.memory_space<vmem>>, vector<1x1x16x16x3xbf16>
    %35 = vector.shape_cast %34 : vector<1x1x16x16x3xbf16> to vector<16x16x3xbf16>
    %36 = vector.shape_cast %35 : vector<16x16x3xbf16> to vector<256x3xbf16>
    %c5 = arith.constant 5 : index
    %c0_44 = arith.constant 0 : index
    %c0_45 = arith.constant 0 : index
    %37 = vector.load %arg2[%c5, %c0_44, %c0_45] : memref<9x3x64xbf16, #tpu.memory_space<vmem>>, vector<1x3x64xbf16>
    %38 = vector.shape_cast %37 : vector<1x3x64xbf16> to vector<3x64xbf16>
    %cst_46 = arith.constant dense<0.000000e+00> : vector<256x64xf32>
    %39 = tpu.matmul %36, %38, %cst_46 {dimension_numbers = #tpu.dot_dimension_numbers<[1], [0], [0], [1], [0, 0, 1, 1], [], []>} : vector<256x3xbf16>, vector<3x64xbf16>, vector<256x64xf32> -> vector<256x64xf32>
    %40 = arith.addf %33, %39 : vector<256x64xf32>
    %c0_47 = arith.constant 0 : index
    %c0_48 = arith.constant 0 : index
    %c2_49 = arith.constant 2 : index
    %c0_50 = arith.constant 0 : index
    %c0_51 = arith.constant 0 : index
    %41 = vector.load %arg1[%c0_47, %c0_48, %c2_49, %c0_50, %c0_51] : memref<1x1x18x18x3xbf16, #tpu.memory_space<vmem>>, vector<1x1x16x16x3xbf16>
    %42 = vector.shape_cast %41 : vector<1x1x16x16x3xbf16> to vector<16x16x3xbf16>
    %43 = vector.shape_cast %42 : vector<16x16x3xbf16> to vector<256x3xbf16>
    %c6 = arith.constant 6 : index
    %c0_52 = arith.constant 0 : index
    %c0_53 = arith.constant 0 : index
    %44 = vector.load %arg2[%c6, %c0_52, %c0_53] : memref<9x3x64xbf16, #tpu.memory_space<vmem>>, vector<1x3x64xbf16>
    %45 = vector.shape_cast %44 : vector<1x3x64xbf16> to vector<3x64xbf16>
    %cst_54 = arith.constant dense<0.000000e+00> : vector<256x64xf32>
    %46 = tpu.matmul %43, %45, %cst_54 {dimension_numbers = #tpu.dot_dimension_numbers<[1], [0], [0], [1], [0, 0, 1, 1], [], []>} : vector<256x3xbf16>, vector<3x64xbf16>, vector<256x64xf32> -> vector<256x64xf32>
    %47 = arith.addf %40, %46 : vector<256x64xf32>
    %c0_55 = arith.constant 0 : index
    %c0_56 = arith.constant 0 : index
    %c2_57 = arith.constant 2 : index
    %c1_58 = arith.constant 1 : index
    %c0_59 = arith.constant 0 : index
    %48 = vector.load %arg1[%c0_55, %c0_56, %c2_57, %c1_58, %c0_59] : memref<1x1x18x18x3xbf16, #tpu.memory_space<vmem>>, vector<1x1x16x16x3xbf16>
    %49 = vector.shape_cast %48 : vector<1x1x16x16x3xbf16> to vector<16x16x3xbf16>
    %50 = vector.shape_cast %49 : vector<16x16x3xbf16> to vector<256x3xbf16>
    %c7 = arith.constant 7 : index
    %c0_60 = arith.constant 0 : index
    %c0_61 = arith.constant 0 : index
    %51 = vector.load %arg2[%c7, %c0_60, %c0_61] : memref<9x3x64xbf16, #tpu.memory_space<vmem>>, vector<1x3x64xbf16>
    %52 = vector.shape_cast %51 : vector<1x3x64xbf16> to vector<3x64xbf16>
    %cst_62 = arith.constant dense<0.000000e+00> : vector<256x64xf32>
    %53 = tpu.matmul %50, %52, %cst_62 {dimension_numbers = #tpu.dot_dimension_numbers<[1], [0], [0], [1], [0, 0, 1, 1], [], []>} : vector<256x3xbf16>, vector<3x64xbf16>, vector<256x64xf32> -> vector<256x64xf32>
    %54 = arith.addf %47, %53 : vector<256x64xf32>
    %c0_63 = arith.constant 0 : index
    %c0_64 = arith.constant 0 : index
    %c2_65 = arith.constant 2 : index
    %c2_66 = arith.constant 2 : index
    %c0_67 = arith.constant 0 : index
    %55 = vector.load %arg1[%c0_63, %c0_64, %c2_65, %c2_66, %c0_67] : memref<1x1x18x18x3xbf16, #tpu.memory_space<vmem>>, vector<1x1x16x16x3xbf16>
    %56 = vector.shape_cast %55 : vector<1x1x16x16x3xbf16> to vector<16x16x3xbf16>
    %57 = vector.shape_cast %56 : vector<16x16x3xbf16> to vector<256x3xbf16>
    %c8 = arith.constant 8 : index
    %c0_68 = arith.constant 0 : index
    %c0_69 = arith.constant 0 : index
    %58 = vector.load %arg2[%c8, %c0_68, %c0_69] : memref<9x3x64xbf16, #tpu.memory_space<vmem>>, vector<1x3x64xbf16>
    %59 = vector.shape_cast %58 : vector<1x3x64xbf16> to vector<3x64xbf16>
    %cst_70 = arith.constant dense<0.000000e+00> : vector<256x64xf32>
    %60 = tpu.matmul %57, %59, %cst_70 {dimension_numbers = #tpu.dot_dimension_numbers<[1], [0], [0], [1], [0, 0, 1, 1], [], []>} : vector<256x3xbf16>, vector<3x64xbf16>, vector<256x64xf32> -> vector<256x64xf32>
    %61 = arith.addf %54, %60 : vector<256x64xf32>
    %c0_71 = arith.constant 0 : index
    %c0_72 = arith.constant 0 : index
    %62 = vector.load %arg3[%c0_71, %c0_72] : memref<1x64xf32, #tpu.memory_space<vmem>>, vector<1x64xf32>
    %63 = vector.broadcast %62 : vector<1x64xf32> to vector<256x64xf32>
    %64 = arith.addf %61, %63 : vector<256x64xf32>
    %cst_73 = arith.constant 0.000000e+00 : f32
    %65 = vector.broadcast %cst_73 : f32 to vector<256x64xf32>
    %66 = arith.maximumf %64, %65 : vector<256x64xf32>
    %67 = arith.truncf %66 : vector<256x64xf32> to vector<256x64xbf16>
    %c0_74 = arith.constant 0 : index
    %c0_75 = arith.constant 0 : index
    %c0_76 = arith.constant 0 : index
    %68 = vector.load %arg4[%c0_74, %c0_75, %c0_76] : memref<1x256x64xbf16, #tpu.memory_space<vmem>>, vector<1x256x64xbf16>
    %69 = vector.shape_cast %68 : vector<1x256x64xbf16> to vector<256x64xbf16>
    %70 = vector.shape_cast %67 : vector<256x64xbf16> to vector<1x256x64xbf16>
    tpu.vector_store %arg4[%c0_74, %c0_75, %c0_76], %70 {strides = array<i32>} : memref<1x256x64xbf16, #tpu.memory_space<vmem>>, vector<1x256x64xbf16>,
    return
  }
  func.func @transform_0(%arg0: i32) -> (i32, i32, i32, i32, i32) {
    %c0_i32 = arith.constant 0 : i32
    %c0_i32_0 = arith.constant 0 : i32
    %c0_i32_1 = arith.constant 0 : i32
    %c0_i32_2 = arith.constant 0 : i32
    %c0_i32_3 = arith.constant 0 : i32
    return %c0_i32, %arg0, %c0_i32_0, %c0_i32_1, %c0_i32_2 : i32, i32, i32, i32, i32
  }
  func.func @transform_1(%arg0: i32) -> (i32, i32, i32) {
    %c0_i32 = arith.constant 0 : i32
    %c0_i32_0 = arith.constant 0 : i32
    %c0_i32_1 = arith.constant 0 : i32
    %c0_i32_2 = arith.constant 0 : i32
    return %c0_i32, %c0_i32_0, %c0_i32_1 : i32, i32, i32
  }
  func.func @transform_2(%arg0: i32) -> (i32, i32) {
    %c0_i32 = arith.constant 0 : i32
    %c0_i32_0 = arith.constant 0 : i32
    %c0_i32_1 = arith.constant 0 : i32
    return %c0_i32, %c0_i32_0 : i32, i32
  }
  func.func @transform_3(%arg0: i32) -> (i32, i32, i32) {
    %c0_i32 = arith.constant 0 : i32
    %c0_i32_0 = arith.constant 0 : i32
    %c0_i32_1 = arith.constant 0 : i32
    return %arg0, %c0_i32, %c0_i32_0 : i32, i32, i32
  }
}

</mosaic_0001>

<bundles_post_ra>
// kernel: tpu_custom_call.1
= control target key start
LH: loop header
LB: loop body
LE: loop exit
PB: predicated region body
PF: predicated region fallthrough
CT: control target
= control target key end

     0   :  { %s6186_s12 = smov 0   ;;  %s8854_s0 = inlined_call_operand.vmem [shape: bf16[1,2,18,18,3], index: 0, kind: input, shape index: {}]   ;;  %s8855_s1 = inlined_call_operand.vmem [shape: bf16[9,3,64], index: 1, kind: input, shape index: {}]   ;;  %s8856_s2 = inlined_call_operand.vmem [shape: f32[1,64], index: 2, kind: input, shape index: {}]   ;;  %s8857_s3 = inlined_call_operand.vmem [shape: bf16[2,256,64], index: 3, kind: output, shape index: {}]  }
   0x1 LB: > { %s5021_s13 = sadd.s32 4294967295, %s6163_s12   ;;  %p5025_p0 = scmp.ge.s32.totalorder %s6163_s12, 1  ;;  %s6163_s12 = sphi %s6186_s12, %s13_s12  }
   0x2   : > { %p137_p1 = scmp.lt.s32.totalorder %s6163_s12, 3 }
   0x4   : > { %p138_p2 = pnand %p5025_p0, %p137_p1 }
   0x6   : > { %141 = sbr.rel (%p138_p2) target bundleno = 558 (0x22e), region = 32 }
   0xb   : > { %v5029_v0 = vld [vmem:[%s8855_s1 + $0x2] sm:$0x3]  ;;  %vm707_vm0 = vcmask 1040384   ;;  %vm708_vm1 = vcmask 1041408   ;;  %p161_p3 = scmp.lt.s32.totalorder %s5021_s13, 1  ;;  %v6165_v1 = vmov 65535  }
   0xc   : > { %v709_v2 = vsel %vm707_vm0, 4294967295, %v6165_v1  ;;  %v204_v4 = vld [vmem:[%s8855_s1] sm:$0x3]  ;;  %v5110_v5 = vld [vmem:[%s8855_s1 + $0x4] sm:$0x3]  ;;  %vm658_vm4 = vcmask 23552  }
   0xd   : > { %v6197_v3 = vsel %vm708_vm1, %v709_v2, 0  ;;  %s9119_s13 = smov (!%p161_p3, %s5021_s13), 1  ;;  %vm221_vm2 = vsmask.f32 3328  ;;  %vm222_vm3 = vsmask.f32 7440 }
   0xe   : > { %8887 = vst [vmem:[#allocation2_spill] sm:$0xff] %v6197_v3  ;;  %v712_v6 = vand.u32 %v5029_v0, %v6197_v3  ;;  %v6209_v7 = vand.u32 %v6197_v3, %v204_v4  ;;  %v6212_v8 = vand.u32 %v5110_v5, %v6197_v3  ;;  %s6094_s20 = smul.u32 216, %s9119_s13  ;;  %v5175_v9 = vld [vmem:[%s8855_s1 + $0x6] sm:$0x3]  ;;  %v5256_v10 = vld [vmem:[%s8855_s1 + $0x8] sm:$0x3]  ;;  %vm6270_vm5 = vmor %vm221_vm2, %vm222_vm3 }
   0xf   : > { %v6252_v22 = vand.u32 %v5175_v9, %v6197_v3  ;;  %v6255_v23 = vand.u32 %v5256_v10, %v6197_v3  ;;  %vm1215_vm6 = vcmask 1042432   ;;  %vm1216_vm7 = vcmask 1046532   ;;  %s5600_s11 = sshll.u32 %s9119_s13, 7 }
  0x10   : > { %6092 = vmatprep.subr.bf16.mxu1 %v712_v6  ;;  %5786 = vmatprep.subr.bf16.mxu0 %v712_v6  ;;  %s6218_s23 = scalar_lea.vmem %s8854_s0, %s6094_s20  ;;  %vm6536_vm8 = vmor %vm1215_vm6, %vm1216_vm7  ;;  %s8681_s15 = scalar_lea.vmem %s8857_s3, %s5600_s11  ;;  %vm4933_vm9 = vcmask 519168  }
  0x11   : > { %6093 = vmatpush3.bf16.msra.mxu1 %v712_v6  ;;  %5787 = vmatpush3.bf16.msra.mxu0 %v712_v6  ;;  %v6227_v11 = vld [vmem:[%s6218_s23] sm:$0xf]  ;;  %v6230_v12 = vld [vmem:[%s6218_s23 + $0x4] sm:$0xf]  ;;  %v6233_v13 = vld [vmem:[%s6218_s23 + $0x8] sm:$0x1] }
  0x12   : > { %5820 = vmatprep.subr.bf16.mxu1 %v6209_v7  ;;  %5854 = vmatprep.subr.bf16.mxu0 %v6212_v8  ;;  %v225_v14 = vshrl.u32 %v6227_v11, 16  ;;  %v228_v15 = vshll.u32 %v6227_v11, 16  ;;  %v234_v16 = vshll.u32 %v6230_v12, 16  ;;  %v238_v17 = vshrl.u32 %v6230_v12, 16  ;;  %v6242_v18 = vld [vmem:[%s6218_s23 + $0x60] sm:$0xf] }
  0x13   : > { %v244_v19 = vshll.u32 %v6233_v13, 16  ;;  %v6246_v20 = vld [vmem:[%s6218_s23 + $0x64] sm:$0xf]  ;;  %v6249_v21 = vld [vmem:[%s6218_s23 + $0x68] sm:$0x1]  ;;  %v417_v29 = vshrl.u32 %v6242_v18, 16 }
  0x14   : > { %v227_v24 = vrot.slane %v225_v14, 4  ;;  %v230_v25 = vrot.slane %v228_v15, 5  ;;  %v236_v26 = vrot.slane %v234_v16, 5  ;;  %v240_v27 = vrot.slane %v238_v17, 4  ;;  %v6263_v36 = vld [vmem:[%s6218_s23 + $0xc] sm:$0xf] }
  0x15   : > { %v246_v28 = vrot.slane %v244_v19, 5  ;;  %v420_v30 = vshll.u32 %v6242_v18, 16  ;;  %v426_v31 = vshll.u32 %v6246_v20, 16  ;;  %v430_v34 = vshrl.u32 %v6246_v20, 16  ;;  %v6266_v37 = vld [vmem:[%s6218_s23 + $0x10] sm:$0xf] }
  0x16   : > { %v231_v32 = vor.u32 %v230_v25, %v227_v24  ;;  %v241_v33 = vor.u32 %v240_v27, %v236_v26  ;;  %v436_v35 = vshll.u32 %v6249_v21, 16  ;;  %v419_v40 = vrot.slane %v417_v29, 4  ;;  %v6276_v48 = vld [vmem:[%s6218_s23 + $0x14] sm:$0x1]  ;;  %v190_v60 = vld [vmem:[%s6218_s23 + $0x6c] sm:$0xf] }
  0x17   : > { %v422_v41 = vrot.slane %v420_v30, 5  ;;  %v428_v42 = vrot.slane %v426_v31, 5  ;;  %v432_v45 = vrot.slane %v430_v34, 4  ;;  %v249_v49 = vshrl.u32 %v6263_v36, 16  ;;  %v6289_v1 = vld [vmem:[%s6218_s23 + $0x70] sm:$0xf] }
  0x18   : > { %v232_v43 = vrot.slane %v231_v32, 4  ;;  %v242_v44 = vrot.slane %v241_v33, 4  ;;  %v438_v46 = vrot.slane %v436_v35, 5  ;;  %v252_v50 = vshll.u32 %v6263_v36, 16  ;;  %v6297_v9 = vld [vmem:[%s6218_s23 + $0x74] sm:$0x1] }
  0x19   : > { %v423_v47 = vor.u32 %v422_v41, %v419_v40  ;;  %v258_v51 = vshll.u32 %v6266_v37, 16  ;;  %v433_v54 = vor.u32 %v432_v45, %v428_v42  ;;  %v262_v55 = vshrl.u32 %v6266_v37, 16  ;;  %v6302_v17 = vld [vmem:[%s6218_s23 + $0x18] sm:$0xf]  ;;  %v6308_v31 = vld [vmem:[%s6218_s23 + $0x1c] sm:$0xf] }
  0x1a   : > { %v237_v52 = vsel %vm6270_vm5, %v232_v43, %v236_v26  ;;  %v247_v53 = vsel %vm6270_vm5, %v242_v44, %v246_v28  ;;  %v251_v58 = vrot.slane %v249_v49, 4  ;;  %v254_v59 = vrot.slane %v252_v50, 5  ;;  %v6314_v35 = vld [vmem:[%s6218_s23 + $0x20] sm:$0x1]  ;;  %v192_v45 = vld [vmem:[%s6218_s23 + $0x78] sm:$0xf] }
  0x1b   : > { %v5030_v56 = vcombine.low %v237_v52, %v247_v53  ;;  %v424_v57 = vrot.slane %v423_v47, 4  ;;  %v434_v61 = vrot.slane %v433_v54, 4  ;;  %v260_v62 = vrot.slane %v258_v51, 5 }
  0x1c   : > { %v264_v63 = vrot.slane %v262_v55, 4  ;;  %v268_v0 = vshll.u32 %v6276_v48, 16  ;;  %v255_v4 = vor.u32 %v254_v59, %v251_v58  ;;  %v441_v16 = vshrl.u32 %v190_v60, 16  ;;  %v6325_v55 = vld [vmem:[%s6218_s23 + $0x7c] sm:$0xf] }
  0x1d   : > { %5788 = vmatprep.mubr.msk.bf16.mxu0 %vm658_vm4, %v5030_v56  ;;  %v429_v2 = vsel %vm6270_vm5, %v424_v57, %v428_v42  ;;  %v439_v10 = vsel %vm6270_vm5, %v434_v61, %v438_v46  ;;  %v444_v25 = vshll.u32 %v190_v60, 16  ;;  %v450_v26 = vshll.u32 %v6289_v1, 16  ;;  %8890 = vst [vmem:[#allocation3_spill] sm:$0xff] %v6325_v55 }
  0x1e   : > { %v265_v14 = vor.u32 %v264_v63, %v260_v62  ;;  %v270_v15 = vrot.slane %v268_v0, 5  ;;  %v5038_v19 = vcombine.low %v429_v2, %v439_v10  ;;  %v256_v24 = vrot.slane %v255_v4, 4  ;;  %v6330_v0 = vld [vmem:[%s6218_s23 + $0x80] sm:$0x1] }
  0x1f   : > { %v443_v28 = vrot.slane %v441_v16, 4  ;;  %v454_v29 = vshrl.u32 %v6289_v1, 16  ;;  %v460_v30 = vshll.u32 %v6297_v9, 16  ;;  %v446_v33 = vrot.slane %v444_v25, 5  ;;  %8891 = vst [vmem:[#allocation4_spill] sm:$0xff] %v6330_v0 }
  0x20   : > { %v266_v27 = vrot.slane %v265_v14, 4  ;;  %5804 = vmatprep.mubr.msk.bf16.mxu1 %vm658_vm4, %v5038_v19  ;;  %v261_v32 = vsel %vm6270_vm5, %v256_v24, %v260_v62  ;;  %v452_v34 = vrot.slane %v450_v26, 5  ;;  %v273_v40 = vshrl.u32 %v6302_v17, 16  ;;  %v6343_v25 = vld [vmem:[%s6218_s23 + $0x28] sm:$0xf] }
  0x21   : > { %v456_v42 = vrot.slane %v454_v29, 4  ;;  %v462_v43 = vrot.slane %v460_v30, 5  ;;  %v276_v44 = vshll.u32 %v6302_v17, 16  ;;  %v447_v47 = vor.u32 %v446_v33, %v443_v28 }
  0x22   : > { %v271_v41 = vsel %vm6270_vm5, %v266_v27, %v270_v15  ;;  %v275_v49 = vrot.slane %v273_v40, 4  ;;  %v282_v50 = vshll.u32 %v6308_v31, 16  ;;  %v286_v53 = vshrl.u32 %v6308_v31, 16  ;;  %v6336_v15 = vld [vmem:[%s6218_s23 + $0x24] sm:$0xf] }
  0x23   : > { %v5031_v46 = vcombine.low %v261_v32, %v271_v41  ;;  %v457_v51 = vor.u32 %v456_v42, %v452_v34  ;;  %v278_v52 = vrot.slane %v276_v44, 5  ;;  %v292_v54 = vshll.u32 %v6314_v35, 16 }
  0x24   : > { %v448_v56 = vrot.slane %v447_v47, 4  ;;  %v284_v57 = vrot.slane %v282_v50, 5  ;;  %v465_v58 = vshrl.u32 %v192_v45, 16  ;;  %v468_v59 = vshll.u32 %v192_v45, 16  ;;  %v6356_v45 = vld [vmem:[%s6218_s23 + $0x84] sm:$0xf] }
  0x25   : > { %5789 = vmatmul.mubr.msk.bf16.vlgmr.msra.gmra.mxu0 %vm658_vm4, %v5031_v46  ;;  %v458_v60 = vrot.slane %v457_v51, 4  ;;  %v279_v61 = vor.u32 %v278_v52, %v275_v49  ;;  %v288_v62 = vrot.slane %v286_v53, 4  ;;  %v294_v63 = vrot.slane %v292_v54, 5  ;;  %v6363_v51 = vld [vmem:[%s6218_s23 + $0x88] sm:$0xf] }
  0x26   : > { %5855 = vmatpush3.bf16.msra.mxu0 %v6212_v8  ;;  %v453_v2 = vsel %vm6270_vm5, %v448_v56, %v452_v34  ;;  %v467_v4 = vrot.slane %v465_v58, 4  ;;  %v470_v10 = vrot.slane %v468_v59, 5  ;;  %v474_v14 = vshll.u32 %v6325_v55, 16  ;;  %v6349_v34 = vld [vmem:[%s6218_s23 + $0x2c] sm:$0x1] }
  0x27   : > { %5922 = vmatprep.subr.bf16.mxu0 %v6255_v23  ;;  %v463_v8 = vsel %vm6270_vm5, %v458_v60, %v462_v43  ;;  %v280_v16 = vrot.slane %v279_v61, 4  ;;  %v289_v19 = vor.u32 %v288_v62, %v284_v57  ;;  %v478_v24 = vshrl.u32 %v6325_v55, 16  ;;  %v6370_v59 = vld [vmem:[%s6218_s23 + $0x8c] sm:$0x1] }
  0x28   : > { %v5039_v26 = vcombine.low %v453_v2, %v463_v8  ;;  %v471_v27 = vor.u32 %v470_v10, %v467_v4  ;;  %v476_v28 = vrot.slane %v474_v14, 5  ;;  %v484_v29 = vshll.u32 %v6330_v0, 16  ;;  %v6378_v4 = vld [vmem:[%s6218_s23 + $0x30] sm:$0xf] }
  0x29   : > { %v285_v30 = vsel %vm6270_vm5, %v280_v16, %v284_v57  ;;  %v290_v32 = vrot.slane %v289_v19, 4  ;;  %v480_v33 = vrot.slane %v478_v24, 4  ;;  %v297_v40 = vshrl.u32 %v6336_v15, 16  ;;  %v6383_v19 = vld [vmem:[%s6218_s23 + $0x34] sm:$0xf] }
  0x2a   : > { %5805 = vmatmul.mubr.msk.bf16.vlgmr.msra.gmra.mxu1 %vm658_vm4, %v5039_v26  ;;  %v472_v41 = vrot.slane %v471_v27, 4  ;;  %v486_v42 = vrot.slane %v484_v29, 5  ;;  %v300_v43 = vshll.u32 %v6336_v15, 16  ;;  %v306_v44 = vshll.u32 %v6343_v25, 16 }
  0x2b   : > { %5821 = vmatpush3.bf16.msra.mxu1 %v6209_v7  ;;  %v295_v46 = vsel %vm6270_vm5, %v290_v32, %v294_v63  ;;  %v481_v47 = vor.u32 %v480_v33, %v476_v28  ;;  %v299_v49 = vrot.slane %v297_v40, 4  ;;  %v310_v50 = vshrl.u32 %v6343_v25, 16 }
  0x2c   : > { %v5032_v52 = vcombine.low %v285_v30, %v295_v46  ;;  %v477_v53 = vsel %vm6270_vm5, %v472_v41, %v476_v28  ;;  %v302_v54 = vrot.slane %v300_v43, 5  ;;  %v308_v56 = vrot.slane %v306_v44, 5  ;;  %5888 = vmatprep.subr.bf16.mxu1 %v6252_v22  ;;  %v6396_v46 = vld [vmem:[%s6218_s23 + $0x90] sm:$0xf] }
  0x2d   : > { %v482_v7 = vrot.slane %v481_v47, 4  ;;  %v312_v57 = vrot.slane %v310_v50, 4  ;;  %v316_v58 = vshll.u32 %v6349_v34, 16  ;;  %v489_v60 = vshrl.u32 %v6356_v45, 16 }
  0x2e   : > { %5792 = vmatprep.mubr.msk.bf16.mxu0 %vm658_vm4, %v5032_v52  ;;  %v303_v61 = vor.u32 %v302_v54, %v299_v49  ;;  %v492_v62 = vshll.u32 %v6356_v45, 16  ;;  %v498_v63 = vshll.u32 %v6363_v51, 16  ;;  %v502_v2 = vshrl.u32 %v6363_v51, 16 }
  0x2f   : > { %v487_v10 = vsel %vm6270_vm5, %v482_v7, %v486_v42  ;;  %v313_v14 = vor.u32 %v312_v57, %v308_v56  ;;  %v318_v8 = vrot.slane %v316_v58, 5  ;;  %v491_v16 = vrot.slane %v489_v60, 4  ;;  %v6391_v42 = vld [vmem:[%s6218_s23 + $0x38] sm:$0x1] }
  0x30   : > { %v5040_v24 = vcombine.low %v477_v53, %v487_v10  ;;  %v304_v26 = vrot.slane %v303_v61, 4  ;;  %v494_v27 = vrot.slane %v492_v62, 5  ;;  %v500_v28 = vrot.slane %v498_v63, 5  ;;  %v6401_v53 = vld [vmem:[%s6218_s23 + $0x94] sm:$0xf] }
  0x31   : > { %v314_v29 = vrot.slane %v313_v14, 4  ;;  %v504_v30 = vrot.slane %v502_v2, 4  ;;  %v508_v32 = vshll.u32 %v6370_v59, 16  ;;  %v321_v33 = vshrl.u32 %v6378_v4, 16  ;;  %v6410_v10 = vld [vmem:[%s6218_s23 + $0x98] sm:$0x1] }
  0x32   : > { %5808 = vmatprep.mubr.msk.bf16.mxu1 %vm658_vm4, %v5040_v24  ;;  %v309_v40 = vsel %vm6270_vm5, %v304_v26, %v308_v56  ;;  %v495_v41 = vor.u32 %v494_v27, %v491_v16  ;;  %v324_v43 = vshll.u32 %v6378_v4, 16  ;;  %v330_v44 = vshll.u32 %v6383_v19, 16  ;;  %8892 = vst [vmem:[#allocation5_spill] sm:$0xff] %v6410_v10  ;;  %v6415_v16 = vld [vmem:[%s6218_s23 + $0x3c] sm:$0xf] }
  0x33   : > { %v319_v47 = vsel %vm6270_vm5, %v314_v29, %v318_v8  ;;  %v505_v49 = vor.u32 %v504_v30, %v500_v28  ;;  %v510_v50 = vrot.slane %v508_v32, 5  ;;  %v323_v52 = vrot.slane %v321_v33, 4  ;;  %v6420_v30 = vld [vmem:[%s6218_s23 + $0x40] sm:$0xf] }
  0x34   : > { %v5033_v54 = vcombine.low %v309_v40, %v319_v47  ;;  %v496_v56 = vrot.slane %v495_v41, 4  ;;  %v326_v7 = vrot.slane %v324_v43, 5  ;;  %v332_v57 = vrot.slane %v330_v44, 5 }
  0x35   : > { %v506_v58 = vrot.slane %v505_v49, 4  ;;  %v334_v60 = vshrl.u32 %v6383_v19, 16  ;;  %v340_v61 = vshll.u32 %v6391_v42, 16  ;;  %v513_v62 = vshrl.u32 %v6396_v46, 16 }
  0x36   : > { %5793 = vmatmul.mubr.msk.bf16.gmra.mxu0 %vm658_vm4, %v5033_v54  ;;  %v501_v63 = vsel %vm6270_vm5, %v496_v56, %v500_v28  ;;  %v327_v2 = vor.u32 %v326_v7, %v323_v52  ;;  %v516_v14 = vshll.u32 %v6396_v46, 16  ;;  %v522_v8 = vshll.u32 %v6401_v53, 16  ;;  %v6429_v52 = vld [vmem:[%s6218_s23 + $0x44] sm:$0x1]  ;;  %v6434_v7 = vld [vmem:[%s6218_s23 + $0x9c] sm:$0xf] }
  0x37   : > { %v511_v24 = vsel %vm6270_vm5, %v506_v58, %v510_v50  ;;  %v336_v26 = vrot.slane %v334_v60, 4  ;;  %v342_v27 = vrot.slane %v340_v61, 5  ;;  %v515_v29 = vrot.slane %v513_v62, 4  ;;  %8893 = vst [vmem:[#allocation6_spill] sm:$0xff] %v6434_v7 }
  0x38   : > { %v5041_v28 = vcombine.low %v501_v63, %v511_v24  ;;  %v328_v32 = vrot.slane %v327_v2, 4  ;;  %v518_v33 = vrot.slane %v516_v14, 5  ;;  %v524_v40 = vrot.slane %v522_v8, 5  ;;  %v6438_v8 = vld [vmem:[%s6218_s23 + $0xa0] sm:$0xf] }
  0x39   : > { %v337_v41 = vor.u32 %v336_v26, %v332_v57  ;;  %v526_v43 = vshrl.u32 %v6401_v53, 16  ;;  %v532_v44 = vshll.u32 %v6410_v10, 16  ;;  %v345_v47 = vshrl.u32 %v6415_v16, 16  ;;  %8894 = vst [vmem:[#allocation7_spill] sm:$0xff] %v6438_v8  ;;  %v1168_v10 = vld [vmem:[%s6218_s23 + $0xc] sm:$0xe] }
  0x3a   : > { %5809 = vmatmul.mubr.msk.bf16.gmra.mxu1 %vm658_vm4, %v5041_v28  ;;  %v333_v49 = vsel %vm6270_vm5, %v328_v32, %v332_v57  ;;  %v519_v50 = vor.u32 %v518_v33, %v515_v29  ;;  %v348_v54 = vshll.u32 %v6415_v16, 16  ;;  %v354_v56 = vshll.u32 %v6420_v30, 16  ;;  %v6444_v28 = vld [vmem:[%s6218_s23 + $0xa4] sm:$0x1]  ;;  %v6448_v33 = vld [vmem:[%s6218_s23 + $0x48] sm:$0xf] }
  0x3b   : > { %v338_v58 = vrot.slane %v337_v41, 4  ;;  %v528_v60 = vrot.slane %v526_v43, 4  ;;  %v534_v61 = vrot.slane %v532_v44, 5  ;;  %v347_v62 = vrot.slane %v345_v47, 4  ;;  %8895 = vst [vmem:[#allocation8_spill] sm:$0xff] %v6444_v28 }
  0x3c   : > { %v520_v63 = vrot.slane %v519_v50, 4  ;;  %v350_v2 = vrot.slane %v348_v54, 5  ;;  %v356_v14 = vrot.slane %v354_v56, 5  ;;  %v358_v57 = vshrl.u32 %v6420_v30, 16 }
  0x3d   : > { %v343_v24 = vsel %vm6270_vm5, %v338_v58, %v342_v27  ;;  %v529_v26 = vor.u32 %v528_v60, %v524_v40  ;;  %v364_v29 = vshll.u32 %v6429_v52, 16  ;;  %v537_v32 = vshrl.u32 %v6434_v7, 16 }
  0x3e   : > { %v5034_v41 = vcombine.low %v333_v49, %v343_v24  ;;  %v525_v43 = vsel %vm6270_vm5, %v520_v63, %v524_v40  ;;  %v351_v44 = vor.u32 %v350_v2, %v347_v62  ;;  %v360_v47 = vrot.slane %v358_v57, 4  ;;  %v6457_v24 = vld [vmem:[%s6218_s23 + $0x4c] sm:$0xf]  ;;  %v6463_v2 = vld [vmem:[%s6218_s23 + $0x50] sm:$0x1] }
  0x3f   : > { %v530_v50 = vrot.slane %v529_v26, 4  ;;  %v366_v54 = vrot.slane %v364_v29, 5  ;;  %v539_v27 = vrot.slane %v537_v32, 4  ;;  %v540_v56 = vshll.u32 %v6434_v7, 16 }
  0x40   : > { %5796 = vmatprep.mubr.msk.bf16.mxu0 %vm658_vm4, %v5034_v41  ;;  %v352_v58 = vrot.slane %v351_v44, 4  ;;  %v361_v60 = vor.u32 %v360_v47, %v356_v14  ;;  %v546_v6 = vshll.u32 %v6438_v8, 16  ;;  %v550_v49 = vshrl.u32 %v6438_v8, 16  ;;  %v6469_v44 = vld [vmem:[%s6218_s23 + $0xa8] sm:$0xf] }
  0x41   : > { %v535_v40 = vsel %vm6270_vm5, %v530_v50, %v534_v61  ;;  %v542_v62 = vrot.slane %v540_v56, 5  ;;  %v556_v63 = vshll.u32 %v6444_v28, 16  ;;  %v369_v57 = vshrl.u32 %v6448_v33, 16  ;;  %8896 = vst [vmem:[#allocation9_spill] sm:$0xff] %v6469_v44 }
  0x42   : > { %v5042_v26 = vcombine.low %v525_v43, %v535_v40  ;;  %v357_v29 = vsel %vm6270_vm5, %v352_v58, %v356_v14  ;;  %v362_v32 = vrot.slane %v361_v60, 4  ;;  %v548_v41 = vrot.slane %v546_v6, 5 }
  0x43   : > { %v543_v47 = vor.u32 %v542_v62, %v539_v27  ;;  %v552_v39 = vrot.slane %v550_v49, 4  ;;  %v558_v61 = vrot.slane %v556_v63, 5  ;;  %v371_v50 = vrot.slane %v369_v57, 4  ;;  %v6479_v49 = vld [vmem:[%s6218_s23 + $0xac] sm:$0xf] }
  0x44   : > { %5812 = vmatprep.mubr.msk.bf16.mxu1 %vm658_vm4, %v5042_v26  ;;  %v367_v56 = vsel %vm6270_vm5, %v362_v32, %v366_v54  ;;  %v372_v43 = vshll.u32 %v6448_v33, 16  ;;  %v378_v40 = vshll.u32 %v6457_v24, 16  ;;  %v382_v14 = vshrl.u32 %v6457_v24, 16  ;;  %8897 = vst [vmem:[#allocation10_spill] sm:$0xff] %v6479_v49  ;;  %v6482_v26 = vld [vmem:[%s6218_s23 + $0xb0] sm:$0x1] }
  0x45   : > { %v5035_v58 = vcombine.low %v357_v29, %v367_v56  ;;  %v544_v6 = vrot.slane %v543_v47, 4  ;;  %v553_v60 = vor.u32 %v552_v39, %v548_v41  ;;  %v388_v27 = vshll.u32 %v6463_v2, 16  ;;  %8898 = vst [vmem:[#allocation11_spill] sm:$0xff] %v6482_v26 }
  0x46   : > { %v374_v62 = vrot.slane %v372_v43, 5  ;;  %v380_v63 = vrot.slane %v378_v40, 5  ;;  %v384_v57 = vrot.slane %v382_v14, 4  ;;  %v561_v54 = vshrl.u32 %v6469_v44, 16  ;;  %v6491_v14 = vld [vmem:[%s6218_s23 + $0x54] sm:$0xf] }
  0x47   : > { %5797 = vmatmul.mubr.msk.bf16.gmra.mxu0 %vm658_vm4, %v5035_v58  ;;  %v549_v29 = vsel %vm6270_vm5, %v544_v6, %v548_v41  ;;  %v554_v32 = vrot.slane %v553_v60, 4  ;;  %v390_v39 = vrot.slane %v388_v27, 5  ;;  %v564_v47 = vshll.u32 %v6469_v44, 16  ;;  %v6498_v60 = vld [vmem:[%s6218_s23 + $0x58] sm:$0xf] }
  0x48   : > { %v375_v56 = vor.u32 %v374_v62, %v371_v50  ;;  %v385_v5 = vor.u32 %v384_v57, %v380_v63  ;;  %v563_v43 = vrot.slane %v561_v54, 4  ;;  %v570_v40 = vshll.u32 %v6479_v49, 16  ;;  %v6501_v54 = vld [vmem:[%s6218_s23 + $0x5c] sm:$0x1] }
  0x49   : > { %v559_v58 = vsel %vm6270_vm5, %v554_v32, %v558_v61  ;;  %v566_v3 = vrot.slane %v564_v47, 5  ;;  %v574_v41 = vshrl.u32 %v6479_v49, 16  ;;  %v580_v6 = vshll.u32 %v6482_v26, 16  ;;  %v1167_v26 = vld [vmem:[%s6218_s23] sm:$0xe] }
  0x4a   : > { %v5043_v50 = vcombine.low %v549_v29, %v559_v58  ;;  %v376_v27 = vrot.slane %v375_v56, 4  ;;  %v386_v62 = vrot.slane %v385_v5, 4  ;;  %v572_v57 = vrot.slane %v570_v40, 5  ;;  %v6512_v56 = vld [vmem:[%s6218_s23 + $0xb4] sm:$0xf] }
  0x4b   : > { %v567_v0 = vor.u32 %v566_v3, %v563_v43  ;;  %v576_v44 = vrot.slane %v574_v41, 4  ;;  %v582_v28 = vrot.slane %v580_v6, 5  ;;  %v393_v61 = vshrl.u32 %v6491_v14, 16  ;;  %8899 = vst [vmem:[#allocation12_spill] sm:$0xff] %v6512_v56  ;;  %v6515_v41 = vld [vmem:[%s6218_s23 + $0xb8] sm:$0xf] }
  0x4c   : > { %5813 = vmatmul.mubr.msk.bf16.gmra.mxu1 %vm658_vm4, %v5043_v50  ;;  %v381_v32 = vsel %vm6270_vm5, %v376_v27, %v380_v63  ;;  %v391_v29 = vsel %vm6270_vm5, %v386_v62, %v390_v39  ;;  %v396_v5 = vshll.u32 %v6491_v14, 16  ;;  %v402_v47 = vshll.u32 %v6498_v60, 16  ;;  %v6520_v39 = vld [vmem:[%s6218_s23 + $0xbc] sm:$0x1] }
  0x4d   : > { %v5036_v3 = vcombine.low %v381_v32, %v391_v29  ;;  %v568_v43 = vrot.slane %v567_v0, 4  ;;  %v577_v40 = vor.u32 %v576_v44, %v572_v57  ;;  %v395_v58 = vrot.slane %v393_v61, 4 }
  0x4e   : > { %v398_v6 = vrot.slane %v396_v5, 5  ;;  %v404_v50 = vrot.slane %v402_v47, 5  ;;  %v406_v63 = vshrl.u32 %v6498_v60, 16  ;;  %v412_v27 = vshll.u32 %v6501_v54, 16 }
  0x4f   : > { %5800 = vmatprep.mubr.msk.bf16.mxu0 %vm658_vm4, %v5036_v3  ;;  %v573_v62 = vsel %vm6270_vm5, %v568_v43, %v572_v57  ;;  %v578_v32 = vrot.slane %v577_v40, 4  ;;  %v585_v0 = vshrl.u32 %v6512_v56, 16  ;;  %v588_v44 = vshll.u32 %v6512_v56, 16 }
  0x50   : > { %v399_v61 = vor.u32 %v398_v6, %v395_v58  ;;  %v408_v29 = vrot.slane %v406_v63, 4  ;;  %v414_v5 = vrot.slane %v412_v27, 5  ;;  %v594_v47 = vshll.u32 %v6515_v41, 16 }
  0x51   : > { %v583_v49 = vsel %vm6270_vm5, %v578_v32, %v582_v28  ;;  %v587_v55 = vrot.slane %v585_v0, 4  ;;  %v590_v3 = vrot.slane %v588_v44, 5  ;;  %v598_v7 = vshrl.u32 %v6515_v41, 16 }
  0x52   : > { %v5044_v57 = vcombine.low %v573_v62, %v583_v49  ;;  %v400_v43 = vrot.slane %v399_v61, 4  ;;  %v409_v40 = vor.u32 %v408_v29, %v404_v50  ;;  %v596_v8 = vrot.slane %v594_v47, 5  ;;  %v1169_v61 = vld [vmem:[%s6218_s23 + $0x18] sm:$0xe] }
  0x53   : > { %v591_v56 = vor.u32 %v590_v3, %v587_v55  ;;  %v600_v58 = vrot.slane %v598_v7, 4  ;;  %v604_v6 = vshll.u32 %v6520_v39, 16  ;;  %v5094_v28 = vrot.slane %v1167_v26, 9 }
  0x54   : > { %5816 = vmatprep.mubr.msk.bf16.mxu1 %vm658_vm4, %v5044_v57  ;;  %v405_v49 = vsel %vm6270_vm5, %v400_v43, %v404_v50  ;;  %v410_v27 = vrot.slane %v409_v40, 4  ;;  %v1220_v62 = vrot.slane %v6230_v12, 5  ;;  %v5063_v55 = vcombine.low %v6263_v36, %v6266_v37 }
  0x55   : > { %v592_v7 = vrot.slane %v591_v56, 4  ;;  %v601_v32 = vor.u32 %v600_v58, %v596_v8  ;;  %v606_v0 = vrot.slane %v604_v6, 5  ;;  %v5095_v44 = vrot.slane %v1168_v10, 9  ;;  %v1170_v6 = vld [vmem:[%s6218_s23 + $0x24] sm:$0xe] }
  0x56   : > { %v415_v26 = vsel %vm6270_vm5, %v410_v27, %v414_v5  ;;  %v1221_v29 = vsel %vm6536_vm8, %v5094_v28, %v1220_v62  ;;  %v1222_v47 = vrot.slane %v1220_v62, 4  ;;  %v8902_v50 = vrot.slane %v6266_v37, 5 }
  0x57   : > { %v5037_v57 = vcombine.low %v405_v49, %v415_v26  ;;  %v597_v43 = vsel %vm6270_vm5, %v592_v7, %v596_v8  ;;  %v602_v56 = vrot.slane %v601_v32, 4  ;;  %v8903_v40 = vrot.slane %v6233_v13, 5 }
  0x58   : > { %v1229_v3 = vrot.slane %v8902_v50, 4  ;;  %v5064_v5 = vcombine.low %v6302_v17, %v6308_v31  ;;  %v5096_v58 = vrot.slane %v1169_v61, 9  ;;  %v5062_v49 = vcombine.low %v6227_v11, %v6230_v12  ;;  %v1171_v61 = vld [vmem:[%s6218_s23 + $0x30] sm:$0xe] }
  0x59   : > { %v1224_v10 = vsel %vm6536_vm8, %v1222_v47, %v8903_v40  ;;  %5801 = vmatmul.mubr.msk.bf16.gmra.mxu0 %vm658_vm4, %v5037_v57  ;;  %v607_v28 = vsel %vm6270_vm5, %v602_v56, %v606_v0  ;;  %v1234_v13 = vrot.slane %v6308_v31, 5  ;;  %v8904_v62 = vmov %v8902_v50 }
  0x5a   : > { %v5111_v8 = vcombine.low %v1221_v29, %v1224_v10  ;;  %v5045_v27 = vcombine.low %v597_v43, %v607_v28  ;;  %v1228_v17 = vsel %vm6536_vm8, %v5095_v44, %v8904_v62  ;;  %v8905_v7 = vrot.slane %v6276_v48, 5  ;;  %v1172_v29 = vld [vmem:[%s6218_s23 + $0x3c] sm:$0xe] }
  0x5b   : > { %v1237_v0 = vrot.slane %v6314_v35, 5  ;;  %v1235_v11 = vsel %vm6536_vm8, %v5096_v58, %v1234_v13  ;;  %v1236_v12 = vrot.slane %v1234_v13, 4  ;;  %v5097_v31 = vrot.slane %v1170_v6, 9  ;;  %v1174_v13 = vld [vmem:[%s6218_s23 + $0x54] sm:$0xe] }
  0x5c   : > { %v1231_v32 = vsel %vm6536_vm8, %v1229_v3, %v8905_v7  ;;  %5856 = vmatprep.mubr.msk.bf16.mxu0 %vm658_vm4, %v5111_v8  ;;  %v1241_v26 = vrot.slane %v6343_v25, 5  ;;  %5817 = vmatmul.mubr.msk.bf16.gmra.mxu1 %vm658_vm4, %v5045_v27  ;;  %v1244_v48 = vrot.slane %v6349_v34, 5  ;;  %v1248_v44 = vrot.slane %v6383_v19, 5  ;;  %v1173_v3 = vld [vmem:[%s6218_s23 + $0x48] sm:$0xe] }
  0x5d   : > { %5822 = vmatprep.mubr.msk.bf16.mxu1 %vm658_vm4, %v5062_v49  ;;  %v5112_v35 = vcombine.low %v1228_v17, %v1231_v32  ;;  %v1238_v47 = vsel %vm6536_vm8, %v1236_v12, %v1237_v0  ;;  %v5098_v43 = vrot.slane %v1171_v61, 9  ;;  %v1251_v56 = vrot.slane %v6391_v42, 5 }
  0x5e   : > { %v1243_v50 = vrot.slane %v1241_v26, 4  ;;  %v5113_v57 = vcombine.low %v1235_v11, %v1238_v47  ;;  %v1242_v40 = vsel %vm6536_vm8, %v5097_v31, %v1241_v26  ;;  %v1250_v34 = vrot.slane %v1248_v44, 4 }
  0x5f   : > { %v5099_v10 = vrot.slane %v1172_v29, 9  ;;  %v1255_v58 = vrot.slane %v6420_v30, 5  ;;  %v1258_v28 = vrot.slane %v6429_v52, 5  ;;  %v5100_v49 = vrot.slane %v1173_v3, 9  ;;  %v1175_v52 = vld [vmem:[%s6218_s23 + $0x60] sm:$0xe] }
  0x60   : > { %v1245_v6 = vsel %vm6536_vm8, %v1243_v50, %v1244_v48  ;;  %v1262_v8 = vrot.slane %v6457_v24, 5  ;;  %v1265_v27 = vrot.slane %v6463_v2, 5  ;;  %v1279_v62 = vrot.slane %v6249_v21, 5  ;;  %v6639_v48 = vld [vmem:[%s6218_s23 + $0x6c] sm:$0xe] }
  0x61   : > { %5857 = vmatmul.mubr.msk.bf16.vlgmr.msra.gmra.mxu0 %vm658_vm4, %v5112_v35  ;;  %v1257_v42 = vrot.slane %v1255_v58, 4  ;;  %v1249_v17 = vsel %vm6536_vm8, %v5098_v43, %v1248_v44  ;;  %v5114_v32 = vcombine.low %v1242_v40, %v1245_v6  ;;  %v1252_v0 = vsel %vm6536_vm8, %v1250_v34, %v1251_v56  ;;  %v6660_v3 = vld [vmem:[%s6218_s23 + $0x78] sm:$0xe] }
  0x62   : > { %5923 = vmatpush3.bf16.msra.mxu0 %v6255_v23  ;;  %5860 = vmatprep.mubr.msk.bf16.mxu0 %vm658_vm4, %v5113_v57  ;;  %v1264_v7 = vrot.slane %v1262_v8, 4  ;;  %v6611_v61 = vsel %vm6536_vm8, %v5099_v10, %v1255_v58  ;;  %v1269_v2 = vrot.slane %v6498_v60, 5  ;;  %v6620_v21 = vsel %vm6536_vm8, %v5100_v49, %v1262_v8  ;;  %v1179_v57 = vld [vmem:[%s6218_s23 + $0x90] sm:$0xe]  ;;  %v1180_v49 = vld [vmem:[%s6218_s23 + $0x9c] sm:$0xe] }
  0x63   : > { %v5101_v23 = vrot.slane %v1174_v13, 9  ;;  %v1272_v11 = vrot.slane %v6501_v54, 5  ;;  %v1276_v12 = vrot.slane %v6246_v20, 5  ;;  %v1259_v36 = vsel %vm6536_vm8, %v1257_v42, %v1258_v28 }
  0x64   : > { %5823 = vmatmul.mubr.msk.bf16.vlgmr.msra.gmra.mxu1 %vm658_vm4, %v5063_v55  ;;  %v6630_v37 = vsel %vm6536_vm8, %v1264_v7, %v1265_v27  ;;  %v1271_v55 = vrot.slane %v1269_v2, 4  ;;  %v5102_v31 = vrot.slane %v1175_v52, 9  ;;  %v5065_v54 = vcombine.low %v6336_v15, %v6343_v25  ;;  %v1178_v15 = vld [vmem:[%s6218_s23 + $0x84] sm:$0xe]  ;;  %v1181_v27 = vld [vmem:[%s6218_s23 + $0xa8] sm:$0xe] }
  0x65   : > { %5889 = vmatpush3.bf16.msra.mxu1 %v6252_v22  ;;  %5826 = vmatprep.mubr.msk.bf16.mxu1 %vm658_vm4, %v5064_v5  ;;  %v5066_v26 = vcombine.low %v6378_v4, %v6383_v19  ;;  %v5115_v22 = vcombine.low %v1249_v17, %v1252_v0  ;;  %v5067_v5 = vcombine.low %v6415_v16, %v6420_v30  ;;  %v1278_v47 = vrot.slane %v1276_v12, 4  ;;  %v8906_v52 = vld [vmem:[#allocation5_spill] sm:$0xff]  ;;  %v8907_v0 = vld [vmem:[#allocation7_spill] sm:$0xff] }
  0x66   : > { %v5068_v44 = vcombine.low %v6448_v33, %v6457_v24  ;;  %v5069_v29 = vcombine.low %v6491_v14, %v6498_v60  ;;  %v5070_v35 = vcombine.low %v6242_v18, %v6246_v20  ;;  %v5116_v25 = vcombine.low %v6611_v61, %v1259_v36  ;;  %v8908_v61 = vld [vmem:[#allocation6_spill] sm:$0xff] }
  0x67   : > { %v5117_v4 = vcombine.low %v6620_v21, %v6630_v37  ;;  %v6653_v19 = vsel %vm6536_vm8, %v5101_v23, %v1269_v2  ;;  %v6657_v50 = vsel %vm6536_vm8, %v1271_v55, %v1272_v11  ;;  %v6666_v43 = vsel %vm6536_vm8, %v5102_v31, %v1276_v12  ;;  %v8909_v23 = vld [vmem:[#allocation3_spill] sm:$0xff]  ;;  %v5214_v2 = vld [vmem:[%s6218_s23 + $0x24] sm:$0xf] }
  0x68   : > { %v5103_v56 = vrot.slane %v6639_v48, 9  ;;  %v1283_v40 = vrot.slane %v6289_v1, 5  ;;  %v5073_v34 = vcombine.low %v6356_v45, %v6363_v51  ;;  %v1286_v10 = vrot.slane %v6297_v9, 5  ;;  %v8912_v48 = vld [vmem:[#allocation9_spill] sm:$0xff] }
  0x69   : > { %5861 = vmatmul.mubr.msk.bf16.gmra.mxu0 %vm658_vm4, %v5114_v32  ;;  %v5105_v58 = vrot.slane %v1178_v15, 9  ;;  %v1297_v6 = vrot.slane %v6363_v51, 5  ;;  %v1300_v28 = vrot.slane %v6370_v59, 5  ;;  %v5118_v8 = vcombine.low %v6653_v19, %v6657_v50 }
  0x6a   : > { %5864 = vmatprep.mubr.msk.bf16.mxu0 %vm658_vm4, %v5115_v22  ;;  %v6681_v13 = vsel %vm6536_vm8, %v1278_v47, %v1279_v62  ;;  %v5104_v1 = vrot.slane %v6660_v3, 9  ;;  %v5106_v17 = vrot.slane %v1179_v57, 9  ;;  %v1304_v7 = vrot.slane %v6401_v53, 5  ;;  %v8911_v22 = vld [vmem:[#allocation10_spill] sm:$0xff]  ;;  %v6736_v47 = vld [vmem:[%s6218_s23 + $0x10] sm:$0xf] }
  0x6b   : > { %v6690_v9 = vsel %vm6536_vm8, %v5105_v58, %v1297_v6  ;;  %v1299_v59 = vrot.slane %v1297_v6, 4  ;;  %v1285_v62 = vrot.slane %v1283_v40, 4  ;;  %v1307_v32 = vrot.slane %v8906_v52, 5  ;;  %v8913_v58 = vld [vmem:[#allocation11_spill] sm:$0xff] }
  0x6c   : > { %5827 = vmatmul.mubr.msk.bf16.gmra.mxu1 %vm658_vm4, %v5065_v54  ;;  %v5107_v21 = vrot.slane %v1180_v49, 9  ;;  %v1290_v11 = vrot.slane %v8909_v23, 5  ;;  %v6704_v36 = vsel %vm6536_vm8, %v5106_v17, %v1304_v7  ;;  %v1306_v37 = vrot.slane %v1304_v7, 4  ;;  %v8910_v54 = vld [vmem:[#allocation8_spill] sm:$0xff] }
  0x6d   : > { %5830 = vmatprep.mubr.msk.bf16.mxu1 %vm658_vm4, %v5066_v26  ;;  %v6700_v12 = vsel %vm6536_vm8, %v1299_v59, %v1300_v28  ;;  %v1311_v31 = vrot.slane %v8907_v0, 5  ;;  %v1314_v26 = vrot.slane %v8910_v54, 5  ;;  %v5108_v3 = vrot.slane %v1181_v27, 9  ;;  %v5208_v28 = vld [vmem:[%s6218_s23 + $0xc] sm:$0xf]  ;;  %v8914_v7 = vld [vmem:[#allocation12_spill] sm:$0xff] }
  0x6e   : > { %v5122_v55 = vcombine.low %v6690_v9, %v6700_v12  ;;  %v6714_v15 = vsel %vm6536_vm8, %v1306_v37, %v1307_v32  ;;  %v1318_v57 = vrot.slane %v8911_v22, 5  ;;  %v1321_v6 = vrot.slane %v8913_v58, 5  ;;  %v1182_v32 = vld [vmem:[%s6218_s23 + $0xb4] sm:$0xe] }
  0x6f   : > { %v5123_v49 = vcombine.low %v6704_v36, %v6714_v15  ;;  %v6724_v59 = vsel %vm6536_vm8, %v5107_v21, %v1311_v31  ;;  %v1313_v17 = vrot.slane %v1311_v31, 4  ;;  %v1292_v27 = vrot.slane %v1290_v11, 4  ;;  %v8915_v37 = vld [vmem:[#allocation4_spill] sm:$0xff] }
  0x70   : > { %v1293_v54 = vrot.slane %v8915_v37, 5  ;;  %v1320_v58 = vrot.slane %v1318_v57, 4  ;;  %v6740_v21 = vsel %vm6536_vm8, %v5103_v56, %v1283_v40  ;;  %v2035_v52 = vshll.u32 %v5208_v28, 16  ;;  %v5321_v37 = vld [vmem:[%s8855_s1 + $0xa] sm:$0x3] }
  0x71   : > { %5865 = vmatmul.mubr.msk.bf16.gmra.mxu0 %vm658_vm4, %v5116_v25  ;;  %v6733_v25 = vsel %vm6536_vm8, %v5108_v3, %v1318_v57  ;;  %v6744_v31 = vsel %vm6536_vm8, %v1313_v17, %v1314_v26  ;;  %v5119_v56 = vcombine.low %v6666_v43, %v6681_v13  ;;  %v6757_v40 = vsel %vm6536_vm8, %v1285_v62, %v1286_v10  ;;  %v6766_v57 = vld [vmem:[%s6218_s23 + $0x14] sm:$0x1]  ;;  %v5212_v10 = vld [vmem:[%s6218_s23 + $0x1c] sm:$0xf]  ;;  %v5386_v13 = vld [vmem:[%s8855_s1 + $0xc] sm:$0x3] }
  0x72   : > { %5868 = vmatprep.mubr.msk.bf16.mxu0 %vm658_vm4, %v5117_v4  ;;  %v2032_v4 = vshrl.u32 %v5208_v28, 16  ;;  %v6763_v3 = vsel %vm6536_vm8, %v1320_v58, %v1321_v6  ;;  %v5211_v28 = vld [vmem:[%s6218_s23 + $0x18] sm:$0xf]  ;;  %v6775_v16 = vsel %vm6536_vm8, %v5104_v1, %v1290_v11  ;;  %v2041_v43 = vshll.u32 %v6736_v47, 16  ;;  %v8916_v1 = vld [vmem:[#allocation2_spill] sm:$0xff] }
  0x73   : > { %v6787_v33 = vsel %vm6536_vm8, %v1292_v27, %v1293_v54  ;;  %v5109_v24 = vrot.slane %v1182_v32, 9  ;;  %v6791_v62 = vand.u32 %v5321_v37, %v8916_v1  ;;  %v2037_v6 = vrot.slane %v2035_v52, 5 }
  0x74   : > { %5831 = vmatmul.mubr.msk.bf16.gmra.mxu1 %vm658_vm4, %v5067_v5  ;;  %v1325_v5 = vrot.slane %v6515_v41, 5  ;;  %v2034_v11 = vrot.slane %v2032_v4, 4  ;;  %v6793_v17 = vrot.slane %v2041_v43, 5  ;;  %v2056_v58 = vshrl.u32 %v5211_v28, 16  ;;  %v5213_v43 = vld [vmem:[%s6218_s23 + $0x20] sm:$0x1] }
  0x75   : > { %5834 = vmatprep.mubr.msk.bf16.mxu1 %vm658_vm4, %v5068_v44  ;;  %v2045_v44 = vshrl.u32 %v6736_v47, 16  ;;  %v1328_v30 = vrot.slane %v6520_v39, 5  ;;  %5956 = vmatprep.subr.bf16.mxu1 %v6791_v62  ;;  %v2059_v27 = vshll.u32 %v5211_v28, 16  ;;  %v2065_v32 = vshll.u32 %v5212_v10, 16 }
  0x76   : > { %v1327_v54 = vrot.slane %v1325_v5, 4  ;;  %v2051_v52 = vshll.u32 %v6766_v57, 16  ;;  %v2058_v4 = vrot.slane %v2056_v58, 4  ;;  %v2069_v37 = vshrl.u32 %v5212_v10, 16  ;;  %v6814_v10 = vld [vmem:[%s6218_s23 + $0x28] sm:$0xf] }
  0x77   : > { %v2047_v26 = vrot.slane %v2045_v44, 4  ;;  %v5120_v39 = vcombine.low %v6740_v21, %v6757_v40  ;;  %v2061_v28 = vrot.slane %v2059_v27, 5  ;;  %v6807_v44 = vrot.slane %v2065_v32, 5  ;;  %v6152_v32 = vld [vmem:[%s6218_s23 + $0x6c] sm:$0xf] }
  0x78   : > { %v6810_v19 = vand.u32 %v5386_v13, %v8916_v1  ;;  %v2038_v50 = vor.u32 %v2037_v6, %v2034_v11  ;;  %v2071_v42 = vrot.slane %v2069_v37, 4  ;;  %v5121_v21 = vcombine.low %v6775_v16, %v6787_v33  ;;  %v5217_v6 = vld [vmem:[%s6218_s23 + $0x30] sm:$0xf] }
  0x79   : > { %5869 = vmatmul.mubr.msk.bf16.gmra.mxu0 %vm658_vm4, %v5118_v8  ;;  %v2048_v8 = vor.u32 %v2047_v26, %v6793_v17  ;;  %v6824_v40 = vsel %vm6536_vm8, %v5109_v24, %v1325_v5  ;;  %v2062_v13 = vor.u32 %v2061_v28, %v2058_v4  ;;  %v6828_v26 = vld [vmem:[%s6218_s23 + $0x2c] sm:$0x1]  ;;  %v2083_v11 = vshll.u32 %v5214_v2, 16  ;;  %v6841_v5 = vld [vmem:[%s6218_s23 + $0x34] sm:$0xf] }
  0x7a   : > { %5872 = vmatprep.mubr.msk.bf16.mxu0 %vm658_vm4, %v5119_v56  ;;  %v2080_v56 = vshrl.u32 %v5214_v2, 16  ;;  %5990 = vmatprep.subr.bf16.mxu0 %v6810_v19  ;;  %v6837_v14 = vsel %vm6536_vm8, %v1327_v54, %v1328_v30  ;;  %v2053_v60 = vrot.slane %v2051_v52, 5  ;;  %v2075_v16 = vshll.u32 %v5213_v43, 16  ;;  %v5220_v30 = vld [vmem:[%s6218_s23 + $0x3c] sm:$0xf] }
  0x7b   : > { %v2085_v33 = vrot.slane %v2083_v11, 5  ;;  %v2089_v24 = vshll.u32 %v6814_v10, 16  ;;  %v2093_v18 = vshrl.u32 %v6814_v10, 16  ;;  %v2039_v20 = vrot.slane %v2038_v50, 4  ;;  %v6153_v54 = vld [vmem:[%s6218_s23 + $0x70] sm:$0xf] }
  0x7c   : > { %5835 = vmatmul.mubr.msk.bf16.gmra.mxu1 %vm658_vm4, %v5069_v29  ;;  %v2072_v29 = vor.u32 %v2071_v42, %v6807_v44  ;;  %v2082_v2 = vrot.slane %v2080_v56, 4  ;;  %v2063_v58 = vrot.slane %v2062_v13, 4  ;;  %v2099_v27 = vshll.u32 %v6828_v26, 16  ;;  %v6154_v42 = vld [vmem:[%s6218_s23 + $0x78] sm:$0xf] }
  0x7d   : > { %5838 = vmatprep.mubr.msk.bf16.mxu1 %vm658_vm4, %v5070_v35  ;;  %v2049_v35 = vrot.slane %v2048_v8, 4  ;;  %v5071_v52 = vcombine.low %v6152_v32, %v6153_v54  ;;  %v5072_v4 = vcombine.low %v6154_v42, %v8909_v23  ;;  %v2104_v37 = vshrl.u32 %v5217_v6, 16  ;;  %v5223_v42 = vld [vmem:[%s6218_s23 + $0x48] sm:$0xf]  ;;  %v6878_v13 = vld [vmem:[%s6218_s23 + $0x4c] sm:$0xf] }
  0x7e   : > { %v2107_v43 = vshll.u32 %v5217_v6, 16  ;;  %v2073_v28 = vrot.slane %v2072_v29, 4  ;;  %v2077_v50 = vrot.slane %v2075_v16, 5  ;;  %v2113_v8 = vshll.u32 %v6841_v5, 16  ;;  %v6860_v6 = vld [vmem:[%s6218_s23 + $0x38] sm:$0x1] }
  0x7f   : > { %v2117_v56 = vshrl.u32 %v6841_v5, 16  ;;  %v2086_v11 = vor.u32 %v2085_v33, %v2082_v2  ;;  %v6857_v32 = vrot.slane %v2089_v24, 5  ;;  %v2095_v23 = vrot.slane %v2093_v18, 4 }
  0x80   : > { %v2044_v29 = vsel %vm6270_vm5, %v2039_v20, %v6793_v17  ;;  %v6868_v16 = vrot.slane %v2099_v27, 5  ;;  %v2106_v54 = vrot.slane %v2104_v37, 4  ;;  %v2054_v2 = vsel %vm6270_vm5, %v2049_v35, %v2053_v60  ;;  %v6891_v37 = vld [vmem:[%s6218_s23 + $0x44] sm:$0x1] }
  0x81   : > { %5873 = vmatmul.mubr.msk.bf16.gmra.mxu0 %vm658_vm4, %v5120_v39  ;;  %v6863_v39 = vld [vmem:[%s6218_s23 + $0x40] sm:$0xf]  ;;  %v2068_v33 = vsel %vm6270_vm5, %v2063_v58, %v6807_v44  ;;  %v2128_v24 = vshrl.u32 %v5220_v30, 16  ;;  %v2131_v18 = vshll.u32 %v5220_v30, 16  ;;  %v2078_v17 = vsel %vm6270_vm5, %v2073_v28, %v2077_v50 }
  0x82   : > { %5876 = vmatprep.mubr.msk.bf16.mxu0 %vm658_vm4, %v5121_v21  ;;  %v2109_v21 = vrot.slane %v2107_v43, 5  ;;  %v6883_v20 = vrot.slane %v2113_v8, 5  ;;  %v2119_v27 = vrot.slane %v2117_v56, 4  ;;  %v6886_v60 = vrot.slane %v2086_v11, 4 }
  0x83   : > { %v2096_v35 = vor.u32 %v2095_v23, %v6857_v32  ;;  %v2130_v44 = vrot.slane %v2128_v24, 4  ;;  %v2133_v58 = vrot.slane %v2131_v18, 5  ;;  %v2141_v28 = vshrl.u32 %v6863_v39, 16  ;;  %v6906_v24 = vld [vmem:[%s6218_s23 + $0x50] sm:$0x1] }
  0x84   : > { %5839 = vmatmul.mubr.msk.bf16.gmra.mxu1 %vm658_vm4, %v5071_v52  ;;  %v2137_v52 = vshll.u32 %v6863_v39, 16  ;;  %v2110_v30 = vor.u32 %v2109_v21, %v2106_v54  ;;  %v6896_v50 = vcombine.low %v2044_v29, %v2054_v2  ;;  %v6898_v8 = vcombine.low %v2068_v33, %v2078_v17  ;;  %v6911_v29 = vld [vmem:[%s6218_s23 + $0x58] sm:$0xf] }
  0x85   : > { %5842 = vmatprep.mubr.msk.bf16.mxu1 %vm658_vm4, %v5072_v4  ;;  %v2123_v4 = vshll.u32 %v6860_v6, 16  ;;  %v2152_v56 = vshrl.u32 %v5223_v42, 16  ;;  %v2155_v11 = vshll.u32 %v5223_v42, 16  ;;  %v2120_v23 = vor.u32 %v2119_v27, %v6883_v20 }
  0x86   : > { %v6893_v43 = vrot.slane %v2137_v52, 5  ;;  %v2134_v54 = vor.u32 %v2133_v58, %v2130_v44  ;;  %v2143_v21 = vrot.slane %v2141_v28, 4  ;;  %v2161_v18 = vshll.u32 %v6878_v13, 16  ;;  %v5226_v52 = vld [vmem:[%s6218_s23 + $0x54] sm:$0xf] }
  0x87   : > { %v2097_v9 = vrot.slane %v2096_v35, 4  ;;  %v2147_v12 = vshll.u32 %v6891_v37, 16  ;;  %v2157_v42 = vrot.slane %v2155_v11, 5  ;;  %v2092_v2 = vsel %vm6270_vm5, %v6886_v60, %v6857_v32  ;;  %v5229_v44 = vld [vmem:[%s6218_s23 + $0x60] sm:$0xf] }
  0x88   : > { %v2111_v33 = vrot.slane %v2110_v30, 4  ;;  %v2125_v17 = vrot.slane %v2123_v4, 5  ;;  %v2165_v27 = vshrl.u32 %v6878_v13, 16  ;;  %v2144_v36 = vor.u32 %v2143_v21, %v6893_v43  ;;  %v6938_v28 = vld [vmem:[%s6218_s23 + $0x5c] sm:$0x1] }
  0x89   : > { %5877 = vmatmul.mubr.msk.bf16.gmra.mxu0 %vm658_vm4, %v5122_v55  ;;  %v2154_v55 = vrot.slane %v2152_v56, 4  ;;  %v6928_v15 = vrot.slane %v2161_v18, 5  ;;  %v2179_v35 = vshll.u32 %v5226_v52, 16  ;;  %v8917_v32 = vcombine.low %v6396_v46, %v6401_v53  ;;  %v6942_v11 = vld [vmem:[%s6218_s23 + $0x64] sm:$0xf] }
  0x8a   : > { %5880 = vmatprep.mubr.msk.bf16.mxu0 %vm658_vm4, %v5123_v49  ;;  %v2176_v49 = vshrl.u32 %v5226_v52, 16  ;;  %v2121_v60 = vrot.slane %v2120_v23, 4  ;;  %v2135_v58 = vrot.slane %v2134_v54, 4  ;;  %v2167_v30 = vrot.slane %v2165_v27, 4  ;;  %v6964_v27 = vld [vmem:[%s6218_s23 + $0x70] sm:$0xf] }
  0x8b   : > { %v2185_v45 = vshll.u32 %v6911_v29, 16  ;;  %v2149_v51 = vrot.slane %v2147_v12, 5  ;;  %v2171_v4 = vshll.u32 %v6906_v24, 16  ;;  %v2189_v56 = vshrl.u32 %v6911_v29, 16 }
  0x8c   : > { %5843 = vmatmul.mubr.msk.bf16.gmra.mxu1 %vm658_vm4, %v5073_v34  ;;  %v2158_v34 = vor.u32 %v2157_v42, %v2154_v55  ;;  %v2102_v46 = vsel %vm6270_vm5, %v2097_v9, %v6868_v16  ;;  %v2116_v53 = vsel %vm6270_vm5, %v2111_v33, %v6883_v20  ;;  %v2178_v23 = vrot.slane %v2176_v49, 4  ;;  %v5232_v55 = vld [vmem:[%s6218_s23 + $0x6c] sm:$0xf] }
  0x8d   : > { %5846 = vmatprep.mubr.msk.bf16.mxu1 %vm658_vm4, %v8917_v32  ;;  %v2181_v54 = vrot.slane %v2179_v35, 5  ;;  %v2145_v21 = vrot.slane %v2144_v36, 4  ;;  %v2168_v18 = vor.u32 %v2167_v30, %v6928_v15  ;;  %v6951_v52 = vrot.slane %v2185_v45, 5 }
  0x8e   : > { %v2191_v12 = vrot.slane %v2189_v56, 4  ;;  %v8918_v42 = vcombine.low %v6724_v59, %v6744_v31  ;;  %v2126_v16 = vsel %vm6270_vm5, %v2121_v60, %v2125_v17  ;;  %v2140_v20 = vsel %vm6270_vm5, %v2135_v58, %v6893_v43 }
  0x8f   : > { %v2200_v9 = vshrl.u32 %v5229_v44, 16  ;;  %v2203_v33 = vshll.u32 %v5229_v44, 16  ;;  %v8919_v36 = vcombine.low %v6733_v25, %v6763_v3  ;;  %v2159_v49 = vrot.slane %v2158_v34, 4 }
  0x90   : > { %v2173_v59 = vrot.slane %v2171_v4, 5  ;;  %v2209_v31 = vshll.u32 %v6942_v11, 16  ;;  %v2213_v17 = vshrl.u32 %v6942_v11, 16  ;;  %v2182_v35 = vor.u32 %v2181_v54, %v2178_v23 }
  0x91   : > { %5881 = vmatmul.mubr.msk.bf16.gmra.mxu0 %vm658_vm4, %v8918_v42  ;;  %v2195_v32 = vshll.u32 %v6938_v28, 16  ;;  %v2202_v43 = vrot.slane %v2200_v9, 4  ;;  %v2205_v60 = vrot.slane %v2203_v33, 5  ;;  %v8920_v44 = vcombine.low %v8908_v61, %v8907_v0  ;;  %v6991_v61 = vld [vmem:[%s6218_s23 + $0x68] sm:$0x1]  ;;  %v6120_v9 = vld [vmem:[%s6218_s23 + $0xc] sm:$0xff]  }
  0x92   : > { %5884 = vmatprep.mubr.msk.bf16.mxu0 %vm658_vm4, %v8919_v36  ;;  %v2150_v25 = vsel %vm6270_vm5, %v2145_v21, %v2149_v51  ;;  %v2169_v3 = vrot.slane %v2168_v18, 4  ;;  %v2192_v58 = vor.u32 %v2191_v12, %v6951_v52  ;;  %v6980_v30 = vrot.slane %v2209_v31, 5  ;;  %v7006_v18 = vld [vmem:[%s6218_s23 + $0x7c] sm:$0xf] }
  0x93   : > { %v8921_v45 = vcombine.low %v8912_v48, %v8911_v22  ;;  %v6986_v34 = vcombine.low %v2092_v2, %v2102_v46  ;;  %v6988_v0 = vcombine.low %v2116_v53, %v2126_v16  ;;  %v2215_v4 = vrot.slane %v2213_v17, 4  ;;  %v5235_v22 = vld [vmem:[%s6218_s23 + $0x78] sm:$0xf]  ;;  %8922 = vst [vmem:[#allocation5_spill] sm:$0xff] %v7006_v18 }
  0x94   : > { %5847 = vmatmul.mubr.msk.bf16.gmra.mxu1 %vm658_vm4, %v8920_v44  ;;  %v2224_v51 = vshrl.u32 %v5232_v55, 16  ;;  %v2206_v56 = vor.u32 %v2205_v60, %v2202_v43  ;;  %v2227_v23 = vshll.u32 %v5232_v55, 16  ;;  %v2233_v54 = vshll.u32 %v6964_v27, 16 }
  0x95   : > { %5850 = vmatprep.mubr.msk.bf16.mxu1 %vm658_vm4, %v8921_v45  ;;  %v2237_v21 = vshrl.u32 %v6964_v27, 16  ;;  %v6996_v48 = vcombine.low %v2140_v20, %v2150_v25  ;;  %v2164_v2 = vsel %vm6270_vm5, %v2159_v49, %v6928_v15  ;;  %v7001_v46 = vrot.slane %v2182_v35, 4  ;;  %v7015_v20 = vld [vmem:[%s6218_s23 + $0x74] sm:$0x1]  ;;  %v7033_v25 = vld [vmem:[%s6218_s23 + $0x88] sm:$0xf] }
  0x96   : > { %v7003_v53 = vrot.slane %v2195_v32, 5  ;;  %v2174_v12 = vsel %vm6270_vm5, %v2169_v3, %v2173_v59  ;;  %v7010_v55 = vrot.slane %v2192_v58, 4  ;;  %v2216_v42 = vor.u32 %v2215_v4, %v6980_v30  ;;  %8924 = vst [vmem:[#allocation7_spill] sm:$0xff] %v7033_v25 }
  0x97   : > { %v2219_v16 = vshll.u32 %v6991_v61, 16  ;;  %v8923_v15 = vcombine.low %v6824_v40, %v6837_v14  ;;  %v2226_v33 = vrot.slane %v2224_v51, 4  ;;  %v2229_v36 = vrot.slane %v2227_v23, 5  ;;  %v5238_v40 = vld [vmem:[%s6218_s23 + $0x84] sm:$0xf] }
  0x98   : > { %v2248_v49 = vshrl.u32 %v5235_v22, 16  ;;  %v2251_v59 = vshll.u32 %v5235_v22, 16  ;;  %v7024_v31 = vrot.slane %v2206_v56, 4  ;;  %v7026_v17 = vrot.slane %v2233_v54, 5  ;;  %v7046_v51 = vld [vmem:[%s6218_s23 + $0x80] sm:$0x1] }
  0x99   : > { %5885 = vmatmul.mubr.msk.bf16.gmra.mxu0 %vm658_vm4, %v8923_v15  ;;  %v2239_v35 = vrot.slane %v2237_v21, 4  ;;  %v2257_v32 = vshll.u32 %v7006_v18, 16  ;;  %v2243_v14 = vshll.u32 %v7015_v20, 16  ;;  %v2261_v44 = vshrl.u32 %v7006_v18, 16  ;;  %8926 = vst [vmem:[#allocation6_spill] sm:$0xff] %v7046_v51 }
  0x9a   : > { %5924 = vmatprep.mubr.msk.bf16.mxu0 %vm658_vm4, %v6896_v50  ;;  %v2250_v43 = vrot.slane %v2248_v49, 4  ;;  %v2253_v60 = vrot.slane %v2251_v59, 5  ;;  %v8925_v50 = vcombine.low %v8914_v7, %v6515_v41  ;;  %v7039_v3 = vcombine.low %v2164_v2, %v2174_v12  ;;  %v5241_v2 = vld [vmem:[%s6218_s23 + $0x90] sm:$0xf]  ;;  %v6122_v49 = vld [vmem:[%s6218_s23 + $0x24] sm:$0xff]  }
  0x9b   : > { %v2188_v58 = vsel %vm6270_vm5, %v7001_v46, %v6951_v52  ;;  %v2217_v45 = vrot.slane %v2216_v42, 4  ;;  %v2221_v4 = vrot.slane %v2219_v16, 5  ;;  %v2230_v41 = vor.u32 %v2229_v36, %v2226_v33  ;;  %v6121_v46 = vld [vmem:[%s6218_s23 + $0x18] sm:$0xff]  }
  0x9c   : > { %5851 = vmatmul.mubr.msk.bf16.gmra.mxu1 %vm658_vm4, %v8925_v50  ;;  %v7049_v7 = vrot.slane %v2257_v32, 5  ;;  %v2263_v56 = vrot.slane %v2261_v44, 4  ;;  %v2272_v23 = vshrl.u32 %v5238_v40, 16  ;;  %v2198_v54 = vsel %vm6270_vm5, %v7010_v55, %v7003_v53  ;;  %v7070_v53 = vld [vmem:[%s6218_s23 + $0x8c] sm:$0x1] }
  0x9d   : > { %5890 = vmatprep.mubr.msk.bf16.mxu1 %vm658_vm4, %v6120_v9  ;;  %v2212_v52 = vsel %vm6270_vm5, %v7024_v31, %v6980_v30  ;;  %v2275_v21 = vshll.u32 %v5238_v40, 16  ;;  %v2281_v22 = vshll.u32 %v7033_v25, 16  ;;  %v2240_v12 = vor.u32 %v2239_v35, %v7026_v17  ;;  %v7067_v9 = vld [vmem:[%s6218_s23 + $0x94] sm:$0xf]  ;;  %8928 = vst [vmem:[#allocation8_spill] sm:$0xff] %v7070_v53 }
  0x9e   : > { %v7063_v42 = vrot.slane %v2243_v14, 5  ;;  %v2254_v16 = vor.u32 %v2253_v60, %v2250_v43  ;;  %v2267_v15 = vshll.u32 %v7046_v51, 16  ;;  %8927 = vst [vmem:[#allocation3_spill] sm:$0xff] %v7067_v9  ;;  %v2274_v55 = vrot.slane %v2272_v23, 4  ;;  %v7099_v23 = vld [vmem:[%s6218_s23 + $0xa0] sm:$0xf] }
  0x9f   : > { %v2277_v33 = vrot.slane %v2275_v21, 5  ;;  %v7072_v30 = vrot.slane %v2281_v22, 5  ;;  %v2285_v36 = vshrl.u32 %v7033_v25, 16  ;;  %v2222_v59 = vsel %vm6270_vm5, %v2217_v45, %v2221_v4  ;;  %v5244_v4 = vld [vmem:[%s6218_s23 + $0x9c] sm:$0xf]  ;;  %8929 = vst [vmem:[#allocation10_spill] sm:$0xff] %v7099_v23 }
  0xa0   : > { %v7080_v31 = vrot.slane %v2230_v41, 4  ;;  %v2264_v35 = vor.u32 %v2263_v56, %v7049_v7  ;;  %v2296_v32 = vshrl.u32 %v5241_v2, 16  ;;  %v2299_v43 = vshll.u32 %v5241_v2, 16  ;;  %v7108_v2 = vld [vmem:[%s6218_s23 + $0x98] sm:$0x1] }
  0xa1   : > { %5925 = vmatmul.mubr.msk.bf16.vlgmr.msra.gmra.mxu0 %vm658_vm4, %v6898_v8  ;;  %v2278_v40 = vor.u32 %v2277_v33, %v2274_v55  ;;  %v2287_v14 = vrot.slane %v2285_v36, 4  ;;  %v2305_v8 = vshll.u32 %v7067_v9, 16  ;;  %v7087_v60 = vrot.slane %v2240_v12, 4  ;;  %8930 = vst [vmem:[#allocation9_spill] sm:$0xff] %v7108_v2 }
  0xa2   : > { %5991 = vmatpush3.bf16.msra.mxu0 %v6810_v19  ;;  %5928 = vmatprep.mubr.msk.bf16.mxu0 %vm658_vm4, %v6986_v34  ;;  %v2291_v44 = vshll.u32 %v7070_v53, 16  ;;  %v2298_v50 = vrot.slane %v2296_v32, 4  ;;  %v2309_v45 = vshrl.u32 %v7067_v9, 16  ;;  %v7093_v19 = vrot.slane %v2254_v16, 4  ;;  %v5247_v32 = vld [vmem:[%s6218_s23 + $0xa8] sm:$0xf] }
  0xa3   : > { %v7095_v41 = vrot.slane %v2267_v15, 5  ;;  %v2288_v34 = vor.u32 %v2287_v14, %v7072_v30  ;;  %v2301_v56 = vrot.slane %v2299_v43, 5  ;;  %v7103_v21 = vrot.slane %v2264_v35, 4  ;;  %v7131_v14 = vld [vmem:[%s6218_s23 + $0xac] sm:$0xf]  ;;  %v6124_v43 = vld [vmem:[%s6218_s23 + $0x3c] sm:$0xff]  }
  0xa4   : > { %5891 = vmatmul.mubr.msk.bf16.vlgmr.msra.gmra.mxu1 %vm658_vm4, %v6121_v46  ;;  %v7105_v22 = vrot.slane %v2278_v40, 4  ;;  %v7110_v46 = vrot.slane %v2305_v8, 5  ;;  %v2311_v12 = vrot.slane %v2309_v45, 4  ;;  %v7112_v16 = vcombine.low %v2188_v58, %v2198_v54  ;;  %v6123_v40 = vld [vmem:[%s6218_s23 + $0x30] sm:$0xff]   ;;  %8931 = vst [vmem:[#allocation11_spill] sm:$0xff] %v7131_v14  ;;  %v6125_v9 = vld [vmem:[%s6218_s23 + $0x48] sm:$0xff]  }
  0xa5   : > { %5957 = vmatpush3.bf16.msra.mxu1 %v6791_v62  ;;  %5894 = vmatprep.mubr.msk.bf16.mxu1 %vm658_vm4, %v6122_v49  ;;  %v2302_v15 = vor.u32 %v2301_v56, %v2298_v50  ;;  %v2320_v55 = vshrl.u32 %v5244_v4, 16  ;;  %v2323_v33 = vshll.u32 %v5244_v4, 16  ;;  %v7114_v62 = vcombine.low %v2212_v52, %v2222_v59  ;;  %v7153_v45 = vld [vmem:[%s6218_s23 + $0xa4] sm:$0x1] }
  0xa6   : > { %v7120_v49 = vrot.slane %v2291_v44, 5  ;;  %v2329_v35 = vshll.u32 %v7099_v23, 16  ;;  %v7125_v58 = vrot.slane %v2288_v34, 4  ;;  %v2312_v54 = vor.u32 %v2311_v12, %v7110_v46  ;;  %8932 = vst [vmem:[#allocation12_spill] sm:$0xff] %v7153_v45  ;;  %v7160_v12 = vld [vmem:[%s6218_s23 + $0xb0] sm:$0x1] }
  0xa7   : > { %v2315_v52 = vshll.u32 %v7108_v2, 16  ;;  %v2333_v59 = vshrl.u32 %v7099_v23, 16  ;;  %v7157_v4 = vrot.slane %v2302_v15, 4  ;;  %v2322_v34 = vrot.slane %v2320_v55, 4  ;;  %8933 = vst [vmem:[#allocation4_spill] sm:$0xff] %v7160_v12 }
  0xa8   : > { %v2325_v56 = vrot.slane %v2323_v33, 5  ;;  %v2344_v44 = vshrl.u32 %v5247_v32, 16  ;;  %v7162_v36 = vrot.slane %v2329_v35, 5  ;;  %v2347_v8 = vshll.u32 %v5247_v32, 16  ;;  %v5250_v23 = vld [vmem:[%s6218_s23 + $0xb4] sm:$0xf] }
  0xa9   : > { %5929 = vmatmul.mubr.msk.bf16.gmra.mxu0 %vm658_vm4, %v6988_v0  ;;  %v2335_v50 = vrot.slane %v2333_v59, 4  ;;  %v2353_v0 = vshll.u32 %v7131_v14, 16  ;;  %v7171_v15 = vrot.slane %v2312_v54, 4  ;;  %v2317_v55 = vrot.slane %v2315_v52, 5  ;;  %v7174_v35 = vld [vmem:[%s6218_s23 + $0xb8] sm:$0xf] }
  0xaa   : > { %5932 = vmatprep.mubr.msk.bf16.mxu0 %vm658_vm4, %v6996_v48  ;;  %v2294_v48 = vsel %vm6270_vm5, %v7125_v58, %v7120_v49  ;;  %v2346_v33 = vrot.slane %v2344_v44, 4  ;;  %8934 = vst [vmem:[#allocation2_spill] sm:$0xff] %v7174_v35  ;;  %v2339_v32 = vshll.u32 %v7153_v45, 16  ;;  %v2349_v59 = vrot.slane %v2347_v8, 5  ;;  %v7186_v54 = vld [vmem:[%s6218_s23 + $0xbc] sm:$0x1] }
  0xab   : > { %v7178_v2 = vrot.slane %v2353_v0, 5  ;;  %v2308_v49 = vsel %vm6270_vm5, %v7157_v4, %v7110_v46  ;;  %v2326_v58 = vor.u32 %v2325_v56, %v2322_v34  ;;  %v2368_v52 = vshrl.u32 %v5250_v23, 16  ;;  %v7195_v4 = vld [vmem:[%s6218_s23 + $0xc4] sm:$0xf] }
  0xac   : > { %5895 = vmatmul.mubr.msk.bf16.gmra.mxu1 %vm658_vm4, %v6123_v40  ;;  %v2357_v40 = vshrl.u32 %v7131_v14, 16  ;;  %v2371_v44 = vshll.u32 %v5250_v23, 16  ;;  %v2363_v8 = vshll.u32 %v7160_v12, 16  ;;  %v2377_v0 = vshll.u32 %v7174_v35, 16  ;;  %v5253_v14 = vld [vmem:[%s6218_s23 + $0xc0] sm:$0xf] }
  0xad   : > { %5898 = vmatprep.mubr.msk.bf16.mxu1 %vm658_vm4, %v6124_v43  ;;  %v2336_v43 = vor.u32 %v2335_v50, %v7162_v36  ;;  %v2350_v53 = vor.u32 %v2349_v59, %v2346_v33  ;;  %v2370_v25 = vrot.slane %v2368_v52, 4  ;;  %v2381_v46 = vshrl.u32 %v7174_v35, 16  ;;  %v6126_v23 = vld [vmem:[%s6218_s23 + $0x54] sm:$0xff]  }
  0xae   : > { %v2359_v45 = vrot.slane %v2357_v40, 4  ;;  %v2373_v51 = vrot.slane %v2371_v44, 5  ;;  %v2318_v50 = vsel %vm6270_vm5, %v7171_v15, %v2317_v55  ;;  %v2341_v34 = vrot.slane %v2339_v32, 5  ;;  %v7213_v32 = vld [vmem:[%s6218_s23 + $0xc8] sm:$0x1] }
  0xaf   : > { %v7204_v40 = vrot.slane %v2377_v0, 5  ;;  %v2383_v59 = vrot.slane %v2381_v46, 4  ;;  %v2387_v52 = vshll.u32 %v7186_v54, 16  ;;  %v2392_v44 = vshrl.u32 %v5253_v14, 16 }
  0xb0   : > { %v2360_v56 = vor.u32 %v2359_v45, %v7178_v2  ;;  %v2374_v33 = vor.u32 %v2373_v51, %v2370_v25  ;;  %v2337_v35 = vrot.slane %v2336_v43, 4  ;;  %v2395_v12 = vshll.u32 %v5253_v14, 16 }
  0xb1   : > { %5933 = vmatmul.mubr.msk.bf16.gmra.mxu0 %vm658_vm4, %v7039_v3  ;;  %v2327_v3 = vrot.slane %v2326_v58, 4  ;;  %v2401_v18 = vshll.u32 %v7195_v4, 16  ;;  %v2351_v15 = vrot.slane %v2350_v53, 4  ;;  %v2365_v55 = vrot.slane %v2363_v8, 5 }
  0xb2   : > { %5936 = vmatprep.mubr.msk.bf16.mxu0 %vm658_vm4, %v7112_v16  ;;  %v2384_v45 = vor.u32 %v2383_v59, %v7204_v40  ;;  %v2394_v16 = vrot.slane %v2392_v44, 4  ;;  %v2361_v25 = vrot.slane %v2360_v56, 4  ;;  %v2397_v51 = vrot.slane %v2395_v12, 5  ;;  %v5292_v44 = vld [vmem:[%s6218_s23 + $0x30] sm:$0xe] }
  0xb3   : > { %v7216_v0 = vrot.slane %v2401_v18, 5  ;;  %v2405_v14 = vshrl.u32 %v7195_v4, 16  ;;  %v8935_v53 = vsel %vm6270_vm5, %v7087_v60, %v7063_v42  ;;  %v8936_v58 = vsel %vm6270_vm5, %v7080_v31, %v7026_v17  ;;  %v6127_v31 = vld [vmem:[%s6218_s23 + $0x60] sm:$0xff]  }
  0xb4   : > { %5899 = vmatmul.mubr.msk.bf16.gmra.mxu1 %vm658_vm4, %v6125_v9  ;;  %v5467_v9 = vld [vmem:[%s8855_s1 + $0xe] sm:$0x3]  ;;  %v5265_v12 = vcombine.low %v8936_v58, %v8935_v53  ;;  %v2375_v18 = vrot.slane %v2374_v33, 4  ;;  %v2385_v43 = vrot.slane %v2384_v45, 4  ;;  %v2389_v8 = vrot.slane %v2387_v52, 5 }
  0xb5   : > { %5902 = vmatprep.mubr.msk.bf16.mxu1 %vm658_vm4, %v6126_v23  ;;  %v8937_v46 = vsel %vm6270_vm5, %v7103_v21, %v7095_v41  ;;  %v8938_v42 = vsel %vm6270_vm5, %v7093_v19, %v7049_v7  ;;  %v2398_v23 = vor.u32 %v2397_v51, %v2394_v16  ;;  %v2407_v56 = vrot.slane %v2405_v14, 4  ;;  %v5532_v19 = vld [vmem:[%s8855_s1 + $0x10] sm:$0x3]  ;;  %v5291_v21 = vld [vmem:[%s6218_s23 + $0x24] sm:$0xe] }
  0xb6   : > { %v5266_v60 = vcombine.low %v8938_v42, %v8937_v46  ;;  %v2411_v17 = vshll.u32 %v7213_v32, 16  ;;  %v8939_v33 = vsel %vm6270_vm5, %v7105_v22, %v7072_v30  ;;  %v7249_v52 = vcombine.low %v2308_v49, %v2318_v50  ;;  %v6128_v30 = vld [vmem:[%s6218_s23 + $0x6c] sm:$0xff]   ;;  %v5293_v14 = vld [vmem:[%s6218_s23 + $0x3c] sm:$0xe] }
  0xb7   : > { %v5267_v59 = vcombine.low %v8939_v33, %v2294_v48  ;;  %v2332_v41 = vsel %vm6270_vm5, %v2327_v3, %v7162_v36  ;;  %v7255_v7 = vand.u32 %v5467_v9, %v8916_v1  ;;  %v2342_v22 = vsel %vm6270_vm5, %v2337_v35, %v2341_v34  ;;  %v7273_v50 = vld [vmem:[%s6218_s23 + $0xc] sm:$0xe] }
  0xb8   : > { %v2356_v36 = vsel %vm6270_vm5, %v2351_v15, %v7178_v2  ;;  %v2366_v48 = vsel %vm6270_vm5, %v2361_v25, %v2365_v55  ;;  %v2408_v49 = vor.u32 %v2407_v56, %v7216_v0  ;;  %v2390_v35 = vsel %vm6270_vm5, %v2385_v43, %v2389_v8  ;;  %v5295_v56 = vld [vmem:[%s6218_s23 + $0x54] sm:$0xe] }
  0xb9   : > { %5937 = vmatmul.mubr.msk.bf16.gmra.mxu0 %vm658_vm4, %v7114_v62  ;;  %v2380_v62 = vsel %vm6270_vm5, %v2375_v18, %v7204_v40  ;;  %v7281_v34 = vrot.slane %v2398_v23, 4  ;;  %v2775_v2 = vrot.slane %v6736_v47, 5  ;;  %6024 = vmatprep.subr.bf16.mxu1 %v7255_v7  ;;  %v7288_v15 = vrot.slane %v2411_v17, 5  ;;  %v6129_v17 = vld [vmem:[%s6218_s23 + $0x78] sm:$0xff]  }
  0xba   : > { %5940 = vmatprep.mubr.msk.bf16.mxu0 %vm658_vm4, %v5265_v12  ;;  %v7286_v3 = vrot.slane %v2408_v49, 4  ;;  %v7291_v55 = vand.u32 %v5532_v19, %v8916_v1  ;;  %v5307_v45 = vrot.slane %v5291_v21, 9  ;;  %v7294_v40 = vcombine.low %v2332_v41, %v2342_v22  ;;  %v5294_v12 = vld [vmem:[%s6218_s23 + $0x48] sm:$0xe]  ;;  %v6136_v47 = vld [vmem:[%s6218_s23 + $0x18] sm:$0xff]  }
  0xbb   : > { %v7296_v16 = vcombine.low %v2356_v36, %v2366_v48  ;;  %v5305_v25 = vrot.slane %v7273_v50, 9  ;;  %v2789_v51 = vrot.slane %v6814_v10, 5  ;;  %v7302_v9 = vcombine.low %v2380_v62, %v2390_v35  ;;  %v6130_v21 = vld [vmem:[%s6218_s23 + $0x84] sm:$0xff]   ;;  %v5296_v36 = vld [vmem:[%s6218_s23 + $0x60] sm:$0xe] }
  0xbc   : > { %5903 = vmatmul.mubr.msk.bf16.gmra.mxu1 %vm658_vm4, %v6127_v31  ;;  %v2778_v1 = vrot.slane %v6766_v57, 5  ;;  %6058 = vmatprep.subr.bf16.mxu0 %v7291_v55  ;;  %v2792_v53 = vrot.slane %v6828_v26, 5  ;;  %v5308_v58 = vrot.slane %v5292_v44, 9  ;;  %v2404_v10 = vsel %vm6270_vm5, %v7281_v34, %v7216_v0 }
  0xbd   : > { %5906 = vmatprep.mubr.msk.bf16.mxu1 %vm658_vm4, %v6128_v30  ;;  %v7314_v18 = vrot.slane %v2775_v2, 4  ;;  %v7318_v43 = vsel %vm6536_vm8, %v5307_v45, %v2789_v51  ;;  %v2791_v8 = vrot.slane %v2789_v51, 4  ;;  %v2414_v26 = vsel %vm6270_vm5, %v7286_v3, %v7288_v15  ;;  %v6135_v15 = vld [vmem:[%s6218_s23 + $0xc0] sm:$0xff]  }
  0xbe   : > { %v2796_v46 = vrot.slane %v6841_v5, 5  ;;  %v2799_v42 = vrot.slane %v6860_v6, 5  ;;  %v5309_v23 = vrot.slane %v5293_v14, 9  ;;  %v2803_v33 = vrot.slane %v6863_v39, 5  ;;  %v5298_v14 = vld [vmem:[%s6218_s23 + $0x78] sm:$0xe] }
  0xbf   : > { %v7330_v31 = vsel %vm6536_vm8, %v2791_v8, %v2792_v53  ;;  %v2806_v41 = vrot.slane %v6891_v37, 5  ;;  %v5310_v19 = vrot.slane %v5294_v12, 9  ;;  %v2810_v22 = vrot.slane %v6878_v13, 5 }
  0xc0   : > { %v5324_v5 = vcombine.low %v7318_v43, %v7330_v31  ;;  %v7340_v6 = vsel %vm6536_vm8, %v5308_v58, %v2796_v46  ;;  %v2798_v30 = vrot.slane %v2796_v46, 4  ;;  %v7347_v39 = vsel %vm6536_vm8, %v5309_v23, %v2803_v33  ;;  %v5299_v23 = vld [vmem:[%s6218_s23 + $0x84] sm:$0xe] }
  0xc1   : > { %5941 = vmatmul.mubr.msk.bf16.gmra.mxu0 %vm658_vm4, %v5266_v60  ;;  %v2805_v37 = vrot.slane %v2803_v33, 4  ;;  %v2813_v60 = vrot.slane %v6906_v24, 5  ;;  %v5311_v48 = vrot.slane %v5295_v56, 9  ;;  %v7356_v62 = vsel %vm6536_vm8, %v5310_v19, %v2810_v22  ;;  %v6131_v19 = vld [vmem:[%s6218_s23 + $0x90] sm:$0xff]  }
  0xc2   : > { %5944 = vmatprep.mubr.msk.bf16.mxu0 %vm658_vm4, %v5267_v59  ;;  %v7352_v49 = vsel %vm6536_vm8, %v2798_v30, %v2799_v42  ;;  %v2812_v13 = vrot.slane %v2810_v22, 4  ;;  %v2817_v35 = vrot.slane %v6911_v29, 5  ;;  %v5297_v59 = vld [vmem:[%s6218_s23 + $0x6c] sm:$0xe]  ;;  %v2820_v45 = vrot.slane %v6938_v28, 5  ;;  %v8940_v30 = vld [vmem:[#allocation5_spill] sm:$0xff] }
  0xc3   : > { %v5325_v44 = vcombine.low %v7340_v6, %v7352_v49  ;;  %v7365_v24 = vsel %vm6536_vm8, %v2805_v37, %v2806_v41  ;;  %v5312_v51 = vrot.slane %v5296_v36, 9  ;;  %v2824_v8 = vrot.slane %v6942_v11, 5  ;;  %v5300_v36 = vld [vmem:[%s6218_s23 + $0x90] sm:$0xe]  ;;  %v8950_v28 = vld [vmem:[#allocation2_spill] sm:$0xff] }
  0xc4   : > { %5907 = vmatmul.mubr.msk.bf16.gmra.mxu1 %vm658_vm4, %v6129_v17  ;;  %v5326_v29 = vcombine.low %v7347_v39, %v7365_v24  ;;  %v7374_v53 = vsel %vm6536_vm8, %v2812_v13, %v2813_v60  ;;  %v7378_v58 = vsel %vm6536_vm8, %v5311_v48, %v2817_v35  ;;  %v2819_v12 = vrot.slane %v2817_v35, 4  ;;  %v8941_v60 = vld [vmem:[#allocation6_spill] sm:$0xff] }
  0xc5   : > { %5910 = vmatprep.mubr.msk.bf16.mxu1 %vm658_vm4, %v6130_v21  ;;  %v2827_v46 = vrot.slane %v6991_v61, 5  ;;  %v5313_v42 = vrot.slane %v5297_v59, 9  ;;  %v2831_v17 = vrot.slane %v6964_v27, 5  ;;  %v2834_v33 = vrot.slane %v7015_v20, 5  ;;  %v6132_v27 = vld [vmem:[%s6218_s23 + $0x9c] sm:$0xff]   ;;  %v6133_v21 = vld [vmem:[%s6218_s23 + $0xa8] sm:$0xff]  }
  0xc6   : > { %v7387_v56 = vsel %vm6536_vm8, %v2819_v12, %v2820_v45  ;;  %v5314_v41 = vrot.slane %v5298_v14, 9  ;;  %v7396_v11 = vsel %vm6536_vm8, %v5312_v51, %v2824_v8  ;;  %v2826_v61 = vrot.slane %v2824_v8, 4  ;;  %v8942_v45 = vld [vmem:[#allocation7_spill] sm:$0xff]  ;;  %v5301_v14 = vld [vmem:[%s6218_s23 + $0x9c] sm:$0xe] }
  0xc7   : > { %v2838_v22 = vrot.slane %v8940_v30, 5  ;;  %v7405_v20 = vsel %vm6536_vm8, %v5313_v42, %v2831_v17  ;;  %v2833_v37 = vrot.slane %v2831_v17, 4  ;;  %v2841_v48 = vrot.slane %v8941_v60, 5  ;;  %v5304_v12 = vld [vmem:[%s6218_s23 + $0xc0] sm:$0xe] }
  0xc8   : > { %v5315_v13 = vrot.slane %v5299_v23, 9  ;;  %v7412_v35 = vsel %vm6536_vm8, %v2826_v61, %v2827_v46  ;;  %v2845_v51 = vrot.slane %v8942_v45, 5  ;;  %v5316_v46 = vrot.slane %v5300_v36, 9  ;;  %v5302_v23 = vld [vmem:[%s6218_s23 + $0xa8] sm:$0xe]  ;;  %v8945_v36 = vld [vmem:[#allocation9_spill] sm:$0xff] }
  0xc9   : > { %5945 = vmatmul.mubr.msk.bf16.gmra.mxu0 %vm658_vm4, %v7249_v52  ;;  %v7416_v52 = vsel %vm6536_vm8, %v5314_v41, %v2838_v22  ;;  %v2840_v59 = vrot.slane %v2838_v22, 4  ;;  %v7424_v8 = vsel %vm6536_vm8, %v2833_v37, %v2834_v33  ;;  %v2855_v37 = vrot.slane %v8945_v36, 5  ;;  %v5303_v45 = vld [vmem:[%s6218_s23 + $0xb4] sm:$0xe] }
  0xca   : > { %5948 = vmatprep.mubr.msk.bf16.mxu0 %vm658_vm4, %v7294_v40  ;;  %v8943_v40 = vld [vmem:[#allocation8_spill] sm:$0xff]  ;;  %v7437_v61 = vsel %vm6536_vm8, %v5315_v13, %v2845_v51  ;;  %v2847_v33 = vrot.slane %v2845_v51, 4  ;;  %v5317_v60 = vrot.slane %v5301_v14, 9  ;;  %v8946_v13 = vld [vmem:[#allocation10_spill] sm:$0xff]  ;;  %v5318_v17 = vrot.slane %v5302_v23, 9  ;;  %v8948_v14 = vld [vmem:[#allocation11_spill] sm:$0xff] }
  0xcb   : > { %v2848_v42 = vrot.slane %v8943_v40, 5  ;;  %v7433_v41 = vsel %vm6536_vm8, %v2840_v59, %v2841_v48  ;;  %v2859_v59 = vrot.slane %v8946_v13, 5  ;;  %v8947_v51 = vld [vmem:[#allocation12_spill] sm:$0xff]  ;;  %v2866_v30 = vrot.slane %v8948_v14, 5 }
  0xcc   : > { %5911 = vmatmul.mubr.msk.bf16.gmra.mxu1 %vm658_vm4, %v6131_v19  ;;  %v8944_v19 = vld [vmem:[#allocation3_spill] sm:$0xff]  ;;  %v2862_v40 = vrot.slane %v8947_v51, 5  ;;  %v8949_v13 = vld [vmem:[#allocation4_spill] sm:$0xff]  ;;  %v5319_v23 = vrot.slane %v5303_v45, 9  ;;  %v2779_v0 = vsel %vm6536_vm8, %v7314_v18, %v2778_v1  ;;  %v6156_v18 = vld [vmem:[%s6218_s23 + $0x20] sm:$0x1] }
  0xcd   : > { %5914 = vmatprep.mubr.msk.bf16.mxu1 %vm658_vm4, %v6132_v27  ;;  %v2852_v22 = vrot.slane %v8944_v19, 5  ;;  %v7447_v48 = vsel %vm6536_vm8, %v2847_v33, %v2848_v42  ;;  %v7462_v42 = vsel %vm6536_vm8, %v5317_v60, %v2859_v59  ;;  %v2861_v33 = vrot.slane %v2859_v59, 4  ;;  %v6134_v27 = vld [vmem:[%s6218_s23 + $0xb4] sm:$0xff]  }
  0xce   : > { %v2869_v51 = vrot.slane %v8949_v13, 5  ;;  %v2868_v14 = vrot.slane %v2866_v30, 4  ;;  %v2873_v60 = vrot.slane %v8950_v28, 5  ;;  %v5320_v59 = vrot.slane %v5304_v12, 9 }
  0xcf   : > { %v7455_v19 = vsel %vm6536_vm8, %v5316_v46, %v2852_v22  ;;  %v2854_v36 = vrot.slane %v2852_v22, 4  ;;  %v7474_v22 = vsel %vm6536_vm8, %v5318_v17, %v2866_v30  ;;  %v2880_v12 = vrot.slane %v7195_v4, 5 }
  0xd0   : > { %v7490_v28 = vsel %vm6536_vm8, %v2868_v14, %v2869_v51  ;;  %v2875_v30 = vrot.slane %v2873_v60, 4  ;;  %v2776_v4 = vsel %vm6536_vm8, %v5305_v25, %v2775_v2  ;;  %v6138_v14 = vld [vmem:[%s6218_s23 + $0x30] sm:$0xff]  }
  0xd1   : > { %5949 = vmatmul.mubr.msk.bf16.gmra.mxu0 %vm658_vm4, %v7296_v16  ;;  %v7470_v46 = vsel %vm6536_vm8, %v2854_v36, %v2855_v37  ;;  %v7483_v16 = vsel %vm6536_vm8, %v2861_v33, %v2862_v40  ;;  %v2876_v37 = vrot.slane %v7186_v54, 5  ;;  %v2883_v40 = vrot.slane %v7213_v32, 5  ;;  %v5290_v32 = vld [vmem:[%s6218_s23 + $0x18] sm:$0xe] }
  0xd2   : > { %5952 = vmatprep.mubr.msk.bf16.mxu0 %vm658_vm4, %v7302_v9  ;;  %v7494_v9 = vsel %vm6536_vm8, %v5319_v23, %v2873_v60  ;;  %v7534_v34 = vsel %vm6536_vm8, %v5320_v59, %v2880_v12  ;;  %v2882_v2 = vrot.slane %v2880_v12, 4  ;;  %v5306_v25 = vrot.slane %v5290_v32, 9  ;;  %v6137_v23 = vld [vmem:[%s6218_s23 + $0x24] sm:$0xff]   ;;  %v5419_v60 = vld [vmem:[%s6218_s23 + $0x18] sm:$0xf] }
  0xd3   : > { %v7522_v3 = vsel %vm6536_vm8, %v2875_v30, %v2876_v37  ;;  %v5322_v1 = vcombine.low %v2776_v4, %v2779_v0  ;;  %v5420_v59 = vld [vmem:[%s6218_s23 + $0x1c] sm:$0xf]  ;;  %v5422_v30 = vld [vmem:[%s6218_s23 + $0x24] sm:$0xf]  ;;  %v3587_v12 = vshrl.u32 %v5419_v60, 16 }
  0xd4   : > { %5915 = vmatmul.mubr.msk.bf16.gmra.mxu1 %vm658_vm4, %v6133_v21  ;;  %v5272_v21 = vcombine.low %v2404_v10, %v2414_v26  ;;  %v7539_v57 = vsel %vm6536_vm8, %v2882_v2, %v2883_v40  ;;  %v2785_v26 = vrot.slane %v6156_v18, 5  ;;  %v3590_v40 = vshll.u32 %v5419_v60, 16  ;;  %v6140_v2 = vld [vmem:[%s6218_s23 + $0x48] sm:$0xff]  }
  0xd5   : > { %5918 = vmatprep.mubr.msk.bf16.mxu1 %vm658_vm4, %v6134_v27  ;;  %v6155_v27 = vld [vmem:[%s6218_s23 + $0x1c] sm:$0xf]  ;;  %v3596_v4 = vshll.u32 %v5420_v59, 16  ;;  %v3600_v32 = vshrl.u32 %v5420_v59, 16 }
  0xd6   : > { %v2782_v36 = vrot.slane %v6155_v27, 5  ;;  %v3611_v27 = vshrl.u32 %v5422_v30, 16 }
  0xd7   : > { %v3602_v18 = vrot.slane %v3600_v32, 4 }
  0xd8   : > { %v2784_v10 = vrot.slane %v2782_v36, 4  ;;  %v2783_v13 = vsel %vm6536_vm8, %v5306_v25, %v2782_v36  ;;  %v3614_v36 = vshll.u32 %v5422_v30, 16  ;;  %v3589_v25 = vrot.slane %v3587_v12, 4 }
  0xd9   : > { %5953 = vmatmul.mubr.msk.bf16.gmra.mxu0 %vm658_vm4, %v5272_v21  ;;  %v7561_v21 = vld [vmem:[%s6218_s23 + $0x28] sm:$0xf]  ;;  %v3613_v43 = vrot.slane %v3611_v27, 4 }
  0xda   : > { %5992 = vmatprep.mubr.msk.bf16.mxu0 %vm658_vm4, %v6136_v47  ;;  %v2786_v51 = vsel %vm6536_vm8, %v2784_v10, %v2785_v26  ;;  %v3620_v0 = vshll.u32 %v7561_v21, 16  ;;  %v3624_v47 = vshrl.u32 %v7561_v21, 16  ;;  %v7574_v10 = vrot.slane %v3596_v4, 5 }
  0xdb   : > { %v5323_v37 = vcombine.low %v2783_v13, %v2786_v51  ;;  %v4330_v26 = vrot.slane %v5420_v59, 5  ;;  %v7578_v13 = vld [vmem:[%s6218_s23 + $0x2c] sm:$0x1]  ;;  %v3616_v31 = vrot.slane %v3614_v36, 5  ;;  %v7588_v59 = vld [vmem:[%s6218_s23 + $0x34] sm:$0xf] }
  0xdc   : > { %5919 = vmatmul.mubr.msk.bf16.gmra.mxu1 %vm658_vm4, %v6135_v15  ;;  %v5421_v15 = vld [vmem:[%s6218_s23 + $0x20] sm:$0x1]  ;;  %v7583_v51 = vrot.slane %v3620_v0, 5  ;;  %v3603_v12 = vor.u32 %v3602_v18, %v7574_v10  ;;  %v3630_v32 = vshll.u32 %v7578_v13, 16  ;;  %v4337_v0 = vrot.slane %v7561_v21, 5 }
  0xdd   : > { %5958 = vmatprep.mubr.msk.bf16.mxu1 %vm658_vm4, %v5322_v1  ;;  %v3592_v1 = vrot.slane %v3590_v40, 5  ;;  %v4332_v40 = vrot.slane %v4330_v26, 4  ;;  %v4333_v4 = vrot.slane %v5421_v15, 5  ;;  %v3617_v36 = vor.u32 %v3616_v31, %v3613_v43  ;;  %v5428_v31 = vld [vmem:[%s6218_s23 + $0x3c] sm:$0xf] }
  0xde   : > { %v3604_v24 = vrot.slane %v3603_v12, 4  ;;  %v4339_v33 = vrot.slane %v4337_v0, 4  ;;  %v7627_v12 = vld [vmem:[%s6218_s23 + $0x38] sm:$0x1] }
  0xdf   : > { %v3593_v60 = vor.u32 %v3592_v1, %v3589_v25  ;;  %v3648_v25 = vshrl.u32 %v7588_v59, 16  ;;  %v6142_v1 = vld [vmem:[%s6218_s23 + $0x60] sm:$0xff]  }
  0xe1   : > { %5993 = vmatmul.mubr.msk.bf16.vlgmr.msra.gmra.mxu0 %vm658_vm4, %v6137_v23  ;;  %v3626_v23 = vrot.slane %v3624_v47, 4  ;;  %v3594_v18 = vrot.slane %v3593_v60, 4  ;;  %v4340_v60 = vrot.slane %v7578_v13, 5 }
  0xe2   : > { %6059 = vmatpush3.bf16.msra.mxu0 %v7291_v55  ;;  %5996 = vmatprep.mubr.msk.bf16.mxu0 %vm658_vm4, %v6138_v14  ;;  %v6139_v55 = vld [vmem:[%s6218_s23 + $0x3c] sm:$0xff]   ;;  %v5425_v14 = vld [vmem:[%s6218_s23 + $0x30] sm:$0xf] }
  0xe3   : > { %v3635_v47 = vshrl.u32 %v5425_v14, 16  ;;  %v3627_v6 = vor.u32 %v3626_v23, %v7583_v51  ;;  %v3638_v49 = vshll.u32 %v5425_v14, 16  ;;  %v3618_v14 = vrot.slane %v3617_v36, 4 }
  0xe4   : > { %5959 = vmatmul.mubr.msk.bf16.vlgmr.msra.gmra.mxu1 %vm658_vm4, %v5323_v37  ;;  %v3606_v37 = vshll.u32 %v5421_v15, 16  ;;  %v3659_v36 = vshrl.u32 %v5428_v31, 16  ;;  %v3599_v13 = vsel %vm6270_vm5, %v3594_v18, %v7574_v10  ;;  %v3654_v18 = vshll.u32 %v7627_v12, 16 }
  0xe5   : > { %6025 = vmatpush3.bf16.msra.mxu1 %v7255_v7  ;;  %5962 = vmatprep.mubr.msk.bf16.mxu1 %vm658_vm4, %v5324_v5  ;;  %v5500_v7 = vld [vmem:[%s6218_s23 + $0x18] sm:$0xe]  ;;  %v7581_v5 = vpop.f32.mrf.mxu0  ;;  %v3623_v10 = vsel %vm6270_vm5, %v3618_v14, %v7583_v51  ;;  %v4344_v14 = vrot.slane %v7588_v59, 5 }
  0xe6   : > { %v5516_v30 = vrot.slane %v5500_v7, 9  ;;  %v3608_v21 = vrot.slane %v3606_v37, 5  ;;  %v3632_v7 = vrot.slane %v3630_v32, 5  ;;  %v3637_v37 = vrot.slane %v3635_v47, 4 }
  0xe7   : > { %v7605_v15 = vpop.f32.mrf.mxu0  ;;  %v3650_v32 = vrot.slane %v3648_v25, 4  ;;  %v7695_v17 = vrot.slane %v3654_v18, 5  ;;  %v4346_v45 = vrot.slane %v4344_v14, 4 }
  0xe8   : > { %v7613_v39 = vsel %vm6536_vm8, %v5516_v30, %v4330_v26  ;;  %v3628_v30 = vrot.slane %v3627_v6, 4  ;;  %v3609_v47 = vsel %vm6270_vm5, %v3604_v24, %v3608_v21  ;;  %v7640_v6 = vld [vmem:[%s6218_s23 + $0x40] sm:$0xf]  ;;  %v8955_v21 = vcombine.low %v7378_v58, %v7387_v56  ;;  %v6143_v24 = vld [vmem:[%s6218_s23 + $0x6c] sm:$0xff]  }
  0xe9   : > { %5997 = vmatmul.mubr.msk.bf16.gmra.mxu0 %vm658_vm4, %v6139_v55  ;;  %v5501_v55 = vld [vmem:[%s6218_s23 + $0x24] sm:$0xe]  ;;  %v7624_v26 = vpop.f32.mrf.mxu0  ;;  %v3668_v58 = vshll.u32 %v7640_v6, 16  ;;  %v3672_v56 = vshrl.u32 %v7640_v6, 16 }
  0xea   : > { %6000 = vmatprep.mubr.msk.bf16.mxu0 %vm658_vm4, %v6140_v2  ;;  %v7596_v27 = vpop.f32.mrf.mxu1  ;;  %v6141_v2 = vld [vmem:[%s6218_s23 + $0x54] sm:$0xff]   ;;  %v5517_v43 = vrot.slane %v5501_v55, 9  ;;  %v3662_v55 = vshll.u32 %v5428_v31, 16  ;;  %v5502_v31 = vld [vmem:[%s6218_s23 + $0x30] sm:$0xe] }
  0xeb   : > { %8951 = vst [vmem:[#allocation5_spill] sm:$0xff] %v7596_v27  ;;  %v7669_v51 = vpop.f32.mrf.mxu0 }
  0xec   : > { %5963 = vmatmul.mubr.msk.bf16.gmra.mxu1 %vm658_vm4, %v5325_v44  ;;  %v3644_v44 = vshll.u32 %v7588_v59, 16  ;;  %v7620_v23 = vpop.f32.mrf.mxu1  ;;  %v7653_v25 = vsel %vm6536_vm8, %v5517_v43, %v4337_v0  ;;  %v3633_v0 = vsel %vm6270_vm5, %v3628_v30, %v3632_v7  ;;  %v7683_v30 = vcombine.low %v3599_v13, %v3609_v47  ;;  %v7699_v47 = vld [vmem:[%s6218_s23 + $0x58] sm:$0xf] }
  0xed   : > { %5966 = vmatprep.mubr.msk.bf16.mxu1 %vm658_vm4, %v5326_v29  ;;  %v7617_v29 = vsel %vm6536_vm8, %v4332_v40, %v4333_v4  ;;  %8952 = vst [vmem:[#allocation6_spill] sm:$0xff] %v7620_v23  ;;  %v3640_v40 = vrot.slane %v3638_v49, 5  ;;  %v8953_v49 = vcombine.low %v7356_v62, %v7374_v53  ;;  %v5431_v62 = vld [vmem:[%s6218_s23 + $0x48] sm:$0xf]  ;;  %v7662_v53 = vld [vmem:[%s6218_s23 + $0x4c] sm:$0xf]  ;;  %v7685_v59 = vcombine.low %v3623_v10, %v3633_v0 }
  0xee   : > { %v7629_v4 = vrot.slane %v3644_v44, 5  ;;  %v7646_v44 = vpop.f32.mrf.mxu1  ;;  %v3686_v50 = vshll.u32 %v5431_v62, 16  ;;  %v3692_v54 = vshll.u32 %v7662_v53, 16  ;;  %v3696_v7 = vshrl.u32 %v7662_v53, 16  ;;  %v7705_v0 = vld [vmem:[%s6218_s23 + $0x44] sm:$0x1] }
  0xef   : > { %8954 = vst [vmem:[#allocation7_spill] sm:$0xff] %v7646_v44  ;;  %v3641_v43 = vor.u32 %v3640_v40, %v3637_v37  ;;  %v4347_v13 = vrot.slane %v7627_v12, 5  ;;  %v5503_v40 = vld [vmem:[%s6218_s23 + $0x3c] sm:$0xe]  ;;  %v8958_v23 = vcombine.low %v7396_v11, %v7412_v35 }
  0xf0   : > { %v7681_v37 = vpop.f32.mrf.mxu1  ;;  %v7710_v44 = vrot.slane %v3692_v54, 5  ;;  %v3698_v12 = vrot.slane %v3696_v7, 4  ;;  %v8960_v54 = vcombine.low %v7405_v20, %v7424_v8  ;;  %v4351_v20 = vrot.slane %v7640_v6, 5  ;;  %v6146_v8 = vld [vmem:[%s6218_s23 + $0x90] sm:$0xff]   ;;  %v5437_v6 = vld [vmem:[%s6218_s23 + $0x60] sm:$0xf] }
  0xf1   : > { %6001 = vmatmul.mubr.msk.bf16.gmra.mxu0 %vm658_vm4, %v6141_v2  ;;  %v3664_v2 = vrot.slane %v3662_v55, 5  ;;  %8956 = vst [vmem:[#allocation8_spill] sm:$0xff] %v7681_v37  ;;  %v3688_v37 = vrot.slane %v3686_v50, 5  ;;  %v6145_v50 = vld [vmem:[%s6218_s23 + $0x84] sm:$0xff]   ;;  %v5519_v35 = vrot.slane %v5503_v40, 9 }
  0xf2   : > { %6004 = vmatprep.mubr.msk.bf16.mxu0 %vm658_vm4, %v6142_v1  ;;  %v7657_v1 = vsel %vm6536_vm8, %v4339_v33, %v4340_v60  ;;  %v3651_v33 = vor.u32 %v3650_v32, %v7629_v4  ;;  %v6144_v60 = vld [vmem:[%s6218_s23 + $0x78] sm:$0xff]   ;;  %v5518_v32 = vrot.slane %v5502_v31, 9 }
  0xf4   : > { %5967 = vmatmul.mubr.msk.bf16.gmra.mxu1 %vm658_vm4, %v8953_v49  ;;  %v3661_v49 = vrot.slane %v3659_v36, 4  ;;  %v5434_v36 = vld [vmem:[%s6218_s23 + $0x54] sm:$0xf]  ;;  %v7702_v10 = vrot.slane %v3651_v33, 4 }
  0xf5   : > { %5970 = vmatprep.mubr.msk.bf16.mxu1 %vm658_vm4, %v8955_v21  ;;  %v3683_v21 = vshrl.u32 %v5431_v62, 16  ;;  %v7693_v62 = vrot.slane %v3641_v43, 4  ;;  %v3674_v43 = vrot.slane %v3672_v56, 4  ;;  %v3720_v56 = vshrl.u32 %v7699_v47, 16 }
  0xf6   : > { %v7691_v55 = vpop.f32.mrf.mxu0  ;;  %v3665_v31 = vor.u32 %v3664_v2, %v3661_v49  ;;  %v3707_v2 = vshrl.u32 %v5434_v36, 16  ;;  %v3710_v49 = vshll.u32 %v5434_v36, 16 }
  0xf7   : > { %8957 = vst [vmem:[#allocation3_spill] sm:$0xff] %v7691_v55  ;;  %v3685_v18 = vrot.slane %v3683_v21, 4  ;;  %v7740_v21 = vsel %vm6536_vm8, %v4346_v45, %v4347_v13  ;;  %v3699_v45 = vor.u32 %v3698_v12, %v7710_v44  ;;  %v4358_v12 = vrot.slane %v7662_v53, 5  ;;  %v7767_v55 = vld [vmem:[%s6218_s23 + $0x5c] sm:$0x1] }
  0xf8   : > { %v7728_v11 = vpop.f32.mrf.mxu0  ;;  %v3709_v27 = vrot.slane %v3707_v2, 4  ;;  %v8964_v53 = vcombine.low %v7416_v52, %v7433_v41  ;;  %v8966_v52 = vcombine.low %v7437_v61, %v7447_v48  ;;  %v6147_v41 = vld [vmem:[%s6218_s23 + $0x9c] sm:$0xff]   ;;  %v4365_v61 = vrot.slane %v7699_v47, 5 }
  0xf9   : > { %6005 = vmatmul.mubr.msk.bf16.gmra.mxu0 %vm658_vm4, %v6143_v24  ;;  %v7707_v24 = vrot.slane %v3668_v58, 5  ;;  %v3716_v58 = vshll.u32 %v7699_v47, 16  ;;  %8961 = vst [vmem:[#allocation10_spill] sm:$0xff] %v7728_v11  ;;  %v3712_v11 = vrot.slane %v3710_v49, 5 }
  0xfa   : > { %6008 = vmatprep.mubr.msk.bf16.mxu0 %vm658_vm4, %v6144_v60  ;;  %v7716_v33 = vpop.f32.mrf.mxu1  ;;  %v7719_v60 = vld [vmem:[%s6218_s23 + $0x50] sm:$0x1]  ;;  %v7760_v40 = vpop.f32.mrf.mxu0 }
  0xfb   : > { %8959 = vst [vmem:[#allocation9_spill] sm:$0xff] %v7716_v33  ;;  %v3675_v36 = vor.u32 %v3674_v43, %v7707_v24  ;;  %v7750_v33 = vrot.slane %v3665_v31, 4  ;;  %v7757_v7 = vrot.slane %v3716_v58, 5  ;;  %v3722_v43 = vrot.slane %v3720_v56, 4  ;;  %8963 = vst [vmem:[#allocation11_spill] sm:$0xff] %v7760_v40 }
  0xfc   : > { %5971 = vmatmul.mubr.msk.bf16.gmra.mxu1 %vm658_vm4, %v8958_v23  ;;  %v7736_v23 = vsel %vm6536_vm8, %v5518_v32, %v4344_v14  ;;  %v3689_v14 = vor.u32 %v3688_v37, %v3685_v18  ;;  %v3702_v32 = vshll.u32 %v7719_v60, 16  ;;  %v7755_v13 = vpop.f32.mrf.mxu1  ;;  %v4353_v31 = vrot.slane %v4351_v20, 4  ;;  %v5504_v58 = vld [vmem:[%s6218_s23 + $0x48] sm:$0xe] }
  0xfd   : > { %5974 = vmatprep.mubr.msk.bf16.mxu1 %vm658_vm4, %v8960_v54  ;;  %v3678_v54 = vshll.u32 %v7705_v0, 16  ;;  %8962 = vst [vmem:[#allocation12_spill] sm:$0xff] %v7755_v13  ;;  %v4354_v18 = vrot.slane %v7705_v0, 5  ;;  %v3676_v2 = vrot.slane %v3675_v36, 4  ;;  %v3731_v56 = vshrl.u32 %v5437_v6, 16 }
  0xfe   : > { %v7773_v13 = vsel %vm6536_vm8, %v5519_v35, %v4351_v20  ;;  %v3690_v37 = vrot.slane %v3689_v14, 4  ;;  %v3700_v40 = vrot.slane %v3699_v45, 4  ;;  %v3704_v0 = vrot.slane %v3702_v32, 5  ;;  %v7788_v14 = vld [vmem:[%s6218_s23 + $0x64] sm:$0xf]  ;;  %v7795_v45 = vpop.f32.mrf.mxu0 }
  0xff   : > { %v3680_v49 = vrot.slane %v3678_v54, 5  ;;  %v3671_v36 = vsel %vm6270_vm5, %v7750_v33, %v7707_v24  ;;  %v3713_v54 = vor.u32 %v3712_v11, %v3709_v27  ;;  %v3723_v35 = vor.u32 %v3722_v43, %v7757_v7  ;;  %8967 = vst [vmem:[#allocation2_spill] sm:$0xff] %v7795_v45  ;;  %v5505_v11 = vld [vmem:[%s6218_s23 + $0x54] sm:$0xe]  ;;  %v6151_v45 = vld [vmem:[%s6218_s23 + $0xcc] sm:$0xff]  }
 0x100   : > { %v3726_v20 = vshll.u32 %v7767_v55, 16  ;;  %v7799_v32 = vsel %vm6536_vm8, %v4353_v31, %v4354_v18  ;;  %v5520_v24 = vrot.slane %v5504_v58, 9  ;;  %v4360_v27 = vrot.slane %v4358_v12, 4 }
 0x101   : > { %6009 = vmatmul.mubr.msk.bf16.gmra.mxu0 %vm658_vm4, %v6145_v50  ;;  %v3734_v50 = vshll.u32 %v5437_v6, 16  ;;  %v4361_v33 = vrot.slane %v7719_v60, 5  ;;  %v6148_v6 = vld [vmem:[%s6218_s23 + $0xa8] sm:$0xff]   ;;  %v3681_v43 = vsel %vm6270_vm5, %v3676_v2, %v3680_v49  ;;  %v3733_v48 = vrot.slane %v3731_v56, 4 }
 0x102   : > { %6012 = vmatprep.mubr.msk.bf16.mxu0 %vm658_vm4, %v6146_v8  ;;  %v7779_v8 = vpop.f32.mrf.mxu1  ;;  %v3705_v31 = vsel %vm6270_vm5, %v3700_v40, %v3704_v0  ;;  %v3740_v18 = vshll.u32 %v7788_v14, 16  ;;  %v3744_v60 = vshrl.u32 %v7788_v14, 16  ;;  %v3724_v2 = vrot.slane %v3723_v35, 4  ;;  %v7817_v56 = vld [vmem:[%s6218_s23 + $0x68] sm:$0x1] }
 0x103   : > { %8965 = vst [vmem:[#allocation4_spill] sm:$0xff] %v7779_v8  ;;  %v3714_v8 = vrot.slane %v3713_v54, 4  ;;  %v3728_v47 = vrot.slane %v3726_v20, 5  ;;  %v5521_v49 = vrot.slane %v5505_v11, 9  ;;  %v8970_v40 = vsel %vm6270_vm5, %v7702_v10, %v7695_v17  ;;  %v5440_v20 = vld [vmem:[%s6218_s23 + $0x6c] sm:$0xf] }
 0x104   : > { %5975 = vmatmul.mubr.msk.bf16.gmra.mxu1 %vm658_vm4, %v8964_v53  ;;  %v3736_v53 = vrot.slane %v3734_v50, 5  ;;  %v7814_v58 = vpop.f32.mrf.mxu1  ;;  %v7838_v54 = vsel %vm6536_vm8, %v5520_v24, %v4358_v12  ;;  %v7842_v35 = vsel %vm6536_vm8, %v4360_v27, %v4361_v33  ;;  %v7845_v17 = vcombine.low %v3671_v36, %v3681_v43  ;;  %v5506_v33 = vld [vmem:[%s6218_s23 + $0x60] sm:$0xe]  ;;  %v5446_v43 = vld [vmem:[%s6218_s23 + $0x84] sm:$0xf] }
 0x105   : > { %5978 = vmatprep.mubr.msk.bf16.mxu1 %vm658_vm4, %v8966_v52  ;;  %v3695_v52 = vsel %vm6270_vm5, %v3690_v37, %v7710_v44  ;;  %8968 = vst [vmem:[#allocation13_spill] sm:$0xff] %v7814_v58  ;;  %v8971_v37 = vsel %vm6270_vm5, %v7693_v62, %v7629_v4  ;;  %v4367_v4 = vrot.slane %v4365_v61, 4  ;;  %v4368_v62 = vrot.slane %v7767_v55, 5 }
 0x106   : > { %v7832_v50 = vcombine.low %v8971_v37, %v8970_v40  ;;  %8972 = vst [vmem:[#allocation15_spill] sm:$0xff] %v7845_v17  ;;  %v3737_v10 = vor.u32 %v3736_v53, %v3733_v48  ;;  %v7852_v11 = vcombine.low %v3695_v52, %v3705_v31  ;;  %v7854_v12 = vrot.slane %v3740_v18, 5 }
 0x107   : > { %v7820_v44 = vpop.f32.mrf.mxu0  ;;  %v7856_v24 = vrot.slane %v3744_v60, 4  ;;  %v3750_v27 = vshll.u32 %v7817_v56, 16  ;;  %v8974_v36 = vcombine.low %v7455_v19, %v7470_v46  ;;  %v3719_v48 = vsel %vm6270_vm5, %v3714_v8, %v7757_v7  ;;  %v5443_v19 = vld [vmem:[%s6218_s23 + $0x78] sm:$0xf] }
 0x108   : > { %8969 = vst [vmem:[#allocation14_spill] sm:$0xff] %v7820_v44  ;;  %8973 = vst [vmem:[#allocation16_spill] sm:$0xff] %v7852_v11  ;;  %v3729_v53 = vsel %vm6270_vm5, %v3724_v2, %v3728_v47  ;;  %v7876_v52 = vsel %vm6536_vm8, %v5521_v49, %v4365_v61  ;;  %v8976_v46 = vcombine.low %v7462_v42, %v7483_v16  ;;  %v3755_v18 = vshrl.u32 %v5440_v20, 16  ;;  %v7888_v2 = vld [vmem:[%s6218_s23 + $0x7c] sm:$0xf]  ;;  %v6150_v61 = vld [vmem:[%s6218_s23 + $0xc0] sm:$0xff]  }
 0x109   : > { %6013 = vmatmul.mubr.msk.bf16.gmra.mxu0 %vm658_vm4, %v6147_v41  ;;  %v7850_v41 = vld [vmem:[%s6218_s23 + $0x70] sm:$0xf]  ;;  %v7883_v31 = vpop.f32.mrf.mxu0  ;;  %v3758_v60 = vshll.u32 %v5440_v20, 16  ;;  %v7893_v47 = vsel %vm6536_vm8, %v4367_v4, %v4368_v62  ;;  %v7895_v42 = vrot.slane %v3737_v10, 4  ;;  %v5522_v16 = vrot.slane %v5506_v33, 9 }
 0x10a   : > { %6016 = vmatprep.mubr.msk.bf16.mxu0 %vm658_vm4, %v6148_v6  ;;  %v6149_v6 = vld [vmem:[%s6218_s23 + $0xb4] sm:$0xff]   ;;  %8977 = vst [vmem:[#allocation18_spill] sm:$0xff] %v7883_v31  ;;  %v3764_v7 = vshll.u32 %v7850_v41, 16  ;;  %v3768_v8 = vshrl.u32 %v7850_v41, 16  ;;  %v4372_v49 = vrot.slane %v7788_v14, 5  ;;  %v7898_v40 = vcombine.low %v3719_v48, %v3729_v53 }
 0x10b   : > { %v3747_v37 = vor.u32 %v7856_v24, %v7854_v12  ;;  %v7902_v20 = vrot.slane %v3750_v27, 5  ;;  %v3779_v4 = vshrl.u32 %v5443_v19, 16  ;;  %v3782_v62 = vshll.u32 %v5443_v19, 16  ;;  %v7914_v33 = vld [vmem:[%s6218_s23 + $0x88] sm:$0xf]  ;;  %v7917_v24 = vpop.f32.mrf.mxu0 }
 0x10c   : > { %5979 = vmatmul.mubr.msk.bf16.gmra.mxu1 %vm658_vm4, %v8974_v36  ;;  %v7864_v55 = vpop.f32.mrf.mxu1  ;;  %8978 = vst [vmem:[#allocation19_spill] sm:$0xff] %v7898_v40  ;;  %v4375_v36 = vrot.slane %v7817_v56, 5  ;;  %v3788_v14 = vshll.u32 %v7888_v2, 16  ;;  %v3792_v10 = vshrl.u32 %v7888_v2, 16  ;;  %8980 = vst [vmem:[#allocation21_spill] sm:$0xff] %v7917_v24  ;;  %v3757_v56 = vrot.slane %v3755_v18, 4 }
 0x10d   : > { %8975 = vst [vmem:[#allocation17_spill] sm:$0xff] %v7864_v55  ;;  %5982 = vmatprep.mubr.msk.bf16.mxu1 %vm658_vm4, %v8976_v46  ;;  %v7906_v46 = vld [vmem:[%s6218_s23 + $0x74] sm:$0x1]  ;;  %v3760_v27 = vrot.slane %v3758_v60, 5  ;;  %v7919_v48 = vrot.slane %v3764_v7, 5  ;;  %v3770_v53 = vrot.slane %v3768_v8, 4  ;;  %v8981_v19 = vcombine.low %v7474_v22, %v7490_v28  ;;  %v7947_v40 = vpop.f32.mrf.mxu0 }
 0x10e   : > { %v7909_v0 = vpop.f32.mrf.mxu1  ;;  %v4374_v55 = vrot.slane %v4372_v49, 4  ;;  %v7932_v18 = vld [vmem:[%s6218_s23 + $0x80] sm:$0x1]  ;;  %v7935_v60 = vld [vmem:[%s6218_s23 + $0x6c] sm:$0xe]  ;;  %v3803_v7 = vshrl.u32 %v5446_v43, 16 }
 0x10f   : > { %8979 = vst [vmem:[#allocation20_spill] sm:$0xff] %v7909_v0  ;;  %v7928_v0 = vsel %vm6536_vm8, %v5522_v16, %v4372_v49  ;;  %v3806_v8 = vshll.u32 %v5446_v43, 16  ;;  %v3816_v58 = vshrl.u32 %v7914_v33, 16  ;;  %v3781_v49 = vrot.slane %v3779_v4, 4  ;;  %8983 = vst [vmem:[#allocation23_spill] sm:$0xff] %v7947_v40 }
 0x110   : > { %v7943_v16 = vpop.f32.mrf.mxu1  ;;  %v3784_v24 = vrot.slane %v3782_v62, 5  ;;  %v7945_v31 = vrot.slane %v3788_v14, 5  ;;  %v3794_v44 = vrot.slane %v3792_v10, 4  ;;  %v8984_v43 = vcombine.low %v7494_v9, %v7522_v3  ;;  %v7966_v3 = vld [vmem:[%s6218_s23 + $0x8c] sm:$0x1] }
 0x111   : > { %6017 = vmatmul.mubr.msk.bf16.gmra.mxu0 %vm658_vm4, %v6149_v6  ;;  %v3774_v6 = vshll.u32 %v7906_v46, 16  ;;  %8982 = vst [vmem:[#allocation22_spill] sm:$0xff] %v7943_v16  ;;  %v3761_v22 = vor.u32 %v3760_v27, %v3757_v56  ;;  %v3771_v28 = vor.u32 %v3770_v53, %v7919_v48  ;;  %v3798_v4 = vshll.u32 %v7932_v18, 16  ;;  %v5508_v56 = vld [vmem:[%s6218_s23 + $0x78] sm:$0xe] }
 0x112   : > { %6020 = vmatprep.mubr.msk.bf16.mxu0 %vm658_vm4, %v6150_v61  ;;  %v3812_v61 = vshll.u32 %v7914_v33, 16  ;;  %v7957_v62 = vrot.slane %v3747_v37, 4  ;;  %v7961_v14 = vsel %vm6536_vm8, %v4374_v55, %v4375_v36  ;;  %v5523_v10 = vrot.slane %v7935_v60, 9  ;;  %v7971_v16 = vpop.f32.mrf.mxu1  ;;  %v5449_v60 = vld [vmem:[%s6218_s23 + $0x90] sm:$0xf] }
 0x113   : > { %v4386_v9 = vrot.slane %v7888_v2, 5  ;;  %v3805_v27 = vrot.slane %v3803_v7, 4  ;;  %v3808_v53 = vrot.slane %v3806_v8, 5  ;;  %8985 = vst [vmem:[#allocation24_spill] sm:$0xff] %v7971_v16  ;;  %v3776_v37 = vrot.slane %v3774_v6, 5 }
 0x114   : > { %5983 = vmatmul.mubr.msk.bf16.gmra.mxu1 %vm658_vm4, %v8981_v19  ;;  %v4379_v19 = vrot.slane %v7850_v41, 5  ;;  %v7969_v41 = vrot.slane %v3812_v61, 5  ;;  %v4382_v40 = vrot.slane %v7906_v46, 5  ;;  %v3785_v55 = vor.u32 %v3784_v24, %v3781_v49  ;;  %v7980_v61 = vld [vmem:[%s6218_s23 + $0x94] sm:$0xf] }
 0x115   : > { %5986 = vmatprep.mubr.msk.bf16.mxu1 %vm658_vm4, %v8984_v43  ;;  %v3818_v43 = vrot.slane %v3816_v58, 4  ;;  %v3795_v36 = vor.u32 %v3794_v44, %v7945_v31  ;;  %v3762_v2 = vrot.slane %v3761_v22, 4  ;;  %v3772_v7 = vrot.slane %v3771_v28, 4 }
 0x116   : > { %v4381_v17 = vrot.slane %v4379_v19, 4  ;;  %v3800_v8 = vrot.slane %v3798_v4, 5  ;;  %v8986_v58 = vcombine.low %v7613_v39, %v7617_v29  ;;  %v5524_v46 = vrot.slane %v5508_v56, 9 }
 0x117   : > { %v4388_v24 = vrot.slane %v4386_v9, 4  ;;  %v4389_v44 = vrot.slane %v7932_v18, 5  ;;  %v3822_v6 = vshll.u32 %v7966_v3, 16  ;;  %v3819_v22 = vor.u32 %v3818_v43, %v7969_v41 }
 0x118   : > { %v3827_v28 = vshrl.u32 %v5449_v60, 16  ;;  %v3830_v4 = vshll.u32 %v5449_v60, 16  ;;  %v8988_v39 = vcombine.low %v7534_v34, %v7539_v57  ;;  %v3786_v29 = vrot.slane %v3785_v55, 4 }
 0x119   : > { %v7976_v11 = vpop.f32.mrf.mxu0  ;;  %6021 = vmatmul.mubr.msk.bf16.gmra.mxu0 %vm658_vm4, %v6151_v45  ;;  %v3809_v45 = vor.u32 %v3808_v53, %v3805_v27  ;;  %v3796_v56 = vrot.slane %v3795_v36, 4  ;;  %v3836_v18 = vshll.u32 %v7980_v61, 16  ;;  %v3753_v27 = vsel %vm6270_vm5, %v7957_v62, %v7902_v20 }
 0x11a   : > { %6060 = vmatprep.mubr.msk.bf16.mxu0 %vm658_vm4, %v8986_v58  ;;  %v3840_v58 = vshrl.u32 %v7980_v61, 16  ;;  %v3767_v34 = vsel %vm6270_vm5, %v3762_v2, %v7919_v48  ;;  %v8012_v57 = vsel %vm6536_vm8, %v5523_v10, %v4379_v19  ;;  %v8016_v53 = vsel %vm6536_vm8, %v4381_v17, %v4382_v40  ;;  %v5509_v19 = vld [vmem:[%s6218_s23 + $0x84] sm:$0xe]  ;;  %v9027_v38 = vld [vmem:[#allocation24_spill] sm:$0xff] }
 0x11b   : > { %v7988_v49 = vpop.f32.mrf.mxu0  ;;  %v8024_v20 = vsel %vm6536_vm8, %v5524_v46, %v4386_v9  ;;  %v8028_v48 = vsel %vm6536_vm8, %v4388_v24, %v4389_v44  ;;  %v3824_v62 = vrot.slane %v3822_v6, 5  ;;  %v3810_v17 = vrot.slane %v3809_v45, 4  ;;  %v8052_v45 = vld [vmem:[%s6218_s23 + $0x98] sm:$0x1] }
 0x11c   : > { %8987 = vst [vmem:[#allocation25_spill] sm:$0xff] %v7988_v49  ;;  %v7991_v16 = vpop.f32.mrf.mxu1  ;;  %5987 = vmatmul.mubr.msk.bf16.gmra.mxu1 %vm658_vm4, %v8988_v39  ;;  %v3820_v40 = vrot.slane %v3819_v22, 4  ;;  %v3829_v55 = vrot.slane %v3827_v28, 4  ;;  %v3832_v36 = vrot.slane %v3830_v4, 5  ;;  %v3791_v9 = vsel %vm6270_vm5, %v3786_v29, %v7945_v31  ;;  %v5452_v22 = vld [vmem:[%s6218_s23 + $0x9c] sm:$0xf] }
 0x11d   : > { %v7999_v49 = vpop.f32.mrf.mxu0  ;;  %6026 = vmatprep.mubr.msk.bf16.mxu1 %vm658_vm4, %v7683_v30  ;;  %v3777_v30 = vsel %vm6270_vm5, %v3772_v7, %v3776_v37  ;;  %v3801_v37 = vsel %vm6270_vm5, %v3796_v56, %v3800_v8  ;;  %v8040_v2 = vrot.slane %v3836_v18, 5  ;;  %v3842_v7 = vrot.slane %v3840_v58, 4  ;;  %v8083_v58 = vld [vmem:[%s6218_s23 + $0xa0] sm:$0xf] }
 0x11e   : > { %v8018_v43 = vpop.f32.mrf.mxu1  ;;  %v8989_v24 = vcombine.low %v7653_v25, %v7657_v1  ;;  %v5538_v44 = vcombine.low %v7876_v52, %v7893_v47  ;;  %v5539_v6 = vcombine.low %v7928_v0, %v7961_v14  ;;  %v5525_v31 = vrot.slane %v5509_v19, 9 }
 0x11f   : > { %v8031_v10 = vpop.f32.mrf.mxu0  ;;  %v4393_v8 = vrot.slane %v7914_v33, 5  ;;  %v8990_v25 = vcombine.low %v7736_v23, %v7740_v21  ;;  %v8991_v1 = vsel %vm6270_vm5, %v7895_v42, %v7854_v12  ;;  %v8068_v39 = vcombine.low %v3767_v34, %v3777_v30  ;;  %v5510_v42 = vld [vmem:[%s6218_s23 + $0x90] sm:$0xe]  ;;  %v8998_v33 = vld [vmem:[#allocation11_spill] sm:$0xff] }
 0x120   : > { %v8033_v60 = vpop.f32.mrf.mxu1  ;;  %v8066_v4 = vcombine.low %v8991_v1, %v3753_v27  ;;  %v8074_v18 = vcombine.low %v3791_v9, %v3801_v37  ;;  %v3815_v23 = vsel %vm6270_vm5, %v3810_v17, %v7969_v41  ;;  %v3825_v21 = vsel %vm6270_vm5, %v3820_v40, %v3824_v62 }
 0x121   : > { %v5858_v46 = vpop.f32.mrf.mxu0  ;;  %6061 = vmatmul.mubr.msk.bf16.vlgmr.msra.gmra.mxu0 %vm658_vm4, %v8989_v24  ;;  %v3833_v12 = vor.u32 %v3832_v36, %v3829_v55  ;;  %v3843_v34 = vor.u32 %v3842_v7, %v8040_v2  ;;  %v3846_v30 = vshll.u32 %v8052_v45, 16  ;;  %v3851_v19 = vshrl.u32 %v5452_v22, 16 }
 0x122   : > { %v8055_v28 = vpop.f32.mrf.mxu1  ;;  %6064 = vmatprep.mubr.msk.bf16.mxu0 %vm658_vm4, %v8990_v25  ;;  %v3854_v9 = vshll.u32 %v5452_v22, 16  ;;  %v8094_v62 = vsel %vm6536_vm8, %v5525_v31, %v4393_v8  ;;  %v4395_v17 = vrot.slane %v4393_v8, 4  ;;  %v4396_v40 = vrot.slane %v7966_v3, 5 }
 0x123   : > { %v1465_v56 = vpop.f32.mrf.mxu0  ;;  %v5526_v55 = vrot.slane %v5510_v42, 9  ;;  %v4400_v36 = vrot.slane %v7980_v61, 5  ;;  %v3860_v7 = vshll.u32 %v8083_v58, 16  ;;  %v3864_v24 = vshrl.u32 %v8083_v58, 16 }
 0x124   : > { %v5824_v27 = vpop.f32.mrf.mxu1  ;;  %6027 = vmatmul.mubr.msk.bf16.vlgmr.msra.gmra.mxu1 %vm658_vm4, %v7685_v59  ;;  %v8103_v25 = vcombine.low %v3815_v23, %v3825_v21  ;;  %v8105_v31 = vrot.slane %v3833_v12, 4  ;;  %v3844_v3 = vrot.slane %v3843_v34, 4  ;;  %v3848_v1 = vrot.slane %v3846_v30, 5  ;;  %v5455_v21 = vld [vmem:[%s6218_s23 + $0xa8] sm:$0xf] }
 0x125   : > { %v1049_v37 = vadd.f32 %v5824_v27, %v7581_v5  ;;  %v5859_v41 = vpop.f32.mrf.mxu0  ;;  %6030 = vmatprep.mubr.msk.bf16.mxu1 %vm658_vm4, %v7832_v50  ;;  %v3853_v42 = vrot.slane %v3851_v19, 4  ;;  %v3856_v61 = vrot.slane %v3854_v9, 5  ;;  %v4403_v23 = vrot.slane %v8052_v45, 5  ;;  %v8131_v30 = vld [vmem:[%s6218_s23 + $0xac] sm:$0xf] }
 0x126   : > { %v1040_v59 = vpop.f32.mrf.mxu1  ;;  %v3866_v34 = vrot.slane %v3864_v24, 4  ;;  %v8995_v24 = vld [vmem:[#allocation3_spill] sm:$0xff] }
 0x127   : > { %v8100_v5 = vadd.f32 %v5858_v46, %v1049_v37  ;;  %v1041_v50 = vadd.f32 %v1040_v59, %v7605_v15  ;;  %v1468_v22 = vpop.f32.mrf.mxu0  ;;  %v8992_v37 = vcombine.low %v7773_v13, %v7799_v32  ;;  %v8116_v15 = vsel %vm6536_vm8, %v4395_v17, %v4396_v40  ;;  %v5511_v17 = vld [vmem:[%s6218_s23 + $0x9c] sm:$0xe] }
 0x128   : > { %v5825_v8 = vpop.f32.mrf.mxu1  ;;  %v4402_v13 = vrot.slane %v4400_v36, 4  ;;  %v8128_v32 = vrot.slane %v3860_v7, 5  ;;  %v4407_v40 = vrot.slane %v8083_v58, 5  ;;  %v3884_v58 = vshll.u32 %v8131_v30, 16 }
 0x129   : > { %v8107_v27 = vadd.f32 %v1465_v56, %v1041_v50  ;;  %v1052_v29 = vadd.f32 %v5825_v8, %v7624_v26  ;;  %v5862_v46 = vpop.f32.mrf.mxu0  ;;  %6065 = vmatmul.mubr.msk.bf16.gmra.mxu0 %vm658_vm4, %v8992_v37  ;;  %v8993_v56 = vcombine.low %v7838_v54, %v7842_v35  ;;  %v8126_v26 = vsel %vm6536_vm8, %v5526_v55, %v4400_v36  ;;  %v5454_v35 = vld [vmem:[%s6218_s23 + $0xa4] sm:$0x1]  ;;  %v8994_v55 = vld [vmem:[#allocation15_spill] sm:$0xff] }
 0x12a   : > { %v1043_v12 = vpop.f32.mrf.mxu1  ;;  %v3839_v54 = vsel %vm6270_vm5, %v8105_v31, %v8040_v2  ;;  %v3875_v36 = vshrl.u32 %v5455_v21, 16  ;;  %v8996_v2 = vld [vmem:[#allocation16_spill] sm:$0xff]  ;;  %v3888_v31 = vshrl.u32 %v8131_v30, 16 }
 0x12b   : > { %6068 = vmatprep.mubr.msk.bf16.mxu0 %vm658_vm4, %v8993_v56  ;;  %v8133_v19 = vadd.f32 %v5859_v41, %v1052_v29  ;;  %v1044_v45 = vadd.f32 %v1043_v12, %v7669_v51  ;;  %v1481_v9 = vpop.f32.mrf.mxu0  ;;  %v3849_v29 = vsel %vm6270_vm5, %v3844_v3, %v3848_v1  ;;  %v3857_v41 = vor.u32 %v3856_v61, %v3853_v42  ;;  %v8997_v61 = vld [vmem:[#allocation10_spill] sm:$0xff] }
 0x12c   : > { %v5828_v59 = vpop.f32.mrf.mxu1  ;;  %6031 = vmatmul.mubr.msk.bf16.gmra.mxu1 %vm658_vm4, %v8994_v55  ;;  %v3878_v51 = vshll.u32 %v5455_v21, 16  ;;  %v8156_v12 = vsel %vm6536_vm8, %v4402_v13, %v4403_v23  ;;  %v3867_v3 = vor.u32 %v3866_v34, %v8128_v32  ;;  %v3870_v1 = vshll.u32 %v5454_v35, 16 }
 0x12d   : > { %v8147_v7 = vadd.f32 %v1468_v22, %v1044_v45  ;;  %v1065_v50 = vadd.f32 %v5828_v59, %v8995_v24  ;;  %v5863_v8 = vpop.f32.mrf.mxu0  ;;  %6034 = vmatprep.mubr.msk.bf16.mxu1 %vm658_vm4, %v8996_v2  ;;  %v5527_v22 = vrot.slane %v5511_v17, 9  ;;  %v4409_v45 = vrot.slane %v4407_v40, 4 }
 0x12e   : > { %v1056_v37 = vpop.f32.mrf.mxu1  ;;  %v4410_v59 = vrot.slane %v5454_v35, 5  ;;  %v8164_v2 = vrot.slane %v3857_v41, 4  ;;  %v3877_v23 = vrot.slane %v3875_v36, 4  ;;  %v3880_v13 = vrot.slane %v3878_v51, 5  ;;  %v8174_v35 = vld [vmem:[%s6218_s23 + $0xb0] sm:$0x1] }
 0x12f   : > { %v8159_v42 = vadd.f32 %v5862_v46, %v1065_v50  ;;  %v1057_v21 = vadd.f32 %v1056_v37, %v8997_v61  ;;  %v1484_v56 = vpop.f32.mrf.mxu0  ;;  %v8176_v50 = vrot.slane %v3884_v58, 5  ;;  %v3890_v41 = vrot.slane %v3888_v31, 4  ;;  %v8999_v51 = vld [vmem:[#allocation2_spill] sm:$0xff] }
 0x130   : > { %v5829_v55 = vpop.f32.mrf.mxu1  ;;  %v8186_v52 = vrot.slane %v3867_v3, 4  ;;  %v8188_v47 = vrot.slane %v3870_v1, 5  ;;  %v8196_v0 = vsel %vm6536_vm8, %v5527_v22, %v4407_v40  ;;  %v8200_v14 = vsel %vm6536_vm8, %v4409_v45, %v4410_v59  ;;  %v8212_v22 = vld [vmem:[%s6218_s23 + $0xb8] sm:$0xf] }
 0x131   : > { %v8166_v34 = vadd.f32 %v1481_v9, %v1057_v21  ;;  %v1068_v17 = vadd.f32 %v5829_v55, %v8998_v33  ;;  %v5866_v46 = vpop.f32.mrf.mxu0  ;;  %6069 = vmatmul.mubr.msk.bf16.gmra.mxu0 %vm658_vm4, %v5538_v44  ;;  %v8182_v9 = vcombine.low %v3839_v54, %v3849_v29  ;;  %v5512_v44 = vld [vmem:[%s6218_s23 + $0xa8] sm:$0xe]  ;;  %v3881_v3 = vor.u32 %v3880_v13, %v3877_v23  ;;  %v9001_v21 = vld [vmem:[#allocation14_spill] sm:$0xff] }
 0x132   : > { %v1059_v37 = vpop.f32.mrf.mxu1  ;;  %6072 = vmatprep.mubr.msk.bf16.mxu0 %vm658_vm4, %v5539_v6  ;;  %v5458_v6 = vld [vmem:[%s6218_s23 + $0xb4] sm:$0xf]  ;;  %v9000_v29 = vld [vmem:[#allocation19_spill] sm:$0xff]  ;;  %v3894_v1 = vshll.u32 %v8174_v35, 16  ;;  %v4414_v40 = vrot.slane %v8131_v30, 5  ;;  %v3891_v55 = vor.u32 %v3890_v41, %v8176_v50  ;;  %v3873_v30 = vsel %vm6270_vm5, %v8186_v52, %v8188_v47 }
 0x133   : > { %v8191_v36 = vadd.f32 %v5863_v8, %v1068_v17  ;;  %v1060_v58 = vadd.f32 %v1059_v37, %v8999_v51  ;;  %v1497_v31 = vpop.f32.mrf.mxu0  ;;  %v5528_v17 = vrot.slane %v5512_v44, 9  ;;  %v3899_v23 = vshrl.u32 %v5458_v6, 16 }
 0x134   : > { %v5832_v54 = vpop.f32.mrf.mxu1  ;;  %6035 = vmatmul.mubr.msk.bf16.gmra.mxu1 %vm658_vm4, %v9000_v29  ;;  %v3902_v13 = vshll.u32 %v5458_v6, 16  ;;  %v3908_v41 = vshll.u32 %v8212_v22, 16  ;;  %v3912_v44 = vshrl.u32 %v8212_v22, 16  ;;  %v5461_v29 = vld [vmem:[%s6218_s23 + $0xc0] sm:$0xf]  ;;  %v3882_v33 = vrot.slane %v3881_v3, 4 }
 0x135   : > { %v8214_v61 = vadd.f32 %v1484_v56, %v1060_v58  ;;  %v1081_v45 = vadd.f32 %v5832_v54, %v9001_v21  ;;  %v5867_v59 = vpop.f32.mrf.mxu0  ;;  %6038 = vmatprep.mubr.msk.bf16.mxu1 %vm658_vm4, %v8066_v4  ;;  %v9003_v58 = vld [vmem:[#allocation18_spill] sm:$0xff]  ;;  %v3896_v52 = vrot.slane %v3894_v1, 5  ;;  %v4416_v47 = vrot.slane %v4414_v40, 4 }
 0x136   : > { %v1072_v37 = vpop.f32.mrf.mxu1  ;;  %v4417_v56 = vrot.slane %v8174_v35, 5  ;;  %v8242_v8 = vsel %vm6536_vm8, %v5528_v17, %v4414_v40  ;;  %v8245_v3 = vld [vmem:[%s6218_s23 + $0xc4] sm:$0xf]  ;;  %v9007_v35 = vcombine.low %v8024_v20, %v8028_v48  ;;  %v8257_v17 = vrot.slane %v3908_v41, 5 }
 0x137   : > { %v8226_v51 = vadd.f32 %v5866_v46, %v1081_v45  ;;  %v1073_v54 = vadd.f32 %v1072_v37, %v9003_v58  ;;  %v1500_v4 = vpop.f32.mrf.mxu0  ;;  %v9005_v46 = vld [vmem:[#allocation21_spill] sm:$0xff]  ;;  %v9006_v37 = vcombine.low %v8012_v57, %v8016_v53  ;;  %v3892_v58 = vrot.slane %v3891_v55, 4  ;;  %v9008_v55 = vld [vmem:[#allocation23_spill] sm:$0xff] }
 0x138   : > { %v5833_v21 = vpop.f32.mrf.mxu1  ;;  %v3923_v57 = vshrl.u32 %v5461_v29, 16  ;;  %v3926_v53 = vshll.u32 %v5461_v29, 16  ;;  %v3887_v20 = vsel %vm6270_vm5, %v3882_v33, %v8176_v50  ;;  %v8266_v48 = vsel %vm6536_vm8, %v4416_v47, %v4417_v56  ;;  %v5513_v29 = vld [vmem:[%s6218_s23 + $0xb4] sm:$0xe] }
 0x139   : > { %9002 = vst [vmem:[#allocation15_spill] sm:$0xff] %v8226_v51  ;;  %v8233_v24 = vadd.f32 %v1497_v31, %v1073_v54  ;;  %v1084_v6 = vadd.f32 %v5833_v21, %v9005_v46  ;;  %v5870_v45 = vpop.f32.mrf.mxu0  ;;  %6073 = vmatmul.mubr.msk.bf16.gmra.mxu0 %vm658_vm4, %v9006_v37  ;;  %v8252_v31 = vld [vmem:[%s6218_s23 + $0xbc] sm:$0x1]  ;;  %v3901_v54 = vrot.slane %v3899_v23, 4  ;;  %v3904_v21 = vrot.slane %v3902_v13, 5 }
 0x13a   : > { %v1075_v1 = vpop.f32.mrf.mxu1  ;;  %6076 = vmatprep.mubr.msk.bf16.mxu0 %vm658_vm4, %v9007_v35  ;;  %v3936_v23 = vshrl.u32 %v8245_v3, 16  ;;  %v3918_v50 = vshll.u32 %v8252_v31, 16  ;;  %v4421_v47 = vrot.slane %v8212_v22, 5  ;;  %v9009_v35 = vld [vmem:[#allocation25_spill] sm:$0xff] }
 0x13b   : > { %9004 = vst [vmem:[#allocation3_spill] sm:$0xff] %v8233_v24  ;;  %v8254_v46 = vadd.f32 %v5867_v59, %v1084_v6  ;;  %v1076_v37 = vadd.f32 %v1075_v1, %v9008_v55  ;;  %v1513_v40 = vpop.f32.mrf.mxu0  ;;  %v3914_v24 = vrot.slane %v3912_v44, 4  ;;  %v3932_v59 = vshll.u32 %v8245_v3, 16 }
 0x13c   : > { %v5836_v51 = vpop.f32.mrf.mxu1  ;;  %6039 = vmatmul.mubr.msk.bf16.gmra.mxu1 %vm658_vm4, %v8068_v39  ;;  %v3897_v39 = vsel %vm6270_vm5, %v3892_v58, %v3896_v52  ;;  %v3905_v56 = vor.u32 %v3904_v21, %v3901_v54  ;;  %v3925_v6 = vrot.slane %v3923_v57, 4  ;;  %v3928_v1 = vrot.slane %v3926_v53, 5 }
 0x13d   : > { %v8270_v13 = vadd.f32 %v1500_v4, %v1076_v37  ;;  %v1097_v41 = vadd.f32 %v5836_v51, %v7976_v11  ;;  %v5871_v44 = vpop.f32.mrf.mxu0  ;;  %6042 = vmatprep.mubr.msk.bf16.mxu1 %vm658_vm4, %v8074_v18  ;;  %v9010_v18 = vsel %vm6270_vm5, %v8164_v2, %v8128_v32  ;;  %v3915_v58 = vor.u32 %v3914_v24, %v8257_v17 }
 0x13e   : > { %v1088_v33 = vpop.f32.mrf.mxu1  ;;  %v8288_v52 = vcombine.low %v9010_v18, %v3873_v30  ;;  %v8291_v22 = vcombine.low %v3887_v20, %v3897_v39  ;;  %v8295_v21 = vrot.slane %v3932_v59, 5  ;;  %v3938_v57 = vrot.slane %v3936_v23, 4  ;;  %v5463_v30 = vld [vmem:[%s6218_s23 + $0xc8] sm:$0x1] }
 0x13f   : > { %v8280_v4 = vadd.f32 %v5870_v45, %v1097_v41  ;;  %v1089_v11 = vadd.f32 %v1088_v33, %v9009_v35  ;;  %v1516_v51 = vpop.f32.mrf.mxu0  ;;  %v5545_v45 = vcombine.low %v8242_v8, %v8266_v48  ;;  %v9011_v32 = vcombine.low %v8094_v62, %v8116_v15  ;;  %v5464_v8 = vld [vmem:[%s6218_s23 + $0xcc] sm:$0xf]  ;;  %v8316_v15 = vld [vmem:[%s6218_s23 + $0xd0] sm:$0xf]  ;;  %v5514_v33 = vld [vmem:[%s6218_s23 + $0xc0] sm:$0xe] }
 0x140   : > { %v5837_v54 = vpop.f32.mrf.mxu1  ;;  %v8304_v24 = vrot.slane %v3918_v50, 5  ;;  %v5529_v2 = vrot.slane %v5513_v29, 9  ;;  %v9012_v48 = vcombine.low %v8126_v26, %v8156_v12  ;;  %v4424_v59 = vrot.slane %v8252_v31, 5 }
 0x141   : > { %v8297_v53 = vadd.f32 %v1513_v40, %v1089_v11  ;;  %v1100_v55 = vadd.f32 %v5837_v54, %v7999_v49  ;;  %v5874_v37 = vpop.f32.mrf.mxu0  ;;  %6077 = vmatmul.mubr.msk.bf16.gmra.mxu0 %vm658_vm4, %v9011_v32  ;;  %v8312_v40 = vrot.slane %v3905_v56, 4  ;;  %v4423_v49 = vrot.slane %v4421_v47, 4 }
 0x142   : > { %v1091_v20 = vpop.f32.mrf.mxu1  ;;  %6080 = vmatprep.mubr.msk.bf16.mxu0 %vm658_vm4, %v9012_v48  ;;  %v3929_v62 = vor.u32 %v3928_v1, %v3925_v6  ;;  %v8321_v50 = vrot.slane %v3915_v58, 4  ;;  %v4428_v26 = vrot.slane %v8245_v3, 5  ;;  %v3939_v56 = vor.u32 %v3938_v57, %v8295_v21 }
 0x143   : > { %v8318_v23 = vadd.f32 %v5871_v44, %v1100_v55  ;;  %v1092_v41 = vadd.f32 %v1091_v20, %v8031_v10  ;;  %v1529_v39 = vpop.f32.mrf.mxu0  ;;  %v3942_v31 = vshll.u32 %v5463_v30, 16  ;;  %v3947_v29 = vshrl.u32 %v5464_v8, 16  ;;  %v9015_v44 = vld [vmem:[#allocation5_spill] sm:$0xff]  ;;  %v9016_v55 = vld [vmem:[#allocation6_spill] sm:$0xff] }
 0x144   : > { %v5840_v12 = vpop.f32.mrf.mxu1  ;;  %6043 = vmatmul.mubr.msk.bf16.gmra.mxu1 %vm658_vm4, %v8103_v25  ;;  %v3950_v6 = vshll.u32 %v5464_v8, 16  ;;  %v3956_v11 = vshll.u32 %v8316_v15, 16  ;;  %v3960_v3 = vshrl.u32 %v8316_v15, 16  ;;  %v4422_v25 = vsel %vm6536_vm8, %v5529_v2, %v4421_v47  ;;  %v9017_v47 = vld [vmem:[#allocation7_spill] sm:$0xff] }
 0x145   : > { %9013 = vst [vmem:[#allocation16_spill] sm:$0xff] %v8318_v23  ;;  %v8328_v1 = vadd.f32 %v1516_v51, %v1092_v41  ;;  %v1113_v35 = vadd.f32 %v5840_v12, %v9015_v44  ;;  %v5875_v10 = vpop.f32.mrf.mxu0  ;;  %6046 = vmatprep.mubr.msk.bf16.mxu1 %vm658_vm4, %v8182_v9  ;;  %v4425_v58 = vsel %vm6536_vm8, %v4423_v49, %v4424_v59  ;;  %v3930_v54 = vrot.slane %v3929_v62, 4 }
 0x146   : > { %v1104_v18 = vpop.f32.mrf.mxu1  ;;  %v5530_v51 = vrot.slane %v5514_v33, 9  ;;  %v4430_v20 = vrot.slane %v4428_v26, 4  ;;  %v4431_v9 = vrot.slane %v5463_v30, 5  ;;  %v3940_v41 = vrot.slane %v3939_v56, 4  ;;  %v5466_v56 = vld [vmem:[%s6218_s23 + $0xd4] sm:$0x1] }
 0x147   : > { %9014 = vst [vmem:[#allocation10_spill] sm:$0xff] %v8328_v1  ;;  %v8339_v57 = vadd.f32 %v5874_v37, %v1113_v35  ;;  %v1105_v32 = vadd.f32 %v1104_v18, %v9016_v55  ;;  %v1532_v8 = vpop.f32.mrf.mxu0  ;;  %v3944_v12 = vrot.slane %v3942_v31, 5  ;;  %v3949_v44 = vrot.slane %v3947_v29, 4  ;;  %v9019_v31 = vld [vmem:[#allocation8_spill] sm:$0xff] }
 0x148   : > { %v5841_v48 = vpop.f32.mrf.mxu1  ;;  %v3952_v1 = vrot.slane %v3950_v6, 5  ;;  %v9018_v37 = vcombine.low %v8196_v0, %v8200_v14  ;;  %v8349_v59 = vrot.slane %v3956_v11, 5  ;;  %v3962_v30 = vrot.slane %v3960_v3, 4 }
 0x149   : > { %v8342_v23 = vadd.f32 %v1529_v39, %v1105_v32  ;;  %v1116_v2 = vadd.f32 %v5841_v48, %v9017_v47  ;;  %v5878_v49 = vpop.f32.mrf.mxu0  ;;  %v3911_v39 = vsel %vm6270_vm5, %v8312_v40, %v8257_v17  ;;  %v3921_v33 = vsel %vm6270_vm5, %v8321_v50, %v8304_v24  ;;  %v5515_v17 = vld [vmem:[%s6218_s23 + $0xcc] sm:$0xe] }
 0x14a   : > { %6081 = vmatmul.mubr.msk.bf16.gmra.mxu0 %vm658_vm4, %v9018_v37  ;;  %v1107_v62 = vpop.f32.mrf.mxu1  ;;  %v4435_v0 = vrot.slane %v8316_v15, 5  ;;  %v4432_v35 = vsel %vm6536_vm8, %v4430_v20, %v4431_v9  ;;  %v5546_v24 = vcombine.low %v4422_v25, %v4425_v58  ;;  %v3935_v15 = vsel %vm6270_vm5, %v3930_v54, %v8295_v21  ;;  %v9021_v20 = vld [vmem:[#allocation12_spill] sm:$0xff] }
 0x14b   : > { %6084 = vmatprep.mubr.msk.bf16.mxu0 %vm658_vm4, %v5545_v45  ;;  %v8362_v14 = vadd.f32 %v5875_v10, %v1116_v2  ;;  %v1108_v29 = vadd.f32 %v1107_v62, %v9019_v31  ;;  %v1545_v6 = vpop.f32.mrf.mxu0  ;;  %v4429_v45 = vsel %vm6536_vm8, %v5530_v51, %v4428_v26  ;;  %v3945_v50 = vsel %vm6270_vm5, %v3940_v41, %v3944_v12  ;;  %v9020_v26 = vld [vmem:[#allocation9_spill] sm:$0xff] }
 0x14c   : > { %v5844_v40 = vpop.f32.mrf.mxu1  ;;  %6047 = vmatmul.mubr.msk.bf16.gmra.mxu1 %vm658_vm4, %v8288_v52  ;;  %v3953_v10 = vor.u32 %v3952_v1, %v3949_v44  ;;  %v3963_v51 = vor.u32 %v3962_v30, %v8349_v59  ;;  %v3966_v52 = vshll.u32 %v5466_v56, 16  ;;  %v5547_v58 = vcombine.low %v4429_v45, %v4432_v35 }
 0x14d   : > { %v8377_v11 = vadd.f32 %v1532_v8, %v1108_v29  ;;  %v1129_v3 = vadd.f32 %v5844_v40, %v9020_v26  ;;  %v5879_v18 = vpop.f32.mrf.mxu0  ;;  %6050 = vmatprep.mubr.msk.bf16.mxu1 %vm658_vm4, %v8291_v22  ;;  %v5531_v55 = vrot.slane %v5515_v17, 9  ;;  %v4437_v32 = vrot.slane %v4435_v0, 4  ;;  %v9022_v22 = vld [vmem:[#allocation4_spill] sm:$0xff]  ;;  %v9024_v17 = vld [vmem:[#allocation17_spill] sm:$0xff] }
 0x14e   : > { %v1120_v25 = vpop.f32.mrf.mxu1  ;;  %v4438_v21 = vrot.slane %v5466_v56, 5  ;;  %v5481_v48 = vcombine.low %v3911_v39, %v3921_v33  ;;  %v5482_v41 = vcombine.low %v3935_v15, %v3945_v50  ;;  %v3954_v12 = vrot.slane %v3953_v10, 4  ;;  %v9023_v56 = vld [vmem:[#allocation13_spill] sm:$0xff]  ;;  %v9025_v10 = vld [vmem:[#allocation20_spill] sm:$0xff] }
 0x14f   : > { %v8383_v54 = vadd.f32 %v5878_v49, %v1129_v3  ;;  %v1121_v1 = vadd.f32 %v1120_v25, %v9021_v20  ;;  %v1548_v8 = vpop.f32.mrf.mxu0  ;;  %v3964_v37 = vrot.slane %v3963_v51, 4  ;;  %v3968_v30 = vrot.slane %v3966_v52, 5  ;;  %v9026_v52 = vld [vmem:[#allocation22_spill] sm:$0xff] }
 0x150   : > { %v5845_v9 = vpop.f32.mrf.mxu1  ;;  %v4436_v49 = vsel %vm6536_vm8, %v5531_v55, %v4435_v0  ;;  %v4439_v39 = vsel %vm6536_vm8, %v4437_v32, %v4438_v21  ;;  %v3959_v45 = vsel %vm6270_vm5, %v3954_v12, %v8349_v59 }
 0x151   : > { %v8386_v44 = vadd.f32 %v1545_v6, %v1121_v1  ;;  %v1132_v47 = vadd.f32 %v5845_v9, %v9022_v22  ;;  %v5882_v2 = vpop.f32.mrf.mxu0  ;;  %v3969_v63 = vsel %vm6270_vm5, %v3964_v37, %v3968_v30 }
 0x152   : > { %6085 = vmatmul.mubr.msk.bf16.gmra.mxu0 %vm658_vm4, %v5546_v24  ;;  %v1123_v62 = vpop.f32.mrf.mxu1  ;;  %v5548_v24 = vcombine.low %v4436_v49, %v4439_v39  ;;  %v5483_v51 = vcombine.low %v3959_v45, %v3969_v63 }
 0x153   : > { %6088 = vmatprep.mubr.msk.bf16.mxu0 %vm658_vm4, %v5547_v58  ;;  %v8395_v33 = vadd.f32 %v5879_v18, %v1132_v47  ;;  %v1124_v31 = vadd.f32 %v1123_v62, %v9023_v56  ;;  %v1561_v29 = vpop.f32.mrf.mxu0 }
 0x154   : > { %v5848_v6 = vpop.f32.mrf.mxu1  ;;  %6051 = vmatmul.mubr.msk.bf16.gmra.mxu1 %vm658_vm4, %v5481_v48 }
 0x155   : > { %v8402_v35 = vadd.f32 %v1548_v8, %v1124_v31  ;;  %v1145_v40 = vadd.f32 %v5848_v6, %v9024_v17  ;;  %v5883_v0 = vpop.f32.mrf.mxu0  ;;  %6054 = vmatprep.mubr.msk.bf16.mxu1 %vm658_vm4, %v5482_v41 }
 0x156   : > { %v1136_v15 = vpop.f32.mrf.mxu1 }
 0x157   : > { %v8408_v50 = vadd.f32 %v5882_v2, %v1145_v40  ;;  %v1137_v26 = vadd.f32 %v1136_v15, %v9025_v10  ;;  %v1564_v3 = vpop.f32.mrf.mxu0 }
 0x158   : > { %v5849_v18 = vpop.f32.mrf.mxu1 }
 0x159   : > { %v8411_v59 = vadd.f32 %v1561_v29, %v1137_v26  ;;  %v1148_v25 = vadd.f32 %v5849_v18, %v9026_v52  ;;  %v5886_v58 = vpop.f32.mrf.mxu0 }
 0x15a   : > { %6089 = vmatmul.mubr.msk.bf16.gmra.mxu0 %vm658_vm4, %v5548_v24  ;;  %v1139_v55 = vpop.f32.mrf.mxu1 }
 0x15b   : > { %v8415_v32 = vadd.f32 %v5883_v0, %v1148_v25  ;;  %v1140_v21 = vadd.f32 %v1139_v55, %v9027_v38  ;;  %v1577_v20 = vpop.f32.mrf.mxu0 }
 0x15c   : > { %v5852_v1 = vpop.f32.mrf.mxu1  ;;  %6055 = vmatmul.mubr.msk.bf16.gmra.mxu1 %vm658_vm4, %v5483_v51 }
 0x15d   : > { %v8419_v8 = vadd.f32 %v1564_v3, %v1140_v21  ;;  %v1161_v9 = vadd.f32 %v5852_v1, %v7991_v16  ;;  %v5887_v48 = vpop.f32.mrf.mxu0 }
 0x15e   : > { %v1152_v41 = vpop.f32.mrf.mxu1 }
 0x15f   : > { %v8422_v12 = vadd.f32 %v5886_v58, %v1161_v9  ;;  %v1153_v22 = vadd.f32 %v1152_v41, %v8018_v43  ;;  %v1580_v47 = vpop.f32.mrf.mxu0 }
 0x160   : > { %v5853_v2 = vpop.f32.mrf.mxu1 }
 0x161   : > { %v8425_v37 = vadd.f32 %v1577_v20, %v1153_v22  ;;  %v1164_v30 = vadd.f32 %v5853_v2, %v8033_v60  ;;  %v5926_v62 = vpop.f32.mrf.mxu0  ;;  %v9028_v22 = vld [vmem:[#allocation15_spill] sm:$0xff] }
 0x162   : > { %v1155_v49 = vpop.f32.mrf.mxu1 }
 0x163   : > { %v8428_v39 = vadd.f32 %v5887_v48, %v1164_v30  ;;  %v1156_v56 = vadd.f32 %v1155_v49, %v8055_v28  ;;  %v2550_v31 = vpop.f32.mrf.mxu0 }
 0x164   : > { %v5892_v16 = vpop.f32.mrf.mxu1 }
 0x165   : > { %v8431_v29 = vadd.f32 %v1580_v47, %v1156_v56  ;;  %v1953_v6 = vadd.f32 %v5892_v16, %v8100_v5  ;;  %v5927_v45 = vpop.f32.mrf.mxu0 }
 0x166   : > { %v1824_v43 = vpop.f32.mrf.mxu1 }
 0x167   : > { %v8434_v17 = vadd.f32 %v5926_v62, %v1953_v6  ;;  %v1951_v40 = vadd.f32 %v1824_v43, %v8107_v27  ;;  %v2553_v0 = vpop.f32.mrf.mxu0  ;;  %v9029_v62 = vld [vmem:[#allocation3_spill] sm:$0xff] }
 0x168   : > { %v5893_v60 = vpop.f32.mrf.mxu1 }
 0x169   : > { %v8437_v63 = vadd.f32 %v2550_v31, %v1951_v40  ;;  %v1954_v24 = vadd.f32 %v5893_v60, %v8133_v19  ;;  %v5930_v15 = vpop.f32.mrf.mxu0 }
 0x16a   : > { %v1827_v28 = vpop.f32.mrf.mxu1 }
 0x16b   : > { %v8440_v10 = vadd.f32 %v5927_v45, %v1954_v24  ;;  %v1952_v26 = vadd.f32 %v1827_v28, %v8147_v7  ;;  %v2566_v3 = vpop.f32.mrf.mxu0 }
 0x16c   : > { %v5896_v5 = vpop.f32.mrf.mxu1 }
 0x16d   : > { %v8443_v18 = vadd.f32 %v2553_v0, %v1952_v26  ;;  %v1957_v51 = vadd.f32 %v5896_v5, %v8159_v42  ;;  %v5931_v52 = vpop.f32.mrf.mxu0 }
 0x16e   : > { %v1840_v27 = vpop.f32.mrf.mxu1 }
 0x16f   : > { %v8446_v25 = vadd.f32 %v5930_v15, %v1957_v51  ;;  %v1955_v58 = vadd.f32 %v1840_v27, %v8166_v34  ;;  %v2569_v55 = vpop.f32.mrf.mxu0 }
 0x170   : > { %v5897_v19 = vpop.f32.mrf.mxu1 }
 0x171   : > { %v8449_v38 = vadd.f32 %v2566_v3, %v1955_v58  ;;  %v1958_v21 = vadd.f32 %v5897_v19, %v8191_v36  ;;  %v5934_v20 = vpop.f32.mrf.mxu0  ;;  %v9031_v19 = vld [vmem:[#allocation10_spill] sm:$0xff] }
 0x172   : > { %v1843_v7 = vpop.f32.mrf.mxu1 }
 0x173   : > { %v8452_v1 = vadd.f32 %v5931_v52, %v1958_v21  ;;  %v1956_v9 = vadd.f32 %v1843_v7, %v8214_v61  ;;  %v2582_v48 = vpop.f32.mrf.mxu0  ;;  %v9030_v52 = vld [vmem:[#allocation16_spill] sm:$0xff] }
 0x174   : > { %v5900_v42 = vpop.f32.mrf.mxu1 }
 0x175   : > { %v8455_v41 = vadd.f32 %v2569_v55, %v1956_v9  ;;  %v1961_v47 = vadd.f32 %v5900_v42, %v9028_v22  ;;  %v5935_v2 = vpop.f32.mrf.mxu0 }
 0x176   : > { %v1856_v34 = vpop.f32.mrf.mxu1 }
 0x177   : > { %v8458_v30 = vadd.f32 %v5934_v20, %v1961_v47  ;;  %v1959_v49 = vadd.f32 %v1856_v34, %v9029_v62  ;;  %v2585_v56 = vpop.f32.mrf.mxu0 }
 0x178   : > { %v5901_v36 = vpop.f32.mrf.mxu1 }
 0x179   : > { %v8461_v31 = vadd.f32 %v2582_v48, %v1959_v49  ;;  %v1962_v16 = vadd.f32 %v5901_v36, %v8254_v46  ;;  %v5938_v6 = vpop.f32.mrf.mxu0 }
 0x17a   : > { %v1859_v61 = vpop.f32.mrf.mxu1 }
 0x17b   : > { %v8464_v45 = vadd.f32 %v5935_v2, %v1962_v16  ;;  %v1960_v43 = vadd.f32 %v1859_v61, %v8270_v13  ;;  %v2598_v40 = vpop.f32.mrf.mxu0 }
 0x17c   : > { %v5904_v0 = vpop.f32.mrf.mxu1 }
 0x17d   : > { %v8467_v60 = vadd.f32 %v2585_v56, %v1960_v43  ;;  %v1965_v24 = vadd.f32 %v5904_v0, %v8280_v4  ;;  %v5939_v15 = vpop.f32.mrf.mxu0 }
 0x17e   : > { %v1872_v28 = vpop.f32.mrf.mxu1 }
 0x17f   : > { %v8470_v26 = vadd.f32 %v5938_v6, %v1965_v24  ;;  %v1963_v3 = vadd.f32 %v1872_v28, %v8297_v53  ;;  %v2601_v5 = vpop.f32.mrf.mxu0 }
 0x180   : > { %v5905_v46 = vpop.f32.mrf.mxu1 }
 0x181   : > { %v8473_v51 = vadd.f32 %v2598_v40, %v1963_v3  ;;  %v1966_v27 = vadd.f32 %v5905_v46, %v9030_v52  ;;  %v5942_v58 = vpop.f32.mrf.mxu0 }
 0x182   : > { %v1875_v13 = vpop.f32.mrf.mxu1 }
 0x183   : > { %v8476_v55 = vadd.f32 %v5939_v15, %v1966_v27  ;;  %v1964_v21 = vadd.f32 %v1875_v13, %v9031_v19  ;;  %v2614_v20 = vpop.f32.mrf.mxu0 }
 0x184   : > { %v5908_v4 = vpop.f32.mrf.mxu1 }
 0x185   : > { %v8479_v7 = vadd.f32 %v2601_v5, %v1964_v21  ;;  %v1969_v9 = vadd.f32 %v5908_v4, %v8339_v57  ;;  %v5943_v48 = vpop.f32.mrf.mxu0 }
 0x186   : > { %v1888_v53 = vpop.f32.mrf.mxu1 }
 0x187   : > { %v8482_v42 = vadd.f32 %v5942_v58, %v1969_v9  ;;  %v1967_v22 = vadd.f32 %v1888_v53, %v8342_v23  ;;  %v2617_v47 = vpop.f32.mrf.mxu0 }
 0x188   : > { %v5909_v2 = vpop.f32.mrf.mxu1 }
 0x189   : > { %v8485_v34 = vadd.f32 %v2614_v20, %v1967_v22  ;;  %v1970_v62 = vadd.f32 %v5909_v2, %v8362_v14  ;;  %v5946_v49 = vpop.f32.mrf.mxu0 }
 0x18a   : > { %v1891_v56 = vpop.f32.mrf.mxu1 }
 0x18b   : > { %v8488_v36 = vadd.f32 %v5943_v48, %v1970_v62  ;;  %v1968_v16 = vadd.f32 %v1891_v56, %v8377_v11  ;;  %v2630_v6 = vpop.f32.mrf.mxu0 }
 0x18c   : > { %v5912_v57 = vpop.f32.mrf.mxu1 }
 0x18d   : > { %9032 = vst [vmem:[#allocation11_spill] sm:$0xff] %v8488_v36  ;;  %v8491_v61 = vadd.f32 %v2617_v47, %v1968_v16  ;;  %v1973_v43 = vadd.f32 %v5912_v57, %v8383_v54  ;;  %v5947_v40 = vpop.f32.mrf.mxu0 }
 0x18e   : > { %v1904_v23 = vpop.f32.mrf.mxu1 }
 0x18f   : > { %9033 = vst [vmem:[#allocation2_spill] sm:$0xff] %v8491_v61  ;;  %v8494_v0 = vadd.f32 %v5946_v49, %v1973_v43  ;;  %v1971_v24 = vadd.f32 %v1904_v23, %v8386_v44  ;;  %v2633_v15 = vpop.f32.mrf.mxu0 }
 0x190   : > { %v5913_v14 = vpop.f32.mrf.mxu1 }
 0x191   : > { %9034 = vst [vmem:[#allocation19_spill] sm:$0xff] %v8494_v0  ;;  %v8497_v28 = vadd.f32 %v2630_v6, %v1971_v24  ;;  %v1974_v3 = vadd.f32 %v5913_v14, %v8395_v33  ;;  %v5950_v5 = vpop.f32.mrf.mxu0 }
 0x192   : > { %v1907_v11 = vpop.f32.mrf.mxu1 }
 0x193   : > { %9035 = vst [vmem:[#allocation14_spill] sm:$0xff] %v8497_v28  ;;  %v8500_v46 = vadd.f32 %v5947_v40, %v1974_v3  ;;  %v1972_v52 = vadd.f32 %v1907_v11, %v8402_v35  ;;  %v2646_v27 = vpop.f32.mrf.mxu0 }
 0x194   : > { %v5916_v54 = vpop.f32.mrf.mxu1 }
 0x195   : > { %9036 = vst [vmem:[#allocation18_spill] sm:$0xff] %v8500_v46  ;;  %v8503_v58 = vadd.f32 %v2633_v15, %v1972_v52  ;;  %v1977_v13 = vadd.f32 %v5916_v54, %v8408_v50  ;;  %v5951_v19 = vpop.f32.mrf.mxu0 }
 0x196   : > { %v1920_v44 = vpop.f32.mrf.mxu1 }
 0x197   : > { %9037 = vst [vmem:[#allocation21_spill] sm:$0xff] %v8503_v58  ;;  %v8506_v21 = vadd.f32 %v5950_v5, %v1977_v13  ;;  %v1975_v20 = vadd.f32 %v1920_v44, %v8411_v59  ;;  %v2649_v4 = vpop.f32.mrf.mxu0 }
 0x198   : > { %v5917_v33 = vpop.f32.mrf.mxu1 }
 0x199   : > { %9038 = vst [vmem:[#allocation23_spill] sm:$0xff] %v8506_v21  ;;  %v8509_v9 = vadd.f32 %v2646_v27, %v1975_v20  ;;  %v1978_v48 = vadd.f32 %v5917_v33, %v8415_v32  ;;  %v5954_v53 = vpop.f32.mrf.mxu0 }
 0x19a   : > { %v1923_v35 = vpop.f32.mrf.mxu1 }
 0x19b   : > { %9039 = vst [vmem:[#allocation25_spill] sm:$0xff] %v8509_v9  ;;  %v8512_v22 = vadd.f32 %v5951_v19, %v1978_v48  ;;  %v1976_v47 = vadd.f32 %v1923_v35, %v8419_v8  ;;  %v2662_v2 = vpop.f32.mrf.mxu0 }
 0x19c   : > { %v5920_v50 = vpop.f32.mrf.mxu1 }
 0x19d   : > { %9040 = vst [vmem:[#allocation5_spill] sm:$0xff] %v8512_v22  ;;  %v8515_v62 = vadd.f32 %v2649_v4, %v1976_v47  ;;  %v1981_v49 = vadd.f32 %v5920_v50, %v8422_v12  ;;  %v5955_v56 = vpop.f32.mrf.mxu0 }
 0x19e   : > { %v1936_v59 = vpop.f32.mrf.mxu1 }
 0x19f   : > { %9041 = vst [vmem:[#allocation6_spill] sm:$0xff] %v8515_v62  ;;  %v8518_v16 = vadd.f32 %v5954_v53, %v1981_v49  ;;  %v1979_v6 = vadd.f32 %v1936_v59, %v8425_v37  ;;  %v2665_v57 = vpop.f32.mrf.mxu0 }
 0x1a0   : > { %v5921_v32 = vpop.f32.mrf.mxu1 }
 0x1a1   : > { %9042 = vst [vmem:[#allocation7_spill] sm:$0xff] %v8518_v16  ;;  %v8521_v43 = vadd.f32 %v2662_v2, %v1979_v6  ;;  %v1982_v40 = vadd.f32 %v5921_v32, %v8428_v39  ;;  %v8524_v23 = vpop.f32.mrf.mxu0 }
 0x1a2   : > { %v1939_v8 = vpop.f32.mrf.mxu1 }
 0x1a3   : > { %9043 = vst [vmem:[#allocation8_spill] sm:$0xff] %v8521_v43  ;;  %v8526_v24 = vadd.f32 %v5955_v56, %v1982_v40  ;;  %v1980_v15 = vadd.f32 %v1939_v8, %v8431_v29  ;;  %v8529_v12 = vpop.f32.mrf.mxu0 }
 0x1a4   : > { %v5960_v14 = vpop.f32.mrf.mxu1 }
 0x1a5   : > { %9044 = vst [vmem:[#allocation9_spill] sm:$0xff] %v8526_v24  ;;  %v8531_v3 = vadd.f32 %v2665_v57, %v1980_v15  ;;  %v8533_v5 = vpop.f32.mrf.mxu0 }
 0x1a6   : > { %v3020_v37 = vpop.f32.mrf.mxu1 }
 0x1a7   : > { %9045 = vst [vmem:[#allocation12_spill] sm:$0xff] %v8531_v3  ;;  %v8535_v11 = vpop.f32.mrf.mxu0 }
 0x1a8   : > { %v5961_v52 = vpop.f32.mrf.mxu1 }
 0x1a9   : > { %v8537_v27 = vpop.f32.mrf.mxu0 }
 0x1aa   : > { %v8539_v39 = vpop.f32.mrf.mxu1 }
 0x1ab   : > { %v8541_v54 = vpop.f32.mrf.mxu0 }
 0x1ac   : > { %v8543_v13 = vpop.f32.mrf.mxu1 }
 0x1ad   : > { %v8545_v29 = vpop.f32.mrf.mxu0 }
 0x1ae   : > { %v8547_v19 = vpop.f32.mrf.mxu1 }
 0x1af   : > { %v8549_v44 = vpop.f32.mrf.mxu0 }
 0x1b0   : > { %v8551_v20 = vpop.f32.mrf.mxu1 }
 0x1b1   : > { %v8553_v4 = vpop.f32.mrf.mxu0 }
 0x1b2   : > { %v8555_v33 = vpop.f32.mrf.mxu1 }
 0x1b3   : > { %v8557_v48 = vpop.f32.mrf.mxu0 }
 0x1b4   : > { %v8559_v53 = vpop.f32.mrf.mxu1 }
 0x1b5   : > { %v8561_v35 = vpop.f32.mrf.mxu0 }
 0x1b6   : > { %v8563_v47 = vpop.f32.mrf.mxu1 }
 0x1b7   : > { %v8565_v2 = vpop.f32.mrf.mxu0 }
 0x1b8   : > { %v8567_v50 = vpop.f32.mrf.mxu1 }
 0x1b9   : > { %v8569_v49 = vpop.f32.mrf.mxu0 }
 0x1ba   : > { %v8571_v56 = vpop.f32.mrf.mxu1 }
 0x1bb   : > { %v8573_v59 = vpop.f32.mrf.mxu0 }
 0x1bc   : > { %v8575_v6 = vpop.f32.mrf.mxu1 }
 0x1bd   : > { %v8577_v57 = vpop.f32.mrf.mxu0 }
 0x1be   : > { %v8579_v32 = vpop.f32.mrf.mxu1 }
 0x1bf   : > { %v8581_v40 = vpop.f32.mrf.mxu0 }
 0x1c0   : > { %v8583_v8 = vpop.f32.mrf.mxu1 }
 0x1c1   : > { %v8585_v15 = vpop.f32.mrf.mxu0 }
 0x1c2   : > { %v8587_v3 = vpop.f32.mrf.mxu1 }
 0x1c3   : > { %v8589_v24 = vpop.f32.mrf.mxu0 }
 0x1c4   : > { %9046 = vst [vmem:[#allocation4_spill] sm:$0xff] %v8589_v24  ;;  %v8591_v43 = vpop.f32.mrf.mxu1 }
 0x1c5   : > { %v8593_v16 = vpop.f32.mrf.mxu0 }
 0x1c6   : > { %9047 = vst [vmem:[#allocation13_spill] sm:$0xff] %v8593_v16  ;;  %v8595_v62 = vpop.f32.mrf.mxu1 }
 0x1c7   : > { %v8597_v22 = vpop.f32.mrf.mxu0 }
 0x1c8   : > { %9048 = vst [vmem:[#allocation17_spill] sm:$0xff] %v8597_v22  ;;  %v8599_v9 = vpop.f32.mrf.mxu1 }
 0x1c9   : > { %9049 = vst [vmem:[#allocation20_spill] sm:$0xff] %v8599_v9  ;;  %v8601_v21 = vpop.f32.mrf.mxu0 }
 0x1ca   : > { %9050 = vst [vmem:[#allocation22_spill] sm:$0xff] %v8601_v21  ;;  %v8603_v58 = vpop.f32.mrf.mxu1 }
 0x1cb   : > { %9051 = vst [vmem:[#allocation24_spill] sm:$0xff] %v8603_v58  ;;  %v8605_v46 = vpop.f32.mrf.mxu0 }
 0x1cc   : > { %9052 = vst [vmem:[#allocation15_spill] sm:$0xff] %v8605_v46  ;;  %v8607_v28 = vpop.f32.mrf.mxu1 }
 0x1cd   : > { %9053 = vst [vmem:[#allocation3_spill] sm:$0xff] %v8607_v28  ;;  %v8609_v0 = vpop.f32.mrf.mxu0 }
 0x1ce   : > { %9054 = vst [vmem:[#allocation16_spill] sm:$0xff] %v8609_v0  ;;  %v8611_v61 = vpop.f32.mrf.mxu1 }
 0x1cf   : > { %9055 = vst [vmem:[#allocation10_spill] sm:$0xff] %v8611_v61  ;;  %v8613_v24 = vpop.f32.mrf.mxu0 }
 0x1d0   : > { %9056 = vst [vmem:[#allocation26_spill] sm:$0xff] %v8613_v24  ;;  %v8615_v16 = vpop.f32.mrf.mxu1 }
 0x1d1   : > { %9057 = vst [vmem:[#allocation27_spill] sm:$0xff] %v8615_v16  ;;  %v8617_v36 = vpop.f32.mrf.mxu0 }
 0x1d2   : > { %9058 = vst [vmem:[#allocation28_spill] sm:$0xff] %v8617_v36  ;;  %v8619_v22 = vpop.f32.mrf.mxu1 }
 0x1d3   : > { %9059 = vst [vmem:[#allocation29_spill] sm:$0xff] %v8619_v22  ;;  %v8621_v9 = vpop.f32.mrf.mxu0 }
 0x1d4   : > { %9060 = vst [vmem:[#allocation30_spill] sm:$0xff] %v8621_v9  ;;  %v8623_v21 = vpop.f32.mrf.mxu1 }
 0x1d5   : > { %9061 = vst [vmem:[#allocation31_spill] sm:$0xff] %v8623_v21  ;;  %v8625_v58 = vpop.f32.mrf.mxu0 }
 0x1d6   : > { %9062 = vst [vmem:[#allocation32_spill] sm:$0xff] %v8625_v58  ;;  %v8627_v46 = vpop.f32.mrf.mxu1  ;;  %v3149_v58 = vadd.f32 %v5960_v14, %v8434_v17  ;;  %v3148_v17 = vadd.f32 %v8539_v39, %v8443_v18 }
 0x1d7   : > { %9063 = vst [vmem:[#allocation33_spill] sm:$0xff] %v8627_v46  ;;  %v8629_v28 = vpop.f32.mrf.mxu0 }
 0x1d8   : > { %9064 = vst [vmem:[#allocation34_spill] sm:$0xff] %v8629_v28  ;;  %v8631_v0 = vpop.f32.mrf.mxu1  ;;  %v3147_v28 = vadd.f32 %v3020_v37, %v8437_v63  ;;  %v8661_v63 = vld [vmem:[%s8856_s2] ss:$0 sm:$0xff] }
 0x1d9   : > { %9065 = vst [vmem:[#allocation35_spill] sm:$0xff] %v8631_v0  ;;  %v8633_v61 = vpop.f32.mrf.mxu0 }
 0x1da   : > { %9066 = vst [vmem:[#allocation36_spill] sm:$0xff] %v8633_v61  ;;  %v8635_v24 = vpop.f32.mrf.mxu1 }
 0x1db   : > { %9067 = vst [vmem:[#allocation37_spill] sm:$0xff] %v8635_v24  ;;  %v8637_v16 = vpop.f32.mrf.mxu0  ;;  %v3508_v24 = vadd.f32 %v8524_v23, %v3149_v58 }
 0x1dc   : > { %9068 = vst [vmem:[#allocation38_spill] sm:$0xff] %v8637_v16  ;;  %v8639_v36 = vpop.f32.mrf.mxu1  ;;  %v3150_v16 = vadd.f32 %v5961_v52, %v8440_v10 }
 0x1dd   : > { %9069 = vst [vmem:[#allocation39_spill] sm:$0xff] %v8639_v36  ;;  %v8641_v22 = vpop.f32.mrf.mxu0 }
 0x1de   : > { %9070 = vst [vmem:[#allocation40_spill] sm:$0xff] %v8641_v22  ;;  %v8643_v9 = vpop.f32.mrf.mxu1  ;;  %v3509_v58 = vadd.f32 %v8533_v5, %v3150_v16 }
 0x1df   : > { %9071 = vst [vmem:[#allocation41_spill] sm:$0xff] %v8643_v9  ;;  %v8646_v21 = vpop.f32.mrf.mxu0  ;;  %v3506_v9 = vadd.f32 %v8529_v12, %v3147_v28  ;;  %v3151_v28 = vadd.f32 %v8547_v19, %v8449_v38  ;;  %v3152_v19 = vadd.f32 %v8555_v33, %v8455_v41  ;;  %v3157_v41 = vadd.f32 %v8559_v53, %v8458_v30 }
 0x1e0   : > { %9072 = vst [vmem:[#allocation42_spill] sm:$0xff] %v8646_v21  ;;  %v8648_v46 = vpop.f32.mrf.mxu1 }
 0x1e1   : > { %9073 = vst [vmem:[#allocation43_spill] sm:$0xff] %v8648_v46  ;;  %v6062_v0 = vpop.f32.mrf.mxu0 }
 0x1e2   : > { %v8651_v61 = vpop.f32.mrf.mxu1 }
 0x1e3   : > { %9074 = vst [vmem:[#allocation44_spill] sm:$0xff] %v8651_v61  ;;  %v4575_v36 = vpop.f32.mrf.mxu0  ;;  %v3153_v61 = vadd.f32 %v8543_v13, %v8446_v25 }
 0x1e4   : > { %v6028_v22 = vpop.f32.mrf.mxu1 }
 0x1e5   : > { %v4234_v14 = vadd.f32 %v6028_v22, %v3508_v24  ;;  %v6063_v21 = vpop.f32.mrf.mxu0  ;;  %v3507_v22 = vadd.f32 %v8535_v11, %v3148_v17  ;;  %v3512_v38 = vadd.f32 %v8537_v27, %v3153_v61  ;;  %v3510_v11 = vadd.f32 %v8541_v54, %v3151_v28 }
 0x1e6   : > { %v4105_v37 = vpop.f32.mrf.mxu1 }
 0x1e7   : > { %v4704_v23 = vadd.f32 %v6062_v0, %v4234_v14  ;;  %v4232_v10 = vadd.f32 %v4105_v37, %v3506_v9  ;;  %v4578_v52 = vpop.f32.mrf.mxu0  ;;  %v3154_v0 = vadd.f32 %v8551_v20, %v8452_v1 }
 0x1e8   : > { %v6029_v18 = vpop.f32.mrf.mxu1 }
 0x1e9   : > { %v4743_v24 = vadd.f32 %v8661_v63, %v4704_v23  ;;  %v4702_v12 = vadd.f32 %v4575_v36, %v4232_v10  ;;  %v4235_v39 = vadd.f32 %v6029_v18, %v3509_v58  ;;  %v6066_v46 = vpop.f32.mrf.mxu0  ;;  %v3513_v27 = vadd.f32 %v8545_v29, %v3154_v0 }
 0x1ea   : > { %v4108_v9 = vpop.f32.mrf.mxu1  ;;  %v3511_v18 = vadd.f32 %v8549_v44, %v3152_v19  ;;  %v3155_v0 = vadd.f32 %v8563_v47, %v8461_v31 }
 0x1eb   : > { %v4775_v16 = vmax.f32 %v4743_v24, 0.0  ;;  %v4741_v5 = vadd.f32 %v8661_v63, %v4702_v12  ;;  %v4705_v25 = vadd.f32 %v6063_v21, %v4235_v39  ;;  %v4233_v13 = vadd.f32 %v4108_v9, %v3507_v22  ;;  %v4591_v14 = vpop.f32.mrf.mxu0 }
 0x1ec   : > { %v6032_v1 = vpop.f32.mrf.mxu1  ;;  %v3516_v39 = vadd.f32 %v8553_v4, %v3157_v41  ;;  %v3158_v9 = vadd.f32 %v8567_v50, %v8464_v45  ;;  %v3156_v4 = vadd.f32 %v8571_v56, %v8467_v60 }
 0x1ed   : > { %v5603_v36 = vpack.c.bf16 %v4775_v16, %v4775_v16  ;;  %v4773_v20 = vmax.f32 %v4741_v5, 0.0  ;;  %v4744_v21 = vadd.f32 %v8661_v63, %v4705_v25  ;;  %v4703_v17 = vadd.f32 %v4578_v52, %v4233_v13  ;;  %v6067_v61 = vpop.f32.mrf.mxu0 }
 0x1ee   : > { %v4238_v54 = vadd.f32 %v6032_v1, %v3512_v38  ;;  %v4121_v33 = vpop.f32.mrf.mxu1  ;;  %v3514_v1 = vadd.f32 %v8557_v48, %v3155_v0 }
 0x1ef   : > { %4936 = vst.msk [vmem:[%s8681_s15 + $0x8] sm:$0xf] %vm4933_vm9, %v5603_v36  ;;  %v5601_v37 = vpack.c.bf16 %v4773_v20, %v4773_v20  ;;  %v4776_v58 = vmax.f32 %v4744_v21, 0.0  ;;  %v4742_v23 = vadd.f32 %v8661_v63, %v4703_v17  ;;  %v4236_v10 = vadd.f32 %v4121_v33, %v3510_v11  ;;  %v4594_v28 = vpop.f32.mrf.mxu0 }
 0x1f0   : > { %v4708_v52 = vadd.f32 %v6066_v46, %v4238_v54  ;;  %v6033_v22 = vpop.f32.mrf.mxu1  ;;  %v3517_v36 = vadd.f32 %v8561_v35, %v3158_v9  ;;  %v3161_v20 = vadd.f32 %v8575_v6, %v8470_v26  ;;  %v3515_v54 = vadd.f32 %v8565_v2, %v3156_v4 }
 0x1f1   : > { %4934 = vst.msk [vmem:[%s8681_s15] sm:$0xf] %vm4933_vm9, %v5601_v37  ;;  %v5604_v29 = vpack.c.bf16 %v4776_v58, %v4776_v58  ;;  %v4774_v24 = vmax.f32 %v4742_v23, 0.0  ;;  %v4706_v30 = vadd.f32 %v4591_v14, %v4236_v10  ;;  %v4239_v53 = vadd.f32 %v6033_v22, %v3513_v27  ;;  %v6070_v12 = vpop.f32.mrf.mxu0 }
 0x1f2   : > { %v4747_v44 = vadd.f32 %v8661_v63, %v4708_v52  ;;  %v4124_v46 = vpop.f32.mrf.mxu1  ;;  %v3159_v33 = vadd.f32 %v8579_v32, %v8473_v51  ;;  %v3520_v10 = vadd.f32 %v8569_v49, %v3161_v20 }
 0x1f3   : > { %4937 = vst.msk [vmem:[%s8681_s15 + $0xc] sm:$0xf] %vm4933_vm9, %v5604_v29  ;;  %v5602_v16 = vpack.c.bf16 %v4774_v24, %v4774_v24  ;;  %v4745_v5 = vadd.f32 %v8661_v63, %v4706_v30  ;;  %v4709_v25 = vadd.f32 %v6067_v61, %v4239_v53  ;;  %v4237_v13 = vadd.f32 %v4124_v46, %v3511_v18  ;;  %v4607_v14 = vpop.f32.mrf.mxu0 }
 0x1f4   : > { %v4779_v38 = vmax.f32 %v4747_v44, 0.0  ;;  %v6036_v11 = vpop.f32.mrf.mxu1  ;;  %v3518_v29 = vadd.f32 %v8573_v59, %v3159_v33  ;;  %v3162_v24 = vadd.f32 %v8583_v8, %v8476_v55  ;;  %v3160_v30 = vadd.f32 %v8587_v3, %v8479_v7 }
 0x1f5   : > { %4935 = vst.msk [vmem:[%s8681_s15 + $0x4] sm:$0xf] %vm4933_vm9, %v5602_v16  ;;  %v4777_v31 = vmax.f32 %v4745_v5, 0.0  ;;  %v4748_v45 = vadd.f32 %v8661_v63, %v4709_v25  ;;  %v4707_v47 = vadd.f32 %v4594_v28, %v4237_v13  ;;  %v4242_v50 = vadd.f32 %v6036_v11, %v3516_v39  ;;  %v6071_v19 = vpop.f32.mrf.mxu0 }
 0x1f6   : > { %v5607_v60 = vpack.c.bf16 %v4779_v38, %v4779_v38  ;;  %v4137_v56 = vpop.f32.mrf.mxu1  ;;  %v3165_v59 = vadd.f32 %v8591_v43, %v8482_v42  ;;  %v3521_v25 = vadd.f32 %v8577_v57, %v3162_v24  ;;  %v3519_v13 = vadd.f32 %v8581_v40, %v3160_v30  ;;  %v9084_v24 = vld [vmem:[#allocation10_spill] sm:$0xff] }
 0x1f7   : > { %v5605_v21 = vpack.c.bf16 %v4777_v31, %v4777_v31  ;;  %v4780_v17 = vmax.f32 %v4748_v45, 0.0  ;;  %v4746_v61 = vadd.f32 %v8661_v63, %v4707_v47  ;;  %v4712_v27 = vadd.f32 %v6070_v12, %v4242_v50  ;;  %v4610_v41 = vpop.f32.mrf.mxu0  ;;  %v9075_v50 = vld [vmem:[#allocation11_spill] sm:$0xff] }
 0x1f8   : > { %4940 = vst.msk [vmem:[%s8681_s15 + $0x18] sm:$0xf] %vm4933_vm9, %v5607_v60  ;;  %v4240_v48 = vadd.f32 %v4137_v56, %v3514_v1  ;;  %v6037_v35 = vpop.f32.mrf.mxu1  ;;  %v3524_v47 = vadd.f32 %v8585_v15, %v3165_v59  ;;  %v9077_v56 = vld [vmem:[#allocation4_spill] sm:$0xff]  ;;  %v9085_v59 = vld [vmem:[#allocation17_spill] sm:$0xff] }
 0x1f9   : > { %4938 = vst.msk [vmem:[%s8681_s15 + $0x10] sm:$0xf] %vm4933_vm9, %v5605_v21  ;;  %v5608_v26 = vpack.c.bf16 %v4780_v17, %v4780_v17  ;;  %v4778_v6 = vmax.f32 %v4746_v61, 0.0  ;;  %v4751_v37 = vadd.f32 %v8661_v63, %v4712_v27  ;;  %v4243_v58 = vadd.f32 %v6037_v35, %v3517_v36  ;;  %v6074_v23 = vpop.f32.mrf.mxu0 }
 0x1fa   : > { %v4710_v28 = vadd.f32 %v4607_v14, %v4240_v48  ;;  %v4140_v2 = vpop.f32.mrf.mxu1  ;;  %v3163_v14 = vadd.f32 %v8595_v62, %v8485_v34  ;;  %v9078_v48 = vld [vmem:[#allocation13_spill] sm:$0xff] }
 0x1fb   : > { %4941 = vst.msk [vmem:[%s8681_s15 + $0x1c] sm:$0xf] %vm4933_vm9, %v5608_v26  ;;  %v5606_v51 = vpack.c.bf16 %v4778_v6, %v4778_v6  ;;  %v4783_v32 = vmax.f32 %v4751_v37, 0.0  ;;  %v4713_v18 = vadd.f32 %v6071_v19, %v4243_v58  ;;  %v4241_v52 = vadd.f32 %v4140_v2, %v3515_v54  ;;  %v4623_v22 = vpop.f32.mrf.mxu0  ;;  %v9076_v19 = vld [vmem:[#allocation20_spill] sm:$0xff]  ;;  %v9079_v26 = vld [vmem:[#allocation2_spill] sm:$0xff]  ;;  %v9081_v58 = vld [vmem:[#allocation19_spill] sm:$0xff] }
 0x1fc   : > { %v4749_v49 = vadd.f32 %v8661_v63, %v4710_v28  ;;  %v6040_v53 = vpop.f32.mrf.mxu1  ;;  %v3166_v1 = vadd.f32 %v9076_v19, %v9075_v50  ;;  %v3522_v21 = vadd.f32 %v9077_v56, %v3163_v14  ;;  %v9080_v6 = vld [vmem:[#allocation24_spill] sm:$0xff] }
 0x1fd   : > { %4939 = vst.msk [vmem:[%s8681_s15 + $0x14] sm:$0xf] %vm4933_vm9, %v5606_v51  ;;  %v5611_v12 = vpack.c.bf16 %v4783_v32, %v4783_v32  ;;  %v4752_v39 = vadd.f32 %v8661_v63, %v4713_v18  ;;  %v4711_v0 = vadd.f32 %v4610_v41, %v4241_v52  ;;  %v4246_v9 = vadd.f32 %v6040_v53, %v3520_v10  ;;  %v6075_v44 = vpop.f32.mrf.mxu0 }
 0x1fe   : > { %v4781_v46 = vmax.f32 %v4749_v49, 0.0  ;;  %v4153_v16 = vpop.f32.mrf.mxu1  ;;  %v3525_v35 = vadd.f32 %v9078_v48, %v3166_v1  ;;  %v3164_v37 = vadd.f32 %v9080_v6, %v9079_v26  ;;  %v9095_v48 = vld [vmem:[#allocation31_spill] sm:$0xff]  ;;  %v9096_v26 = vld [vmem:[#allocation25_spill] sm:$0xff] }
 0x1ff   : > { %4944 = vst.msk [vmem:[%s8681_s15 + $0x28] sm:$0xf] %vm4933_vm9, %v5611_v12  ;;  %v4784_v55 = vmax.f32 %v4752_v39, 0.0  ;;  %v4750_v7 = vadd.f32 %v8661_v63, %v4711_v0  ;;  %v4716_v3 = vadd.f32 %v6074_v23, %v4246_v9  ;;  %v4244_v8 = vadd.f32 %v4153_v16, %v3518_v29  ;;  %v4626_v5 = vpop.f32.mrf.mxu0  ;;  %v9082_v23 = vld [vmem:[#allocation3_spill] sm:$0xff]  ;;  %v9083_v29 = vld [vmem:[#allocation14_spill] sm:$0xff]  ;;  %v9097_v6 = vld [vmem:[#allocation33_spill] sm:$0xff] }
 0x200   : > { %v5609_v42 = vpack.c.bf16 %v4781_v46, %v4781_v46  ;;  %v6041_v43 = vpop.f32.mrf.mxu1  ;;  %v3169_v10 = vadd.f32 %v9082_v23, %v9081_v58  ;;  %v3167_v30 = vadd.f32 %v9084_v24, %v9083_v29  ;;  %v3523_v46 = vadd.f32 %v9085_v59, %v3164_v37  ;;  %v9086_v16 = vld [vmem:[#allocation22_spill] sm:$0xff] }
 0x201   : > { %v5612_v4 = vpack.c.bf16 %v4784_v55, %v4784_v55  ;;  %v4782_v38 = vmax.f32 %v4750_v7, 0.0  ;;  %v4755_v11 = vadd.f32 %v8661_v63, %v4716_v3  ;;  %v4714_v31 = vadd.f32 %v4623_v22, %v4244_v8  ;;  %v6078_v45 = vpop.f32.mrf.mxu0  ;;  %v9087_v7 = vld [vmem:[#allocation18_spill] sm:$0xff]  ;;  %v9088_v3 = vld [vmem:[#allocation27_spill] sm:$0xff] }
 0x202   : > { %4942 = vst.msk [vmem:[%s8681_s15 + $0x20] sm:$0xf] %vm4933_vm9, %v5609_v42  ;;  %v4247_v57 = vadd.f32 %v6041_v43, %v3521_v25  ;;  %v4156_v40 = vpop.f32.mrf.mxu1  ;;  %v3528_v55 = vadd.f32 %v9086_v16, %v3169_v10  ;;  %v3170_v8 = vadd.f32 %v9088_v3, %v9087_v7  ;;  %v3171_v37 = vadd.f32 %v9097_v6, %v9096_v26  ;;  %v9103_v16 = vld [vmem:[#allocation37_spill] sm:$0xff] }
 0x203   : > { %4945 = vst.msk [vmem:[%s8681_s15 + $0x2c] sm:$0xf] %vm4933_vm9, %v5612_v4  ;;  %v5610_v34 = vpack.c.bf16 %v4782_v38, %v4782_v38  ;;  %v4787_v62 = vmax.f32 %v4755_v11, 0.0  ;;  %v4753_v36 = vadd.f32 %v8661_v63, %v4714_v31  ;;  %v4245_v20 = vadd.f32 %v4156_v40, %v3519_v13  ;;  %v4639_v60 = vpop.f32.mrf.mxu0  ;;  %v9089_v38 = vld [vmem:[#allocation15_spill] sm:$0xff]  ;;  %v9090_v31 = vld [vmem:[#allocation21_spill] sm:$0xff] }
 0x204   : > { %v4717_v17 = vadd.f32 %v6075_v44, %v4247_v57  ;;  %v6044_v15 = vpop.f32.mrf.mxu1  ;;  %v3526_v11 = vadd.f32 %v9089_v38, %v3167_v30  ;;  %v9106_v38 = vld [vmem:[#allocation39_spill] sm:$0xff] }
 0x205   : > { %4943 = vst.msk [vmem:[%s8681_s15 + $0x24] sm:$0xf] %vm4933_vm9, %v5610_v34  ;;  %v5615_v61 = vpack.c.bf16 %v4787_v62, %v4787_v62  ;;  %v4785_v27 = vmax.f32 %v4753_v36, 0.0  ;;  %v4715_v41 = vadd.f32 %v4626_v5, %v4245_v20  ;;  %v4250_v54 = vadd.f32 %v6044_v15, %v3524_v47  ;;  %v6079_v33 = vpop.f32.mrf.mxu0  ;;  %v9092_v36 = vld [vmem:[#allocation16_spill] sm:$0xff] }
 0x206   : > { %v4756_v28 = vadd.f32 %v8661_v63, %v4717_v17  ;;  %v4169_v2 = vpop.f32.mrf.mxu1  ;;  %v3529_v20 = vadd.f32 %v9092_v36, %v3170_v8 }
 0x207   : > { %4948 = vst.msk [vmem:[%s8681_s15 + $0x38] sm:$0xf] %vm4933_vm9, %v5615_v61  ;;  %v5613_v51 = vpack.c.bf16 %v4785_v27, %v4785_v27  ;;  %v4754_v32 = vadd.f32 %v8661_v63, %v4715_v41  ;;  %v4720_v18 = vadd.f32 %v6078_v45, %v4250_v54  ;;  %v4248_v52 = vadd.f32 %v4169_v2, %v3522_v21  ;;  %v4642_v22 = vpop.f32.mrf.mxu0  ;;  %v9091_v45 = vld [vmem:[#allocation29_spill] sm:$0xff]  ;;  %v9093_v41 = vld [vmem:[#allocation26_spill] sm:$0xff] }
 0x208   : > { %v4788_v49 = vmax.f32 %v4756_v28, 0.0  ;;  %v6045_v53 = vpop.f32.mrf.mxu1  ;;  %v3168_v47 = vadd.f32 %v9091_v45, %v9090_v31 }
 0x209   : > { %4946 = vst.msk [vmem:[%s8681_s15 + $0x30] sm:$0xf] %vm4933_vm9, %v5613_v51  ;;  %v4786_v12 = vmax.f32 %v4754_v32, 0.0  ;;  %v4759_v39 = vadd.f32 %v8661_v63, %v4720_v18  ;;  %v4718_v0 = vadd.f32 %v4639_v60, %v4248_v52  ;;  %v4251_v9 = vadd.f32 %v6045_v53, %v3525_v35  ;;  %v9098_v18 = vld [vmem:[#allocation5_spill] sm:$0xff]  ;;  %v9099_v52 = vld [vmem:[#allocation35_spill] sm:$0xff] }
 0x20a   : > { %v6082_v44 = vpop.f32.mrf.mxu0  ;;  %v5616_v5 = vpack.c.bf16 %v4788_v49, %v4788_v49  ;;  %v4172_v25 = vpop.f32.mrf.mxu1  ;;  %v3527_v54 = vadd.f32 %v9093_v41, %v3168_v47  ;;  %v9110_v41 = vld [vmem:[#allocation41_spill] sm:$0xff] }
 0x20b   : > { %v5614_v13 = vpack.c.bf16 %v4786_v12, %v4786_v12  ;;  %v4791_v14 = vmax.f32 %v4759_v39, 0.0  ;;  %v4757_v42 = vadd.f32 %v8661_v63, %v4718_v0  ;;  %v4721_v43 = vadd.f32 %v6079_v33, %v4251_v9  ;;  %v9094_v33 = vld [vmem:[#allocation23_spill] sm:$0xff]  ;;  %v9100_v0 = vld [vmem:[#allocation28_spill] sm:$0xff] }
 0x20c   : > { %v4655_v4 = vpop.f32.mrf.mxu0  ;;  %4949 = vst.msk [vmem:[%s8681_s15 + $0x3c] sm:$0xf] %vm4933_vm9, %v5616_v5  ;;  %v4249_v50 = vadd.f32 %v4172_v25, %v3523_v46  ;;  %v6048_v19 = vpop.f32.mrf.mxu1  ;;  %v3173_v35 = vadd.f32 %v9095_v48, %v9094_v33  ;;  %v9102_v46 = vld [vmem:[#allocation6_spill] sm:$0xff]  ;;  %v9111_v33 = vld [vmem:[#allocation9_spill] sm:$0xff]  ;;  %v9112_v48 = vld [vmem:[#allocation43_spill] sm:$0xff] }
 0x20d   : > { %4947 = vst.msk [vmem:[%s8681_s15 + $0x34] sm:$0xf] %vm4933_vm9, %v5614_v13  ;;  %v5619_v1 = vpack.c.bf16 %v4791_v14, %v4791_v14  ;;  %v4789_v57 = vmax.f32 %v4757_v42, 0.0  ;;  %v4760_v40 = vadd.f32 %v8661_v63, %v4721_v43  ;;  %v4254_v34 = vadd.f32 %v6048_v19, %v3528_v55  ;;  %v9104_v42 = vld [vmem:[#allocation32_spill] sm:$0xff] }
 0x20e   : > { %v6083_v62 = vpop.f32.mrf.mxu0  ;;  %v4719_v60 = vadd.f32 %v4642_v22, %v4249_v50  ;;  %v4185_v56 = vpop.f32.mrf.mxu1  ;;  %v3174_v22 = vadd.f32 %v9099_v52, %v9098_v18  ;;  %v3532_v9 = vadd.f32 %v9100_v0, %v3173_v35  ;;  %v3172_v55 = vadd.f32 %v9103_v16, %v9102_v46 }
 0x20f   : > { %4952 = vst.msk [vmem:[%s8681_s15 + $0x48] sm:$0xf] %vm4933_vm9, %v5619_v1  ;;  %v5617_v21 = vpack.c.bf16 %v4789_v57, %v4789_v57  ;;  %v4792_v17 = vmax.f32 %v4760_v40, 0.0  ;;  %v4724_v15 = vadd.f32 %v6082_v44, %v4254_v34  ;;  %v4252_v61 = vadd.f32 %v4185_v56, %v3526_v11  ;;  %v9101_v44 = vld [vmem:[#allocation30_spill] sm:$0xff] }
 0x210   : > { %v4658_v27 = vpop.f32.mrf.mxu0  ;;  %v4758_v58 = vadd.f32 %v8661_v63, %v4719_v60  ;;  %v6049_v23 = vpop.f32.mrf.mxu1  ;;  %v3530_v59 = vadd.f32 %v9101_v44, %v3171_v37  ;;  %v3533_v43 = vadd.f32 %v9104_v42, %v3174_v22  ;;  %v9107_v40 = vld [vmem:[#allocation34_spill] sm:$0xff]  ;;  %v3178_v35 = vadd.f32 %v9112_v48, %v9111_v33 }
 0x211   : > { %4950 = vst.msk [vmem:[%s8681_s15 + $0x40] sm:$0xf] %vm4933_vm9, %v5617_v21  ;;  %v5620_v10 = vpack.c.bf16 %v4792_v17, %v4792_v17  ;;  %v4763_v28 = vadd.f32 %v8661_v63, %v4724_v15  ;;  %v4722_v2 = vadd.f32 %v4655_v4, %v4252_v61  ;;  %v4255_v51 = vadd.f32 %v6049_v23, %v3529_v20  ;;  %v9105_v4 = vld [vmem:[#allocation7_spill] sm:$0xff]  ;;  %v9108_v15 = vld [vmem:[#allocation36_spill] sm:$0xff] }
 0x212   : > { %v6086_v32 = vpop.f32.mrf.mxu0  ;;  %v4790_v29 = vmax.f32 %v4758_v58, 0.0  ;;  %v4188_v24 = vpop.f32.mrf.mxu1  ;;  %v3177_v11 = vadd.f32 %v9106_v38, %v9105_v4  ;;  %v3531_v34 = vadd.f32 %v9107_v40, %v3172_v55  ;;  %v9117_v55 = vld [vmem:[#allocation42_spill] sm:$0xff] }
 0x213   : > { %4953 = vst.msk [vmem:[%s8681_s15 + $0x4c] sm:$0xf] %vm4933_vm9, %v5620_v10  ;;  %v4795_v30 = vmax.f32 %v4763_v28, 0.0  ;;  %v4761_v49 = vadd.f32 %v8661_v63, %v4722_v2  ;;  %v4725_v53 = vadd.f32 %v6083_v62, %v4255_v51  ;;  %v4253_v12 = vadd.f32 %v4188_v24, %v3527_v54  ;;  %v9113_v28 = vld [vmem:[#allocation12_spill] sm:$0xff] }
 0x214   : > { %v4671_v39 = vpop.f32.mrf.mxu0  ;;  %v5618_v7 = vpack.c.bf16 %v4790_v29, %v4790_v29  ;;  %v6052_v3 = vpop.f32.mrf.mxu1  ;;  %v3536_v61 = vadd.f32 %v9108_v15, %v3177_v11  ;;  %v9114_v2 = vld [vmem:[#allocation44_spill] sm:$0xff] }
 0x215   : > { %v5623_v8 = vpack.c.bf16 %v4795_v30, %v4795_v30  ;;  %v4793_v5 = vmax.f32 %v4761_v49, 0.0  ;;  %v4764_v25 = vadd.f32 %v8661_v63, %v4725_v53  ;;  %v4723_v13 = vadd.f32 %v4658_v27, %v4253_v12  ;;  %v9109_v27 = vld [vmem:[#allocation8_spill] sm:$0xff]  ;;  %v9115_v49 = vld [vmem:[#allocation38_spill] sm:$0xff] }
 0x216   : > { %v6087_v14 = vpop.f32.mrf.mxu0  ;;  %4951 = vst.msk [vmem:[%s8681_s15 + $0x44] sm:$0xf] %vm4933_vm9, %v5618_v7  ;;  %v4258_v31 = vadd.f32 %v6052_v3, %v3532_v9  ;;  %v4201_v45 = vpop.f32.mrf.mxu1  ;;  %v3175_v54 = vadd.f32 %v9110_v41, %v9109_v27  ;;  %v3176_v51 = vadd.f32 %v9114_v2, %v9113_v28  ;;  %v9116_v12 = vld [vmem:[#allocation40_spill] sm:$0xff] }
 0x217   : > { %4956 = vst.msk [vmem:[%s8681_s15 + $0x58] sm:$0xf] %vm4933_vm9, %v5623_v8  ;;  %v5621_v47 = vpack.c.bf16 %v4793_v5, %v4793_v5  ;;  %v4796_v50 = vmax.f32 %v4764_v25, 0.0  ;;  %v4762_v19 = vadd.f32 %v8661_v63, %v4723_v13  ;;  %v4256_v1 = vadd.f32 %v4201_v45, %v3530_v59 }
 0x218   : > { %v4674_v57 = vpop.f32.mrf.mxu0  ;;  %v4728_v62 = vadd.f32 %v6086_v32, %v4258_v31  ;;  %v6053_v36 = vpop.f32.mrf.mxu1  ;;  %v3534_v53 = vadd.f32 %v9115_v49, %v3175_v54  ;;  %v3535_v7 = vadd.f32 %v9117_v55, %v3176_v51 }
 0x219   : > { %4954 = vst.msk [vmem:[%s8681_s15 + $0x50] sm:$0xf] %vm4933_vm9, %v5621_v47  ;;  %v5624_v20 = vpack.c.bf16 %v4796_v50, %v4796_v50  ;;  %v4794_v60 = vmax.f32 %v4762_v19, 0.0  ;;  %v4726_v56 = vadd.f32 %v4671_v39, %v4256_v1  ;;  %v4259_v21 = vadd.f32 %v6053_v36, %v3533_v43 }
 0x21a   : > { %v6090_v17 = vpop.f32.mrf.mxu0  ;;  %v4767_v26 = vadd.f32 %v8661_v63, %v4728_v62  ;;  %v4204_v6 = vpop.f32.mrf.mxu1  ;;  %v3537_v39 = vadd.f32 %v9116_v12, %v3178_v35 }
 0x21b   : > { %4957 = vst.msk [vmem:[%s8681_s15 + $0x5c] sm:$0xf] %vm4933_vm9, %v5624_v20  ;;  %v5622_v37 = vpack.c.bf16 %v4794_v60, %v4794_v60  ;;  %v4765_v58 = vadd.f32 %v8661_v63, %v4726_v56  ;;  %v4729_v23 = vadd.f32 %v6087_v14, %v4259_v21  ;;  %v4257_v10 = vadd.f32 %v4204_v6, %v3531_v34 }
 0x21c   : > { %v4799_v32 = vmax.f32 %v4767_v26, 0.0  ;;  %v6056_v18 = vpop.f32.mrf.mxu1  ;;  %v4687_v52 = vpop.f32.mrf.mxu0 }
 0x21d   : > { %4955 = vst.msk [vmem:[%s8681_s15 + $0x54] sm:$0xf] %vm4933_vm9, %v5622_v37  ;;  %v4797_v22 = vmax.f32 %v4765_v58, 0.0  ;;  %v4768_v29 = vadd.f32 %v8661_v63, %v4729_v23  ;;  %v4727_v24 = vadd.f32 %v4674_v57, %v4257_v10  ;;  %v4262_v30 = vadd.f32 %v6056_v18, %v3536_v61 }
 0x21e   : > { %v5627_v0 = vpack.c.bf16 %v4799_v32, %v4799_v32  ;;  %v4217_v9 = vpop.f32.mrf.mxu1  ;;  %v6091_v5 = vpop.f32.mrf.mxu0 }
 0x21f   : > { %v5625_v44 = vpack.c.bf16 %v4797_v22, %v4797_v22  ;;  %v4800_v59 = vmax.f32 %v4768_v29, 0.0  ;;  %v4766_v46 = vadd.f32 %v8661_v63, %v4727_v24  ;;  %v4732_v16 = vadd.f32 %v6090_v17, %v4262_v30 }
 0x220   : > { %4960 = vst.msk [vmem:[%s8681_s15 + $0x68] sm:$0xf] %vm4933_vm9, %v5627_v0  ;;  %v4260_v3 = vadd.f32 %v4217_v9, %v3534_v53  ;;  %v6057_v8 = vpop.f32.mrf.mxu1  ;;  %v4690_v50 = vpop.f32.mrf.mxu0 }
 0x221   : > { %4958 = vst.msk [vmem:[%s8681_s15 + $0x60] sm:$0xf] %vm4933_vm9, %v5625_v44  ;;  %v5628_v25 = vpack.c.bf16 %v4800_v59, %v4800_v59  ;;  %v4798_v13 = vmax.f32 %v4766_v46, 0.0  ;;  %v4771_v14 = vadd.f32 %v8661_v63, %v4732_v16  ;;  %v4263_v42 = vadd.f32 %v6057_v8, %v3537_v39 }
 0x222   : > { %v4730_v43 = vadd.f32 %v4687_v52, %v4260_v3  ;;  %v4220_v4 = vpop.f32.mrf.mxu1 }
 0x223   : > { %4961 = vst.msk [vmem:[%s8681_s15 + $0x6c] sm:$0xf] %vm4933_vm9, %v5628_v25  ;;  %v5626_v38 = vpack.c.bf16 %v4798_v13, %v4798_v13  ;;  %v4803_v11 = vmax.f32 %v4771_v14, 0.0  ;;  %v4733_v31 = vadd.f32 %v6091_v5, %v4263_v42  ;;  %v4261_v45 = vadd.f32 %v4220_v4, %v3535_v7 }
 0x224   : > { %v4769_v47 = vadd.f32 %v8661_v63, %v4730_v43 }
 0x225   : > { %4959 = vst.msk [vmem:[%s8681_s15 + $0x64] sm:$0xf] %vm4933_vm9, %v5626_v38  ;;  %v5631_v19 = vpack.c.bf16 %v4803_v11, %v4803_v11  ;;  %v4772_v1 = vadd.f32 %v8661_v63, %v4733_v31  ;;  %v4731_v57 = vadd.f32 %v4690_v50, %v4261_v45 }
 0x226   : > { %v4801_v40 = vmax.f32 %v4769_v47, 0.0 }
 0x227   : > { %4964 = vst.msk [vmem:[%s8681_s15 + $0x78] sm:$0xf] %vm4933_vm9, %v5631_v19  ;;  %v4804_v34 = vmax.f32 %v4772_v1, 0.0  ;;  %v4770_v62 = vadd.f32 %v8661_v63, %v4731_v57 }
 0x228   : > { %v5629_v36 = vpack.c.bf16 %v4801_v40, %v4801_v40 }
 0x229   : > { %v5632_v20 = vpack.c.bf16 %v4804_v34, %v4804_v34  ;;  %v4802_v60 = vmax.f32 %v4770_v62, 0.0 }
 0x22a   : > { %4962 = vst.msk [vmem:[%s8681_s15 + $0x70] sm:$0xf] %vm4933_vm9, %v5629_v36 }
 0x22b   : > { %4965 = vst.msk [vmem:[%s8681_s15 + $0x7c] sm:$0xf] %vm4933_vm9, %v5632_v20  ;;  %v5630_v56 = vpack.c.bf16 %v4802_v60, %v4802_v60 }
 0x22d   : > { %4963 = vst.msk [vmem:[%s8681_s15 + $0x74] sm:$0xf] %vm4933_vm9, %v5630_v56 }
 0x22e PF: > { %s13_s12 = sadd.s32 1, %s6163_s12  }
 0x22f   : > { %p10_p4 = scmp.ge.s32.totalorder %s13_s12, 4  }
 0x231   :  { %12 = sbr.rel (!%p10_p4) target bundleno = 1 (0x1), region = 72 }

</bundles_post_ra>
